<compile_context>
chip_gen: v7x
topology: tpu7x:2x2x1
jax: 0.10.0
libtpu: 0.0.40
codegen_flags: <defaults>
</compile_context>

<pallas_src>
import jax
import jax.numpy as jnp
from jax import lax
from jax.experimental import pallas as pl
from jax.experimental.pallas import tpu as pltpu


# ---------------------------------------------------------------------------
# In-kernel building blocks
# ---------------------------------------------------------------------------
def _even_row_selector(lp, lm):
    """(lp, lm) f32 0/1 matrix with sel[r, c] = (c == 2r); built with iota."""
    rows = lax.broadcasted_iota(jnp.int32, (lp, lm), 0)
    cols = lax.broadcasted_iota(jnp.int32, (lp, lm), 1)
    return (cols == 2 * rows).astype(jnp.float32)


def _conv_relu_pool(x2d, w_cat, b_row, sel, k_taps, cout):
    """Conv1d(K, stride 1, valid) + ReLU + MaxPool1d(2) for one batch element.

    x2d:   (Lin, Cin)
    w_cat: (Cin, K*Cout)  -- taps concatenated along lanes (built wrapper-side)
    b_row: (1, Cout)
    sel:   (Lp, Lout-1)   -- even-position selector
    returns (Lp, Cout)
    """
    lin = x2d.shape[0]
    lout = lin - k_taps + 1
    # One MXU pass covers all K taps; tap k lands on lanes [k*Cout, (k+1)*Cout).
    z = jnp.dot(x2d, w_cat, preferred_element_type=jnp.float32)   # (Lin, K*Cout)
    acc = z[0:lout, 0:cout]
    for k in range(1, k_taps):                                    # VPU adds
        acc = acc + z[k:k + lout, k * cout:(k + 1) * cout]
    y = jnp.maximum(acc + b_row, 0.0)                             # ReLU
    # MaxPool1d(2): pairwise max on the VPU, then gather even rows via a small
    # 0/1 selector matmul (PyTorch floor semantics: trailing odd row dropped).
    ymax = jnp.maximum(y[:lout - 1, :], y[1:, :])                 # (Lout-1, Cout)
    return jnp.dot(sel, ymax, preferred_element_type=jnp.float32)


def _make_fused_kernel(n_convs, k_taps):
    def kernel(*refs):
        x_ref = refs[0]
        conv_refs = refs[1:1 + 2 * n_convs]
        (wihf_ref, whhf_ref, bf_ref, wihb_ref, bb_ref,
         wfcf_ref, wfcb_ref, bfc_ref, o_ref) = refs[1 + 2 * n_convs:]

        batch = x_ref.shape[0]

        # ---- feature extractor: n_convs x (Conv1d + ReLU + MaxPool1d(2)) ----
        acts = [x_ref[b] for b in range(batch)]               # (L, Cin) each
        for layer in range(n_convs):
            w_cat = conv_refs[2 * layer][...]                 # (Cin, K*Cout)
            b_row = conv_refs[2 * layer + 1][...]             # (1, Cout)
            cout = b_row.shape[1]
            lin = acts[0].shape[0]
            lout = lin - k_taps + 1
            sel = _even_row_selector(lout // 2, lout - 1)     # shared over batch
            acts = [_conv_relu_pool(a, w_cat, b_row, sel, k_taps, cout)
                    for a in acts]                            # (Lp, Cout) each

        # ---- bidirectional tanh-RNN (only out[:, -1, :] is used) + FC ----
        whh_t = whhf_ref[...]
        wihf_t = wihf_ref[...]
        bf = bf_ref[...]
        hidden = whh_t.shape[0]

        for b in range(batch):                                # static batch unroll
            # feature_extractor output is (Cout, Lp); batch_first RNN => T=Cout.
            seq = jnp.transpose(acts[b])                      # (T, F)
            t_steps = seq.shape[0]

            # Hoist the input projection (and combined bias) off the recurrent
            # dependency chain: xw[t] = x_t @ W_ih^T + (b_ih + b_hh).
            xw = jnp.dot(seq, wihf_t, preferred_element_type=jnp.float32) + bf

            h_fwd = jnp.zeros((1, hidden), jnp.float32)
            for t in range(t_steps):                          # static time unroll
                h_fwd = jnp.tanh(
                    jnp.dot(h_fwd, whh_t, preferred_element_type=jnp.float32)
                    + xw[t:t + 1, :])

            # Backward direction: out[:, -1, H:] is its first step from h0 == 0,
            # so only W_ih_b and the two biases contribute (W_hh_b drops out).
            h_bwd = jnp.tanh(
                jnp.dot(seq[t_steps - 1:t_steps, :], wihb_ref[...],
                        preferred_element_type=jnp.float32) + bb_ref[...])

            # fc(concat([h_fwd, h_bwd])) split into two matmuls.
            logits = (
                jnp.dot(h_fwd, wfcf_ref[...], preferred_element_type=jnp.float32)
                + jnp.dot(h_bwd, wfcb_ref[...], preferred_element_type=jnp.float32)
                + bfc_ref[...])                               # (1, O)
            o_ref[b] = logits

    return kernel


# ---------------------------------------------------------------------------
# Wrapper: single fused pallas_call
# ---------------------------------------------------------------------------
def forward_pallas(x_bcl, conv_params, rnn_params):
    """Fused forward pass. x_bcl: (B, Cin, L) torch NCL layout -> (B, O)."""
    batch = x_bcl.shape[0]
    n_convs = len(conv_params)
    k_taps = conv_params[0][0].shape[2]
    hidden = rnn_params["whh_f"].shape[0]
    out_size = rnn_params["w_fc"].shape[0]
    f32 = jnp.float32

    args = [jnp.transpose(x_bcl, (0, 2, 1)).astype(f32)]        # (B, L, Cin)
    for w_oik, b in conv_params:                                # torch (Cout, Cin, K)
        cout, cin, _ = w_oik.shape
        # (Cout, Cin, K) -> (Cin, K, Cout) -> (Cin, K*Cout): taps along lanes.
        w_cat = jnp.transpose(w_oik, (1, 2, 0)).reshape(cin, k_taps * cout)
        args += [w_cat.astype(f32), b.reshape(1, cout).astype(f32)]
    args += [
        rnn_params["wih_f"].T.astype(f32),                                   # (F, H)
        rnn_params["whh_f"].T.astype(f32),                                   # (H, H)
        (rnn_params["bih_f"] + rnn_params["bhh_f"]).reshape(1, hidden).astype(f32),
        rnn_params["wih_b"].T.astype(f32),                                   # (F, H)
        (rnn_params["bih_b"] + rnn_params["bhh_b"]).reshape(1, hidden).astype(f32),
        rnn_params["w_fc"][:, :hidden].T.astype(f32),                        # (H, O)
        rnn_params["w_fc"][:, hidden:].T.astype(f32),                        # (H, O)
        rnn_params["b_fc"].reshape(1, out_size).astype(f32),
    ]

    vmem = pl.BlockSpec(memory_space=pltpu.MemorySpace.VMEM)
    out3 = pl.pallas_call(
        _make_fused_kernel(n_convs, k_taps),
        out_shape=jax.ShapeDtypeStruct((batch, 1, out_size), f32),
        in_specs=[vmem] * len(args),
        out_specs=vmem,
    )(*args)
    return out3[:, 0, :]


# ---------------------------------------------------------------------------
# Pure-JAX reference (mirrors PyTorch semantics)
# ---------------------------------------------------------------------------
def reference_forward(x_bcl, conv_params, rnn_params):
    h = jnp.transpose(x_bcl, (0, 2, 1)).astype(jnp.float32)     # (B, L, Cin)
    for w_oik, b in conv_params:
        cout, _, k_taps = w_oik.shape
        w_kio = jnp.transpose(w_oik, (2, 1, 0))
        bsz, lin, _ = h.shape
        lout = lin - k_taps + 1
        acc = jnp.zeros((bsz, lout, cout), jnp.float32)
        for k in range(k_taps):
            acc = acc + jnp.matmul(h[:, k:k + lout, :], w_kio[k])
        y = jnp.maximum(acc + b.reshape(1, 1, cout), 0.0)
        lp = lout // 2
        h = y[:, :2 * lp, :].reshape(bsz, lp, 2, cout).max(axis=2)
    seq = jnp.transpose(h, (0, 2, 1))                           # (B, T, F)

    bsz, t_steps, _ = seq.shape
    hidden = rnn_params["whh_f"].shape[0]
    hf = jnp.zeros((bsz, hidden), jnp.float32)
    for t in range(t_steps):
        hf = jnp.tanh(seq[:, t, :] @ rnn_params["wih_f"].T + rnn_params["bih_f"]
                      + hf @ rnn_params["whh_f"].T + rnn_params["bhh_f"])
    hb = jnp.tanh(seq[:, t_steps - 1, :] @ rnn_params["wih_b"].T
                  + rnn_params["bih_b"] + rnn_params["bhh_b"])
    out_last = jnp.concatenate([hf, hb], axis=-1)
    return out_last @ rnn_params["w_fc"].T + rnn_params["b_fc"]


if __name__ == "__main__":
    B, Cin, L = 2, 3, 128
    Cout, K = 16, 5          # out_channels (= RNN sequence length), kernel_size
    N_CONVS = 3
    H = 32                   # hidden_size (bidirectional -> fc sees 2*H)
    O = 6                    # out_size (= len(LABELS); LABELS undefined upstream)

    # Feature-extractor output length == RNN input feature size (n_rec).
    n_rec = L
    for _ in range(N_CONVS):
        n_rec = (n_rec - K + 1) // 2                            # 128 -> 62 -> 29 -> 12

    keys = iter(jax.random.split(jax.random.PRNGKey(0), 32))

    conv_params = []
    ci = Cin
    for _ in range(N_CONVS):
        w = 0.2 * jax.random.normal(next(keys), (Cout, ci, K), jnp.float32)
        b = 0.1 * jax.random.normal(next(keys), (Cout,), jnp.float32)
        conv_params.append((w, b))
        ci = Cout

    rnn_params = {
        "wih_f": 0.2 * jax.random.normal(next(keys), (H, n_rec), jnp.float32),
        "whh_f": 0.2 * jax.random.normal(next(keys), (H, H), jnp.float32),
        "bih_f": 0.1 * jax.random.normal(next(keys), (H,), jnp.float32),
        "bhh_f": 0.1 * jax.random.normal(next(keys), (H,), jnp.float32),
        # Backward-direction W_hh never reaches forward()'s output
        # (only out[:, -1, :] is used), so it is omitted.
        "wih_b": 0.2 * jax.random.normal(next(keys), (H, n_rec), jnp.float32),
        "bih_b": 0.1 * jax.random.normal(next(keys), (H,), jnp.float32),
        "bhh_b": 0.1 * jax.random.normal(next(keys), (H,), jnp.float32),
        "w_fc": 0.2 * jax.random.normal(next(keys), (O, 2 * H), jnp.float32),
        "b_fc": 0.1 * jax.random.normal(next(keys), (O,), jnp.float32),
    }

    x = jax.random.normal(next(keys), (B, Cin, L), jnp.float32)  # torch NCL layout

    forward = jax.jit(forward_pallas)
    out = jax.block_until_ready(forward(x, conv_params, rnn_params))
    ref = reference_forward(x, conv_params, rnn_params)

    assert out.shape == (B, O), out.shape
    max_err = float(jnp.max(jnp.abs(out - ref)))
    assert max_err < 1e-3, f"mismatch vs reference: max_err={max_err}"
    print("KERNEL_OK")
</pallas_src>

<mosaic_0001>
module attributes {stable_mosaic.version = 11 : i64} {
  func.func @kernel(%arg0: memref<2x128x3xf32, #tpu.memory_space<vmem>>, %arg1: memref<3x80xf32, #tpu.memory_space<vmem>>, %arg2: memref<1x16xf32, #tpu.memory_space<vmem>>, %arg3: memref<16x80xf32, #tpu.memory_space<vmem>>, %arg4: memref<1x16xf32, #tpu.memory_space<vmem>>, %arg5: memref<16x80xf32, #tpu.memory_space<vmem>>, %arg6: memref<1x16xf32, #tpu.memory_space<vmem>>, %arg7: memref<12x32xf32, #tpu.memory_space<vmem>>, %arg8: memref<32x32xf32, #tpu.memory_space<vmem>>, %arg9: memref<1x32xf32, #tpu.memory_space<vmem>>, %arg10: memref<12x32xf32, #tpu.memory_space<vmem>>, %arg11: memref<1x32xf32, #tpu.memory_space<vmem>>, %arg12: memref<32x6xf32, #tpu.memory_space<vmem>>, %arg13: memref<32x6xf32, #tpu.memory_space<vmem>>, %arg14: memref<1x6xf32, #tpu.memory_space<vmem>>, %arg15: memref<2x1x6xf32, #tpu.memory_space<vmem>>) attributes {dimension_semantics = [], scalar_prefetch = 0 : i64, scratch_operands = 0 : i64, tpu.core_type = #tpu.core_type<tc>} {
    %c0 = arith.constant 0 : index
    %c0_0 = arith.constant 0 : index
    %c0_1 = arith.constant 0 : index
    %0 = vector.load %arg0[%c0, %c0_0, %c0_1] : memref<2x128x3xf32, #tpu.memory_space<vmem>>, vector<1x128x3xf32>
    %1 = vector.shape_cast %0 : vector<1x128x3xf32> to vector<128x3xf32>
    %c1 = arith.constant 1 : index
    %c0_2 = arith.constant 0 : index
    %c0_3 = arith.constant 0 : index
    %2 = vector.load %arg0[%c1, %c0_2, %c0_3] : memref<2x128x3xf32, #tpu.memory_space<vmem>>, vector<1x128x3xf32>
    %3 = vector.shape_cast %2 : vector<1x128x3xf32> to vector<128x3xf32>
    %c0_4 = arith.constant 0 : index
    %c0_5 = arith.constant 0 : index
    %4 = vector.load %arg1[%c0_4, %c0_5] : memref<3x80xf32, #tpu.memory_space<vmem>>, vector<3x80xf32>
    %c0_6 = arith.constant 0 : index
    %c0_7 = arith.constant 0 : index
    %5 = vector.load %arg2[%c0_6, %c0_7] : memref<1x16xf32, #tpu.memory_space<vmem>>, vector<1x16xf32>
    %6 = tpu.iota {dimensions = array<i32: 0>} : vector<62x123xi32>
    %7 = tpu.iota {dimensions = array<i32: 1>} : vector<62x123xi32>
    %c2_i32 = arith.constant 2 : i32
    %8 = vector.broadcast %c2_i32 : i32 to vector<62x123xi32>
    %9 = arith.muli %8, %6 : vector<62x123xi32>
    %10 = arith.cmpi eq, %7, %9 : vector<62x123xi32>
    %11 = arith.extui %10 : vector<62x123xi1> to vector<62x123xi32>
    %12 = arith.sitofp %11 : vector<62x123xi32> to vector<62x123xf32>
    %cst = arith.constant dense<0.000000e+00> : vector<128x80xf32>
    %13 = tpu.matmul %1, %4, %cst {dimension_numbers = #tpu.dot_dimension_numbers<[1], [0], [0], [1], [0, 0, 1, 1], [], []>} : vector<128x3xf32>, vector<3x80xf32>, vector<128x80xf32> -> vector<128x80xf32>
    %14 = vector.extract_strided_slice %13 {offsets = [0, 0], sizes = [124, 16], strides = [1, 1]} : vector<128x80xf32> to vector<124x16xf32>
    %15 = vector.extract_strided_slice %13 {offsets = [1, 16], sizes = [124, 16], strides = [1, 1]} : vector<128x80xf32> to vector<124x16xf32>
    %16 = arith.addf %14, %15 : vector<124x16xf32>
    %17 = vector.extract_strided_slice %13 {offsets = [2, 32], sizes = [124, 16], strides = [1, 1]} : vector<128x80xf32> to vector<124x16xf32>
    %18 = arith.addf %16, %17 : vector<124x16xf32>
    %19 = vector.extract_strided_slice %13 {offsets = [3, 48], sizes = [124, 16], strides = [1, 1]} : vector<128x80xf32> to vector<124x16xf32>
    %20 = arith.addf %18, %19 : vector<124x16xf32>
    %21 = vector.extract_strided_slice %13 {offsets = [4, 64], sizes = [124, 16], strides = [1, 1]} : vector<128x80xf32> to vector<124x16xf32>
    %22 = arith.addf %20, %21 : vector<124x16xf32>
    %23 = vector.broadcast %5 : vector<1x16xf32> to vector<124x16xf32>
    %24 = arith.addf %22, %23 : vector<124x16xf32>
    %cst_8 = arith.constant 0.000000e+00 : f32
    %25 = vector.broadcast %cst_8 : f32 to vector<124x16xf32>
    %26 = arith.maximumf %24, %25 : vector<124x16xf32>
    %27 = vector.extract_strided_slice %26 {offsets = [0, 0], sizes = [123, 16], strides = [1, 1]} : vector<124x16xf32> to vector<123x16xf32>
    %28 = vector.extract_strided_slice %26 {offsets = [1, 0], sizes = [123, 16], strides = [1, 1]} : vector<124x16xf32> to vector<123x16xf32>
    %29 = arith.maximumf %27, %28 : vector<123x16xf32>
    %cst_9 = arith.constant dense<0.000000e+00> : vector<62x16xf32>
    %30 = tpu.matmul %12, %29, %cst_9 {dimension_numbers = #tpu.dot_dimension_numbers<[1], [0], [0], [1], [0, 0, 1, 1], [], []>} : vector<62x123xf32>, vector<123x16xf32>, vector<62x16xf32> -> vector<62x16xf32>
    %cst_10 = arith.constant dense<0.000000e+00> : vector<128x80xf32>
    %31 = tpu.matmul %3, %4, %cst_10 {dimension_numbers = #tpu.dot_dimension_numbers<[1], [0], [0], [1], [0, 0, 1, 1], [], []>} : vector<128x3xf32>, vector<3x80xf32>, vector<128x80xf32> -> vector<128x80xf32>
    %32 = vector.extract_strided_slice %31 {offsets = [0, 0], sizes = [124, 16], strides = [1, 1]} : vector<128x80xf32> to vector<124x16xf32>
    %33 = vector.extract_strided_slice %31 {offsets = [1, 16], sizes = [124, 16], strides = [1, 1]} : vector<128x80xf32> to vector<124x16xf32>
    %34 = arith.addf %32, %33 : vector<124x16xf32>
    %35 = vector.extract_strided_slice %31 {offsets = [2, 32], sizes = [124, 16], strides = [1, 1]} : vector<128x80xf32> to vector<124x16xf32>
    %36 = arith.addf %34, %35 : vector<124x16xf32>
    %37 = vector.extract_strided_slice %31 {offsets = [3, 48], sizes = [124, 16], strides = [1, 1]} : vector<128x80xf32> to vector<124x16xf32>
    %38 = arith.addf %36, %37 : vector<124x16xf32>
    %39 = vector.extract_strided_slice %31 {offsets = [4, 64], sizes = [124, 16], strides = [1, 1]} : vector<128x80xf32> to vector<124x16xf32>
    %40 = arith.addf %38, %39 : vector<124x16xf32>
    %41 = vector.broadcast %5 : vector<1x16xf32> to vector<124x16xf32>
    %42 = arith.addf %40, %41 : vector<124x16xf32>
    %cst_11 = arith.constant 0.000000e+00 : f32
    %43 = vector.broadcast %cst_11 : f32 to vector<124x16xf32>
    %44 = arith.maximumf %42, %43 : vector<124x16xf32>
    %45 = vector.extract_strided_slice %44 {offsets = [0, 0], sizes = [123, 16], strides = [1, 1]} : vector<124x16xf32> to vector<123x16xf32>
    %46 = vector.extract_strided_slice %44 {offsets = [1, 0], sizes = [123, 16], strides = [1, 1]} : vector<124x16xf32> to vector<123x16xf32>
    %47 = arith.maximumf %45, %46 : vector<123x16xf32>
    %cst_12 = arith.constant dense<0.000000e+00> : vector<62x16xf32>
    %48 = tpu.matmul %12, %47, %cst_12 {dimension_numbers = #tpu.dot_dimension_numbers<[1], [0], [0], [1], [0, 0, 1, 1], [], []>} : vector<62x123xf32>, vector<123x16xf32>, vector<62x16xf32> -> vector<62x16xf32>
    %c0_13 = arith.constant 0 : index
    %c0_14 = arith.constant 0 : index
    %49 = vector.load %arg3[%c0_13, %c0_14] : memref<16x80xf32, #tpu.memory_space<vmem>>, vector<16x80xf32>
    %c0_15 = arith.constant 0 : index
    %c0_16 = arith.constant 0 : index
    %50 = vector.load %arg4[%c0_15, %c0_16] : memref<1x16xf32, #tpu.memory_space<vmem>>, vector<1x16xf32>
    %51 = tpu.iota {dimensions = array<i32: 0>} : vector<29x57xi32>
    %52 = tpu.iota {dimensions = array<i32: 1>} : vector<29x57xi32>
    %c2_i32_17 = arith.constant 2 : i32
    %53 = vector.broadcast %c2_i32_17 : i32 to vector<29x57xi32>
    %54 = arith.muli %53, %51 : vector<29x57xi32>
    %55 = arith.cmpi eq, %52, %54 : vector<29x57xi32>
    %56 = arith.extui %55 : vector<29x57xi1> to vector<29x57xi32>
    %57 = arith.sitofp %56 : vector<29x57xi32> to vector<29x57xf32>
    %cst_18 = arith.constant dense<0.000000e+00> : vector<62x80xf32>
    %58 = tpu.matmul %30, %49, %cst_18 {dimension_numbers = #tpu.dot_dimension_numbers<[1], [0], [0], [1], [0, 0, 1, 1], [], []>} : vector<62x16xf32>, vector<16x80xf32>, vector<62x80xf32> -> vector<62x80xf32>
    %59 = vector.extract_strided_slice %58 {offsets = [0, 0], sizes = [58, 16], strides = [1, 1]} : vector<62x80xf32> to vector<58x16xf32>
    %60 = vector.extract_strided_slice %58 {offsets = [1, 16], sizes = [58, 16], strides = [1, 1]} : vector<62x80xf32> to vector<58x16xf32>
    %61 = arith.addf %59, %60 : vector<58x16xf32>
    %62 = vector.extract_strided_slice %58 {offsets = [2, 32], sizes = [58, 16], strides = [1, 1]} : vector<62x80xf32> to vector<58x16xf32>
    %63 = arith.addf %61, %62 : vector<58x16xf32>
    %64 = vector.extract_strided_slice %58 {offsets = [3, 48], sizes = [58, 16], strides = [1, 1]} : vector<62x80xf32> to vector<58x16xf32>
    %65 = arith.addf %63, %64 : vector<58x16xf32>
    %66 = vector.extract_strided_slice %58 {offsets = [4, 64], sizes = [58, 16], strides = [1, 1]} : vector<62x80xf32> to vector<58x16xf32>
    %67 = arith.addf %65, %66 : vector<58x16xf32>
    %68 = vector.broadcast %50 : vector<1x16xf32> to vector<58x16xf32>
    %69 = arith.addf %67, %68 : vector<58x16xf32>
    %cst_19 = arith.constant 0.000000e+00 : f32
    %70 = vector.broadcast %cst_19 : f32 to vector<58x16xf32>
    %71 = arith.maximumf %69, %70 : vector<58x16xf32>
    %72 = vector.extract_strided_slice %71 {offsets = [0, 0], sizes = [57, 16], strides = [1, 1]} : vector<58x16xf32> to vector<57x16xf32>
    %73 = vector.extract_strided_slice %71 {offsets = [1, 0], sizes = [57, 16], strides = [1, 1]} : vector<58x16xf32> to vector<57x16xf32>
    %74 = arith.maximumf %72, %73 : vector<57x16xf32>
    %cst_20 = arith.constant dense<0.000000e+00> : vector<29x16xf32>
    %75 = tpu.matmul %57, %74, %cst_20 {dimension_numbers = #tpu.dot_dimension_numbers<[1], [0], [0], [1], [0, 0, 1, 1], [], []>} : vector<29x57xf32>, vector<57x16xf32>, vector<29x16xf32> -> vector<29x16xf32>
    %cst_21 = arith.constant dense<0.000000e+00> : vector<62x80xf32>
    %76 = tpu.matmul %48, %49, %cst_21 {dimension_numbers = #tpu.dot_dimension_numbers<[1], [0], [0], [1], [0, 0, 1, 1], [], []>} : vector<62x16xf32>, vector<16x80xf32>, vector<62x80xf32> -> vector<62x80xf32>
    %77 = vector.extract_strided_slice %76 {offsets = [0, 0], sizes = [58, 16], strides = [1, 1]} : vector<62x80xf32> to vector<58x16xf32>
    %78 = vector.extract_strided_slice %76 {offsets = [1, 16], sizes = [58, 16], strides = [1, 1]} : vector<62x80xf32> to vector<58x16xf32>
    %79 = arith.addf %77, %78 : vector<58x16xf32>
    %80 = vector.extract_strided_slice %76 {offsets = [2, 32], sizes = [58, 16], strides = [1, 1]} : vector<62x80xf32> to vector<58x16xf32>
    %81 = arith.addf %79, %80 : vector<58x16xf32>
    %82 = vector.extract_strided_slice %76 {offsets = [3, 48], sizes = [58, 16], strides = [1, 1]} : vector<62x80xf32> to vector<58x16xf32>
    %83 = arith.addf %81, %82 : vector<58x16xf32>
    %84 = vector.extract_strided_slice %76 {offsets = [4, 64], sizes = [58, 16], strides = [1, 1]} : vector<62x80xf32> to vector<58x16xf32>
    %85 = arith.addf %83, %84 : vector<58x16xf32>
    %86 = vector.broadcast %50 : vector<1x16xf32> to vector<58x16xf32>
    %87 = arith.addf %85, %86 : vector<58x16xf32>
    %cst_22 = arith.constant 0.000000e+00 : f32
    %88 = vector.broadcast %cst_22 : f32 to vector<58x16xf32>
    %89 = arith.maximumf %87, %88 : vector<58x16xf32>
    %90 = vector.extract_strided_slice %89 {offsets = [0, 0], sizes = [57, 16], strides = [1, 1]} : vector<58x16xf32> to vector<57x16xf32>
    %91 = vector.extract_strided_slice %89 {offsets = [1, 0], sizes = [57, 16], strides = [1, 1]} : vector<58x16xf32> to vector<57x16xf32>
    %92 = arith.maximumf %90, %91 : vector<57x16xf32>
    %cst_23 = arith.constant dense<0.000000e+00> : vector<29x16xf32>
    %93 = tpu.matmul %57, %92, %cst_23 {dimension_numbers = #tpu.dot_dimension_numbers<[1], [0], [0], [1], [0, 0, 1, 1], [], []>} : vector<29x57xf32>, vector<57x16xf32>, vector<29x16xf32> -> vector<29x16xf32>
    %c0_24 = arith.constant 0 : index
    %c0_25 = arith.constant 0 : index
    %94 = vector.load %arg5[%c0_24, %c0_25] : memref<16x80xf32, #tpu.memory_space<vmem>>, vector<16x80xf32>
    %c0_26 = arith.constant 0 : index
    %c0_27 = arith.constant 0 : index
    %95 = vector.load %arg6[%c0_26, %c0_27] : memref<1x16xf32, #tpu.memory_space<vmem>>, vector<1x16xf32>
    %96 = tpu.iota {dimensions = array<i32: 0>} : vector<12x24xi32>
    %97 = tpu.iota {dimensions = array<i32: 1>} : vector<12x24xi32>
    %c2_i32_28 = arith.constant 2 : i32
    %98 = vector.broadcast %c2_i32_28 : i32 to vector<12x24xi32>
    %99 = arith.muli %98, %96 : vector<12x24xi32>
    %100 = arith.cmpi eq, %97, %99 : vector<12x24xi32>
    %101 = arith.extui %100 : vector<12x24xi1> to vector<12x24xi32>
    %102 = arith.sitofp %101 : vector<12x24xi32> to vector<12x24xf32>
    %cst_29 = arith.constant dense<0.000000e+00> : vector<29x80xf32>
    %103 = tpu.matmul %75, %94, %cst_29 {dimension_numbers = #tpu.dot_dimension_numbers<[1], [0], [0], [1], [0, 0, 1, 1], [], []>} : vector<29x16xf32>, vector<16x80xf32>, vector<29x80xf32> -> vector<29x80xf32>
    %104 = vector.extract_strided_slice %103 {offsets = [0, 0], sizes = [25, 16], strides = [1, 1]} : vector<29x80xf32> to vector<25x16xf32>
    %105 = vector.extract_strided_slice %103 {offsets = [1, 16], sizes = [25, 16], strides = [1, 1]} : vector<29x80xf32> to vector<25x16xf32>
    %106 = arith.addf %104, %105 : vector<25x16xf32>
    %107 = vector.extract_strided_slice %103 {offsets = [2, 32], sizes = [25, 16], strides = [1, 1]} : vector<29x80xf32> to vector<25x16xf32>
    %108 = arith.addf %106, %107 : vector<25x16xf32>
    %109 = vector.extract_strided_slice %103 {offsets = [3, 48], sizes = [25, 16], strides = [1, 1]} : vector<29x80xf32> to vector<25x16xf32>
    %110 = arith.addf %108, %109 : vector<25x16xf32>
    %111 = vector.extract_strided_slice %103 {offsets = [4, 64], sizes = [25, 16], strides = [1, 1]} : vector<29x80xf32> to vector<25x16xf32>
    %112 = arith.addf %110, %111 : vector<25x16xf32>
    %113 = vector.broadcast %95 : vector<1x16xf32> to vector<25x16xf32>
    %114 = arith.addf %112, %113 : vector<25x16xf32>
    %cst_30 = arith.constant 0.000000e+00 : f32
    %115 = vector.broadcast %cst_30 : f32 to vector<25x16xf32>
    %116 = arith.maximumf %114, %115 : vector<25x16xf32>
    %117 = vector.extract_strided_slice %116 {offsets = [0, 0], sizes = [24, 16], strides = [1, 1]} : vector<25x16xf32> to vector<24x16xf32>
    %118 = vector.extract_strided_slice %116 {offsets = [1, 0], sizes = [24, 16], strides = [1, 1]} : vector<25x16xf32> to vector<24x16xf32>
    %119 = arith.maximumf %117, %118 : vector<24x16xf32>
    %cst_31 = arith.constant dense<0.000000e+00> : vector<12x16xf32>
    %120 = tpu.matmul %102, %119, %cst_31 {dimension_numbers = #tpu.dot_dimension_numbers<[1], [0], [0], [1], [0, 0, 1, 1], [], []>} : vector<12x24xf32>, vector<24x16xf32>, vector<12x16xf32> -> vector<12x16xf32>
    %cst_32 = arith.constant dense<0.000000e+00> : vector<29x80xf32>
    %121 = tpu.matmul %93, %94, %cst_32 {dimension_numbers = #tpu.dot_dimension_numbers<[1], [0], [0], [1], [0, 0, 1, 1], [], []>} : vector<29x16xf32>, vector<16x80xf32>, vector<29x80xf32> -> vector<29x80xf32>
    %122 = vector.extract_strided_slice %121 {offsets = [0, 0], sizes = [25, 16], strides = [1, 1]} : vector<29x80xf32> to vector<25x16xf32>
    %123 = vector.extract_strided_slice %121 {offsets = [1, 16], sizes = [25, 16], strides = [1, 1]} : vector<29x80xf32> to vector<25x16xf32>
    %124 = arith.addf %122, %123 : vector<25x16xf32>
    %125 = vector.extract_strided_slice %121 {offsets = [2, 32], sizes = [25, 16], strides = [1, 1]} : vector<29x80xf32> to vector<25x16xf32>
    %126 = arith.addf %124, %125 : vector<25x16xf32>
    %127 = vector.extract_strided_slice %121 {offsets = [3, 48], sizes = [25, 16], strides = [1, 1]} : vector<29x80xf32> to vector<25x16xf32>
    %128 = arith.addf %126, %127 : vector<25x16xf32>
    %129 = vector.extract_strided_slice %121 {offsets = [4, 64], sizes = [25, 16], strides = [1, 1]} : vector<29x80xf32> to vector<25x16xf32>
    %130 = arith.addf %128, %129 : vector<25x16xf32>
    %131 = vector.broadcast %95 : vector<1x16xf32> to vector<25x16xf32>
    %132 = arith.addf %130, %131 : vector<25x16xf32>
    %cst_33 = arith.constant 0.000000e+00 : f32
    %133 = vector.broadcast %cst_33 : f32 to vector<25x16xf32>
    %134 = arith.maximumf %132, %133 : vector<25x16xf32>
    %135 = vector.extract_strided_slice %134 {offsets = [0, 0], sizes = [24, 16], strides = [1, 1]} : vector<25x16xf32> to vector<24x16xf32>
    %136 = vector.extract_strided_slice %134 {offsets = [1, 0], sizes = [24, 16], strides = [1, 1]} : vector<25x16xf32> to vector<24x16xf32>
    %137 = arith.maximumf %135, %136 : vector<24x16xf32>
    %cst_34 = arith.constant dense<0.000000e+00> : vector<12x16xf32>
    %138 = tpu.matmul %102, %137, %cst_34 {dimension_numbers = #tpu.dot_dimension_numbers<[1], [0], [0], [1], [0, 0, 1, 1], [], []>} : vector<12x24xf32>, vector<24x16xf32>, vector<12x16xf32> -> vector<12x16xf32>
    %c0_35 = arith.constant 0 : index
    %c0_36 = arith.constant 0 : index
    %139 = vector.load %arg8[%c0_35, %c0_36] : memref<32x32xf32, #tpu.memory_space<vmem>>, vector<32x32xf32>
    %c0_37 = arith.constant 0 : index
    %c0_38 = arith.constant 0 : index
    %140 = vector.load %arg7[%c0_37, %c0_38] : memref<12x32xf32, #tpu.memory_space<vmem>>, vector<12x32xf32>
    %c0_39 = arith.constant 0 : index
    %c0_40 = arith.constant 0 : index
    %141 = vector.load %arg9[%c0_39, %c0_40] : memref<1x32xf32, #tpu.memory_space<vmem>>, vector<1x32xf32>
    %142 = tpu.transpose %120, [1, 0] : vector<12x16xf32> -> vector<16x12xf32>
    %cst_41 = arith.constant dense<0.000000e+00> : vector<16x32xf32>
    %143 = tpu.matmul %142, %140, %cst_41 {dimension_numbers = #tpu.dot_dimension_numbers<[1], [0], [0], [1], [0, 0, 1, 1], [], []>} : vector<16x12xf32>, vector<12x32xf32>, vector<16x32xf32> -> vector<16x32xf32>
    %144 = vector.broadcast %141 : vector<1x32xf32> to vector<16x32xf32>
    %145 = arith.addf %143, %144 : vector<16x32xf32>
    %cst_42 = arith.constant 0.000000e+00 : f32
    %146 = vector.broadcast %cst_42 : f32 to vector<1x32xf32>
    %cst_43 = arith.constant dense<0.000000e+00> : vector<1x32xf32>
    %147 = tpu.matmul %146, %139, %cst_43 {dimension_numbers = #tpu.dot_dimension_numbers<[1], [0], [0], [1], [0, 0, 1, 1], [], []>} : vector<1x32xf32>, vector<32x32xf32>, vector<1x32xf32> -> vector<1x32xf32>
    %148 = vector.extract_strided_slice %145 {offsets = [0, 0], sizes = [1, 32], strides = [1, 1]} : vector<16x32xf32> to vector<1x32xf32>
    %149 = arith.addf %147, %148 : vector<1x32xf32>
    %150 = math.tanh %149 : vector<1x32xf32>
    %cst_44 = arith.constant dense<0.000000e+00> : vector<1x32xf32>
    %151 = tpu.matmul %150, %139, %cst_44 {dimension_numbers = #tpu.dot_dimension_numbers<[1], [0], [0], [1], [0, 0, 1, 1], [], []>} : vector<1x32xf32>, vector<32x32xf32>, vector<1x32xf32> -> vector<1x32xf32>
    %152 = vector.extract_strided_slice %145 {offsets = [1, 0], sizes = [1, 32], strides = [1, 1]} : vector<16x32xf32> to vector<1x32xf32>
    %153 = arith.addf %151, %152 : vector<1x32xf32>
    %154 = math.tanh %153 : vector<1x32xf32>
    %cst_45 = arith.constant dense<0.000000e+00> : vector<1x32xf32>
    %155 = tpu.matmul %154, %139, %cst_45 {dimension_numbers = #tpu.dot_dimension_numbers<[1], [0], [0], [1], [0, 0, 1, 1], [], []>} : vector<1x32xf32>, vector<32x32xf32>, vector<1x32xf32> -> vector<1x32xf32>
    %156 = vector.extract_strided_slice %145 {offsets = [2, 0], sizes = [1, 32], strides = [1, 1]} : vector<16x32xf32> to vector<1x32xf32>
    %157 = arith.addf %155, %156 : vector<1x32xf32>
    %158 = math.tanh %157 : vector<1x32xf32>
    %cst_46 = arith.constant dense<0.000000e+00> : vector<1x32xf32>
    %159 = tpu.matmul %158, %139, %cst_46 {dimension_numbers = #tpu.dot_dimension_numbers<[1], [0], [0], [1], [0, 0, 1, 1], [], []>} : vector<1x32xf32>, vector<32x32xf32>, vector<1x32xf32> -> vector<1x32xf32>
    %160 = vector.extract_strided_slice %145 {offsets = [3, 0], sizes = [1, 32], strides = [1, 1]} : vector<16x32xf32> to vector<1x32xf32>
    %161 = arith.addf %159, %160 : vector<1x32xf32>
    %162 = math.tanh %161 : vector<1x32xf32>
    %cst_47 = arith.constant dense<0.000000e+00> : vector<1x32xf32>
    %163 = tpu.matmul %162, %139, %cst_47 {dimension_numbers = #tpu.dot_dimension_numbers<[1], [0], [0], [1], [0, 0, 1, 1], [], []>} : vector<1x32xf32>, vector<32x32xf32>, vector<1x32xf32> -> vector<1x32xf32>
    %164 = vector.extract_strided_slice %145 {offsets = [4, 0], sizes = [1, 32], strides = [1, 1]} : vector<16x32xf32> to vector<1x32xf32>
    %165 = arith.addf %163, %164 : vector<1x32xf32>
    %166 = math.tanh %165 : vector<1x32xf32>
    %cst_48 = arith.constant dense<0.000000e+00> : vector<1x32xf32>
    %167 = tpu.matmul %166, %139, %cst_48 {dimension_numbers = #tpu.dot_dimension_numbers<[1], [0], [0], [1], [0, 0, 1, 1], [], []>} : vector<1x32xf32>, vector<32x32xf32>, vector<1x32xf32> -> vector<1x32xf32>
    %168 = vector.extract_strided_slice %145 {offsets = [5, 0], sizes = [1, 32], strides = [1, 1]} : vector<16x32xf32> to vector<1x32xf32>
    %169 = arith.addf %167, %168 : vector<1x32xf32>
    %170 = math.tanh %169 : vector<1x32xf32>
    %cst_49 = arith.constant dense<0.000000e+00> : vector<1x32xf32>
    %171 = tpu.matmul %170, %139, %cst_49 {dimension_numbers = #tpu.dot_dimension_numbers<[1], [0], [0], [1], [0, 0, 1, 1], [], []>} : vector<1x32xf32>, vector<32x32xf32>, vector<1x32xf32> -> vector<1x32xf32>
    %172 = vector.extract_strided_slice %145 {offsets = [6, 0], sizes = [1, 32], strides = [1, 1]} : vector<16x32xf32> to vector<1x32xf32>
    %173 = arith.addf %171, %172 : vector<1x32xf32>
    %174 = math.tanh %173 : vector<1x32xf32>
    %cst_50 = arith.constant dense<0.000000e+00> : vector<1x32xf32>
    %175 = tpu.matmul %174, %139, %cst_50 {dimension_numbers = #tpu.dot_dimension_numbers<[1], [0], [0], [1], [0, 0, 1, 1], [], []>} : vector<1x32xf32>, vector<32x32xf32>, vector<1x32xf32> -> vector<1x32xf32>
    %176 = vector.extract_strided_slice %145 {offsets = [7, 0], sizes = [1, 32], strides = [1, 1]} : vector<16x32xf32> to vector<1x32xf32>
    %177 = arith.addf %175, %176 : vector<1x32xf32>
    %178 = math.tanh %177 : vector<1x32xf32>
    %cst_51 = arith.constant dense<0.000000e+00> : vector<1x32xf32>
    %179 = tpu.matmul %178, %139, %cst_51 {dimension_numbers = #tpu.dot_dimension_numbers<[1], [0], [0], [1], [0, 0, 1, 1], [], []>} : vector<1x32xf32>, vector<32x32xf32>, vector<1x32xf32> -> vector<1x32xf32>
    %180 = vector.extract_strided_slice %145 {offsets = [8, 0], sizes = [1, 32], strides = [1, 1]} : vector<16x32xf32> to vector<1x32xf32>
    %181 = arith.addf %179, %180 : vector<1x32xf32>
    %182 = math.tanh %181 : vector<1x32xf32>
    %cst_52 = arith.constant dense<0.000000e+00> : vector<1x32xf32>
    %183 = tpu.matmul %182, %139, %cst_52 {dimension_numbers = #tpu.dot_dimension_numbers<[1], [0], [0], [1], [0, 0, 1, 1], [], []>} : vector<1x32xf32>, vector<32x32xf32>, vector<1x32xf32> -> vector<1x32xf32>
    %184 = vector.extract_strided_slice %145 {offsets = [9, 0], sizes = [1, 32], strides = [1, 1]} : vector<16x32xf32> to vector<1x32xf32>
    %185 = arith.addf %183, %184 : vector<1x32xf32>
    %186 = math.tanh %185 : vector<1x32xf32>
    %cst_53 = arith.constant dense<0.000000e+00> : vector<1x32xf32>
    %187 = tpu.matmul %186, %139, %cst_53 {dimension_numbers = #tpu.dot_dimension_numbers<[1], [0], [0], [1], [0, 0, 1, 1], [], []>} : vector<1x32xf32>, vector<32x32xf32>, vector<1x32xf32> -> vector<1x32xf32>
    %188 = vector.extract_strided_slice %145 {offsets = [10, 0], sizes = [1, 32], strides = [1, 1]} : vector<16x32xf32> to vector<1x32xf32>
    %189 = arith.addf %187, %188 : vector<1x32xf32>
    %190 = math.tanh %189 : vector<1x32xf32>
    %cst_54 = arith.constant dense<0.000000e+00> : vector<1x32xf32>
    %191 = tpu.matmul %190, %139, %cst_54 {dimension_numbers = #tpu.dot_dimension_numbers<[1], [0], [0], [1], [0, 0, 1, 1], [], []>} : vector<1x32xf32>, vector<32x32xf32>, vector<1x32xf32> -> vector<1x32xf32>
    %192 = vector.extract_strided_slice %145 {offsets = [11, 0], sizes = [1, 32], strides = [1, 1]} : vector<16x32xf32> to vector<1x32xf32>
    %193 = arith.addf %191, %192 : vector<1x32xf32>
    %194 = math.tanh %193 : vector<1x32xf32>
    %cst_55 = arith.constant dense<0.000000e+00> : vector<1x32xf32>
    %195 = tpu.matmul %194, %139, %cst_55 {dimension_numbers = #tpu.dot_dimension_numbers<[1], [0], [0], [1], [0, 0, 1, 1], [], []>} : vector<1x32xf32>, vector<32x32xf32>, vector<1x32xf32> -> vector<1x32xf32>
    %196 = vector.extract_strided_slice %145 {offsets = [12, 0], sizes = [1, 32], strides = [1, 1]} : vector<16x32xf32> to vector<1x32xf32>
    %197 = arith.addf %195, %196 : vector<1x32xf32>
    %198 = math.tanh %197 : vector<1x32xf32>
    %cst_56 = arith.constant dense<0.000000e+00> : vector<1x32xf32>
    %199 = tpu.matmul %198, %139, %cst_56 {dimension_numbers = #tpu.dot_dimension_numbers<[1], [0], [0], [1], [0, 0, 1, 1], [], []>} : vector<1x32xf32>, vector<32x32xf32>, vector<1x32xf32> -> vector<1x32xf32>
    %200 = vector.extract_strided_slice %145 {offsets = [13, 0], sizes = [1, 32], strides = [1, 1]} : vector<16x32xf32> to vector<1x32xf32>
    %201 = arith.addf %199, %200 : vector<1x32xf32>
    %202 = math.tanh %201 : vector<1x32xf32>
    %cst_57 = arith.constant dense<0.000000e+00> : vector<1x32xf32>
    %203 = tpu.matmul %202, %139, %cst_57 {dimension_numbers = #tpu.dot_dimension_numbers<[1], [0], [0], [1], [0, 0, 1, 1], [], []>} : vector<1x32xf32>, vector<32x32xf32>, vector<1x32xf32> -> vector<1x32xf32>
    %204 = vector.extract_strided_slice %145 {offsets = [14, 0], sizes = [1, 32], strides = [1, 1]} : vector<16x32xf32> to vector<1x32xf32>
    %205 = arith.addf %203, %204 : vector<1x32xf32>
    %206 = math.tanh %205 : vector<1x32xf32>
    %cst_58 = arith.constant dense<0.000000e+00> : vector<1x32xf32>
    %207 = tpu.matmul %206, %139, %cst_58 {dimension_numbers = #tpu.dot_dimension_numbers<[1], [0], [0], [1], [0, 0, 1, 1], [], []>} : vector<1x32xf32>, vector<32x32xf32>, vector<1x32xf32> -> vector<1x32xf32>
    %208 = vector.extract_strided_slice %145 {offsets = [15, 0], sizes = [1, 32], strides = [1, 1]} : vector<16x32xf32> to vector<1x32xf32>
    %209 = arith.addf %207, %208 : vector<1x32xf32>
    %210 = math.tanh %209 : vector<1x32xf32>
    %211 = vector.extract_strided_slice %142 {offsets = [15, 0], sizes = [1, 12], strides = [1, 1]} : vector<16x12xf32> to vector<1x12xf32>
    %c0_59 = arith.constant 0 : index
    %c0_60 = arith.constant 0 : index
    %212 = vector.load %arg10[%c0_59, %c0_60] : memref<12x32xf32, #tpu.memory_space<vmem>>, vector<12x32xf32>
    %cst_61 = arith.constant dense<0.000000e+00> : vector<1x32xf32>
    %213 = tpu.matmul %211, %212, %cst_61 {dimension_numbers = #tpu.dot_dimension_numbers<[1], [0], [0], [1], [0, 0, 1, 1], [], []>} : vector<1x12xf32>, vector<12x32xf32>, vector<1x32xf32> -> vector<1x32xf32>
    %c0_62 = arith.constant 0 : index
    %c0_63 = arith.constant 0 : index
    %214 = vector.load %arg11[%c0_62, %c0_63] : memref<1x32xf32, #tpu.memory_space<vmem>>, vector<1x32xf32>
    %215 = arith.addf %213, %214 : vector<1x32xf32>
    %216 = math.tanh %215 : vector<1x32xf32>
    %c0_64 = arith.constant 0 : index
    %c0_65 = arith.constant 0 : index
    %217 = vector.load %arg12[%c0_64, %c0_65] : memref<32x6xf32, #tpu.memory_space<vmem>>, vector<32x6xf32>
    %cst_66 = arith.constant dense<0.000000e+00> : vector<1x6xf32>
    %218 = tpu.matmul %210, %217, %cst_66 {dimension_numbers = #tpu.dot_dimension_numbers<[1], [0], [0], [1], [0, 0, 1, 1], [], []>} : vector<1x32xf32>, vector<32x6xf32>, vector<1x6xf32> -> vector<1x6xf32>
    %c0_67 = arith.constant 0 : index
    %c0_68 = arith.constant 0 : index
    %219 = vector.load %arg13[%c0_67, %c0_68] : memref<32x6xf32, #tpu.memory_space<vmem>>, vector<32x6xf32>
    %cst_69 = arith.constant dense<0.000000e+00> : vector<1x6xf32>
    %220 = tpu.matmul %216, %219, %cst_69 {dimension_numbers = #tpu.dot_dimension_numbers<[1], [0], [0], [1], [0, 0, 1, 1], [], []>} : vector<1x32xf32>, vector<32x6xf32>, vector<1x6xf32> -> vector<1x6xf32>
    %221 = arith.addf %218, %220 : vector<1x6xf32>
    %c0_70 = arith.constant 0 : index
    %c0_71 = arith.constant 0 : index
    %222 = vector.load %arg14[%c0_70, %c0_71] : memref<1x6xf32, #tpu.memory_space<vmem>>, vector<1x6xf32>
    %223 = arith.addf %221, %222 : vector<1x6xf32>
    %c0_72 = arith.constant 0 : index
    %c0_73 = arith.constant 0 : index
    %c0_74 = arith.constant 0 : index
    %224 = vector.load %arg15[%c0_72, %c0_73, %c0_74] : memref<2x1x6xf32, #tpu.memory_space<vmem>>, vector<1x1x6xf32>
    %225 = vector.shape_cast %224 : vector<1x1x6xf32> to vector<1x6xf32>
    %226 = vector.shape_cast %223 : vector<1x6xf32> to vector<1x1x6xf32>
    tpu.vector_store %arg15[%c0_72, %c0_73, %c0_74], %226 {strides = array<i32>} : memref<2x1x6xf32, #tpu.memory_space<vmem>>, vector<1x1x6xf32>,
    %227 = tpu.transpose %138, [1, 0] : vector<12x16xf32> -> vector<16x12xf32>
    %cst_75 = arith.constant dense<0.000000e+00> : vector<16x32xf32>
    %228 = tpu.matmul %227, %140, %cst_75 {dimension_numbers = #tpu.dot_dimension_numbers<[1], [0], [0], [1], [0, 0, 1, 1], [], []>} : vector<16x12xf32>, vector<12x32xf32>, vector<16x32xf32> -> vector<16x32xf32>
    %229 = vector.broadcast %141 : vector<1x32xf32> to vector<16x32xf32>
    %230 = arith.addf %228, %229 : vector<16x32xf32>
    %cst_76 = arith.constant 0.000000e+00 : f32
    %231 = vector.broadcast %cst_76 : f32 to vector<1x32xf32>
    %cst_77 = arith.constant dense<0.000000e+00> : vector<1x32xf32>
    %232 = tpu.matmul %231, %139, %cst_77 {dimension_numbers = #tpu.dot_dimension_numbers<[1], [0], [0], [1], [0, 0, 1, 1], [], []>} : vector<1x32xf32>, vector<32x32xf32>, vector<1x32xf32> -> vector<1x32xf32>
    %233 = vector.extract_strided_slice %230 {offsets = [0, 0], sizes = [1, 32], strides = [1, 1]} : vector<16x32xf32> to vector<1x32xf32>
    %234 = arith.addf %232, %233 : vector<1x32xf32>
    %235 = math.tanh %234 : vector<1x32xf32>
    %cst_78 = arith.constant dense<0.000000e+00> : vector<1x32xf32>
    %236 = tpu.matmul %235, %139, %cst_78 {dimension_numbers = #tpu.dot_dimension_numbers<[1], [0], [0], [1], [0, 0, 1, 1], [], []>} : vector<1x32xf32>, vector<32x32xf32>, vector<1x32xf32> -> vector<1x32xf32>
    %237 = vector.extract_strided_slice %230 {offsets = [1, 0], sizes = [1, 32], strides = [1, 1]} : vector<16x32xf32> to vector<1x32xf32>
    %238 = arith.addf %236, %237 : vector<1x32xf32>
    %239 = math.tanh %238 : vector<1x32xf32>
    %cst_79 = arith.constant dense<0.000000e+00> : vector<1x32xf32>
    %240 = tpu.matmul %239, %139, %cst_79 {dimension_numbers = #tpu.dot_dimension_numbers<[1], [0], [0], [1], [0, 0, 1, 1], [], []>} : vector<1x32xf32>, vector<32x32xf32>, vector<1x32xf32> -> vector<1x32xf32>
    %241 = vector.extract_strided_slice %230 {offsets = [2, 0], sizes = [1, 32], strides = [1, 1]} : vector<16x32xf32> to vector<1x32xf32>
    %242 = arith.addf %240, %241 : vector<1x32xf32>
    %243 = math.tanh %242 : vector<1x32xf32>
    %cst_80 = arith.constant dense<0.000000e+00> : vector<1x32xf32>
    %244 = tpu.matmul %243, %139, %cst_80 {dimension_numbers = #tpu.dot_dimension_numbers<[1], [0], [0], [1], [0, 0, 1, 1], [], []>} : vector<1x32xf32>, vector<32x32xf32>, vector<1x32xf32> -> vector<1x32xf32>
    %245 = vector.extract_strided_slice %230 {offsets = [3, 0], sizes = [1, 32], strides = [1, 1]} : vector<16x32xf32> to vector<1x32xf32>
    %246 = arith.addf %244, %245 : vector<1x32xf32>
    %247 = math.tanh %246 : vector<1x32xf32>
    %cst_81 = arith.constant dense<0.000000e+00> : vector<1x32xf32>
    %248 = tpu.matmul %247, %139, %cst_81 {dimension_numbers = #tpu.dot_dimension_numbers<[1], [0], [0], [1], [0, 0, 1, 1], [], []>} : vector<1x32xf32>, vector<32x32xf32>, vector<1x32xf32> -> vector<1x32xf32>
    %249 = vector.extract_strided_slice %230 {offsets = [4, 0], sizes = [1, 32], strides = [1, 1]} : vector<16x32xf32> to vector<1x32xf32>
    %250 = arith.addf %248, %249 : vector<1x32xf32>
    %251 = math.tanh %250 : vector<1x32xf32>
    %cst_82 = arith.constant dense<0.000000e+00> : vector<1x32xf32>
    %252 = tpu.matmul %251, %139, %cst_82 {dimension_numbers = #tpu.dot_dimension_numbers<[1], [0], [0], [1], [0, 0, 1, 1], [], []>} : vector<1x32xf32>, vector<32x32xf32>, vector<1x32xf32> -> vector<1x32xf32>
    %253 = vector.extract_strided_slice %230 {offsets = [5, 0], sizes = [1, 32], strides = [1, 1]} : vector<16x32xf32> to vector<1x32xf32>
    %254 = arith.addf %252, %253 : vector<1x32xf32>
    %255 = math.tanh %254 : vector<1x32xf32>
    %cst_83 = arith.constant dense<0.000000e+00> : vector<1x32xf32>
    %256 = tpu.matmul %255, %139, %cst_83 {dimension_numbers = #tpu.dot_dimension_numbers<[1], [0], [0], [1], [0, 0, 1, 1], [], []>} : vector<1x32xf32>, vector<32x32xf32>, vector<1x32xf32> -> vector<1x32xf32>
    %257 = vector.extract_strided_slice %230 {offsets = [6, 0], sizes = [1, 32], strides = [1, 1]} : vector<16x32xf32> to vector<1x32xf32>
    %258 = arith.addf %256, %257 : vector<1x32xf32>
    %259 = math.tanh %258 : vector<1x32xf32>
    %cst_84 = arith.constant dense<0.000000e+00> : vector<1x32xf32>
    %260 = tpu.matmul %259, %139, %cst_84 {dimension_numbers = #tpu.dot_dimension_numbers<[1], [0], [0], [1], [0, 0, 1, 1], [], []>} : vector<1x32xf32>, vector<32x32xf32>, vector<1x32xf32> -> vector<1x32xf32>
    %261 = vector.extract_strided_slice %230 {offsets = [7, 0], sizes = [1, 32], strides = [1, 1]} : vector<16x32xf32> to vector<1x32xf32>
    %262 = arith.addf %260, %261 : vector<1x32xf32>
    %263 = math.tanh %262 : vector<1x32xf32>
    %cst_85 = arith.constant dense<0.000000e+00> : vector<1x32xf32>
    %264 = tpu.matmul %263, %139, %cst_85 {dimension_numbers = #tpu.dot_dimension_numbers<[1], [0], [0], [1], [0, 0, 1, 1], [], []>} : vector<1x32xf32>, vector<32x32xf32>, vector<1x32xf32> -> vector<1x32xf32>
    %265 = vector.extract_strided_slice %230 {offsets = [8, 0], sizes = [1, 32], strides = [1, 1]} : vector<16x32xf32> to vector<1x32xf32>
    %266 = arith.addf %264, %265 : vector<1x32xf32>
    %267 = math.tanh %266 : vector<1x32xf32>
    %cst_86 = arith.constant dense<0.000000e+00> : vector<1x32xf32>
    %268 = tpu.matmul %267, %139, %cst_86 {dimension_numbers = #tpu.dot_dimension_numbers<[1], [0], [0], [1], [0, 0, 1, 1], [], []>} : vector<1x32xf32>, vector<32x32xf32>, vector<1x32xf32> -> vector<1x32xf32>
    %269 = vector.extract_strided_slice %230 {offsets = [9, 0], sizes = [1, 32], strides = [1, 1]} : vector<16x32xf32> to vector<1x32xf32>
    %270 = arith.addf %268, %269 : vector<1x32xf32>
    %271 = math.tanh %270 : vector<1x32xf32>
    %cst_87 = arith.constant dense<0.000000e+00> : vector<1x32xf32>
    %272 = tpu.matmul %271, %139, %cst_87 {dimension_numbers = #tpu.dot_dimension_numbers<[1], [0], [0], [1], [0, 0, 1, 1], [], []>} : vector<1x32xf32>, vector<32x32xf32>, vector<1x32xf32> -> vector<1x32xf32>
    %273 = vector.extract_strided_slice %230 {offsets = [10, 0], sizes = [1, 32], strides = [1, 1]} : vector<16x32xf32> to vector<1x32xf32>
    %274 = arith.addf %272, %273 : vector<1x32xf32>
    %275 = math.tanh %274 : vector<1x32xf32>
    %cst_88 = arith.constant dense<0.000000e+00> : vector<1x32xf32>
    %276 = tpu.matmul %275, %139, %cst_88 {dimension_numbers = #tpu.dot_dimension_numbers<[1], [0], [0], [1], [0, 0, 1, 1], [], []>} : vector<1x32xf32>, vector<32x32xf32>, vector<1x32xf32> -> vector<1x32xf32>
    %277 = vector.extract_strided_slice %230 {offsets = [11, 0], sizes = [1, 32], strides = [1, 1]} : vector<16x32xf32> to vector<1x32xf32>
    %278 = arith.addf %276, %277 : vector<1x32xf32>
    %279 = math.tanh %278 : vector<1x32xf32>
    %cst_89 = arith.constant dense<0.000000e+00> : vector<1x32xf32>
    %280 = tpu.matmul %279, %139, %cst_89 {dimension_numbers = #tpu.dot_dimension_numbers<[1], [0], [0], [1], [0, 0, 1, 1], [], []>} : vector<1x32xf32>, vector<32x32xf32>, vector<1x32xf32> -> vector<1x32xf32>
    %281 = vector.extract_strided_slice %230 {offsets = [12, 0], sizes = [1, 32], strides = [1, 1]} : vector<16x32xf32> to vector<1x32xf32>
    %282 = arith.addf %280, %281 : vector<1x32xf32>
    %283 = math.tanh %282 : vector<1x32xf32>
    %cst_90 = arith.constant dense<0.000000e+00> : vector<1x32xf32>
    %284 = tpu.matmul %283, %139, %cst_90 {dimension_numbers = #tpu.dot_dimension_numbers<[1], [0], [0], [1], [0, 0, 1, 1], [], []>} : vector<1x32xf32>, vector<32x32xf32>, vector<1x32xf32> -> vector<1x32xf32>
    %285 = vector.extract_strided_slice %230 {offsets = [13, 0], sizes = [1, 32], strides = [1, 1]} : vector<16x32xf32> to vector<1x32xf32>
    %286 = arith.addf %284, %285 : vector<1x32xf32>
    %287 = math.tanh %286 : vector<1x32xf32>
    %cst_91 = arith.constant dense<0.000000e+00> : vector<1x32xf32>
    %288 = tpu.matmul %287, %139, %cst_91 {dimension_numbers = #tpu.dot_dimension_numbers<[1], [0], [0], [1], [0, 0, 1, 1], [], []>} : vector<1x32xf32>, vector<32x32xf32>, vector<1x32xf32> -> vector<1x32xf32>
    %289 = vector.extract_strided_slice %230 {offsets = [14, 0], sizes = [1, 32], strides = [1, 1]} : vector<16x32xf32> to vector<1x32xf32>
    %290 = arith.addf %288, %289 : vector<1x32xf32>
    %291 = math.tanh %290 : vector<1x32xf32>
    %cst_92 = arith.constant dense<0.000000e+00> : vector<1x32xf32>
    %292 = tpu.matmul %291, %139, %cst_92 {dimension_numbers = #tpu.dot_dimension_numbers<[1], [0], [0], [1], [0, 0, 1, 1], [], []>} : vector<1x32xf32>, vector<32x32xf32>, vector<1x32xf32> -> vector<1x32xf32>
    %293 = vector.extract_strided_slice %230 {offsets = [15, 0], sizes = [1, 32], strides = [1, 1]} : vector<16x32xf32> to vector<1x32xf32>
    %294 = arith.addf %292, %293 : vector<1x32xf32>
    %295 = math.tanh %294 : vector<1x32xf32>
    %296 = vector.extract_strided_slice %227 {offsets = [15, 0], sizes = [1, 12], strides = [1, 1]} : vector<16x12xf32> to vector<1x12xf32>
    %c0_93 = arith.constant 0 : index
    %c0_94 = arith.constant 0 : index
    %297 = vector.load %arg10[%c0_93, %c0_94] : memref<12x32xf32, #tpu.memory_space<vmem>>, vector<12x32xf32>
    %cst_95 = arith.constant dense<0.000000e+00> : vector<1x32xf32>
    %298 = tpu.matmul %296, %297, %cst_95 {dimension_numbers = #tpu.dot_dimension_numbers<[1], [0], [0], [1], [0, 0, 1, 1], [], []>} : vector<1x12xf32>, vector<12x32xf32>, vector<1x32xf32> -> vector<1x32xf32>
    %c0_96 = arith.constant 0 : index
    %c0_97 = arith.constant 0 : index
    %299 = vector.load %arg11[%c0_96, %c0_97] : memref<1x32xf32, #tpu.memory_space<vmem>>, vector<1x32xf32>
    %300 = arith.addf %298, %299 : vector<1x32xf32>
    %301 = math.tanh %300 : vector<1x32xf32>
    %c0_98 = arith.constant 0 : index
    %c0_99 = arith.constant 0 : index
    %302 = vector.load %arg12[%c0_98, %c0_99] : memref<32x6xf32, #tpu.memory_space<vmem>>, vector<32x6xf32>
    %cst_100 = arith.constant dense<0.000000e+00> : vector<1x6xf32>
    %303 = tpu.matmul %295, %302, %cst_100 {dimension_numbers = #tpu.dot_dimension_numbers<[1], [0], [0], [1], [0, 0, 1, 1], [], []>} : vector<1x32xf32>, vector<32x6xf32>, vector<1x6xf32> -> vector<1x6xf32>
    %c0_101 = arith.constant 0 : index
    %c0_102 = arith.constant 0 : index
    %304 = vector.load %arg13[%c0_101, %c0_102] : memref<32x6xf32, #tpu.memory_space<vmem>>, vector<32x6xf32>
    %cst_103 = arith.constant dense<0.000000e+00> : vector<1x6xf32>
    %305 = tpu.matmul %301, %304, %cst_103 {dimension_numbers = #tpu.dot_dimension_numbers<[1], [0], [0], [1], [0, 0, 1, 1], [], []>} : vector<1x32xf32>, vector<32x6xf32>, vector<1x6xf32> -> vector<1x6xf32>
    %306 = arith.addf %303, %305 : vector<1x6xf32>
    %c0_104 = arith.constant 0 : index
    %c0_105 = arith.constant 0 : index
    %307 = vector.load %arg14[%c0_104, %c0_105] : memref<1x6xf32, #tpu.memory_space<vmem>>, vector<1x6xf32>
    %308 = arith.addf %306, %307 : vector<1x6xf32>
    %c1_106 = arith.constant 1 : index
    %c0_107 = arith.constant 0 : index
    %c0_108 = arith.constant 0 : index
    %309 = vector.load %arg15[%c1_106, %c0_107, %c0_108] : memref<2x1x6xf32, #tpu.memory_space<vmem>>, vector<1x1x6xf32>
    %310 = vector.shape_cast %309 : vector<1x1x6xf32> to vector<1x6xf32>
    %311 = vector.shape_cast %308 : vector<1x6xf32> to vector<1x1x6xf32>
    tpu.vector_store %arg15[%c1_106, %c0_107, %c0_108], %311 {strides = array<i32>} : memref<2x1x6xf32, #tpu.memory_space<vmem>>, vector<1x1x6xf32>,
    return
  }
}

</mosaic_0001>

<bundles_post_ra>
// kernel: forward_pallas.1
= control target key start
LH: loop header
LB: loop body
LE: loop exit
PB: predicated region body
PF: predicated region fallthrough
CT: control target
= control target key end

     0   :  { %vm178_vm0 = vcmask 1042432   ;;  %vm129_vm1 = vcmask 23552   ;;  %s10441_s0 = inlined_call_operand.vmem [shape: f32[2,128,3], index: 0, kind: input, shape index: {}]   ;;  %s10442_s1 = inlined_call_operand.vmem [shape: f32[3,80], index: 1, kind: input, shape index: {}]   ;;  %s10443_s2 = inlined_call_operand.vmem [shape: f32[1,16], index: 2, kind: input, shape index: {}]   ;;  %s10444_s3 = inlined_call_operand.vmem [shape: f32[16,80], index: 3, kind: input, shape index: {}]   ;;  %s10445_s4 = inlined_call_operand.vmem [shape: f32[1,16], index: 4, kind: input, shape index: {}]   ;;  %s10446_s5 = inlined_call_operand.vmem [shape: f32[16,80], index: 5, kind: input, shape index: {}]   ;;  %s10447_s6 = inlined_call_operand.vmem [shape: f32[1,16], index: 6, kind: input, shape index: {}]   ;;  %s10448_s7 = inlined_call_operand.vmem [shape: f32[12,32], index: 7, kind: input, shape index: {}]   ;;  %s10449_s8 = inlined_call_operand.vmem [shape: f32[32,32], index: 8, kind: input, shape index: {}]   ;;  %s10450_s9 = inlined_call_operand.vmem [shape: f32[1,32], index: 9, kind: input, shape index: {}]   ;;  %s10451_s10 = inlined_call_operand.vmem [shape: f32[12,32], index: 10, kind: input, shape index: {}]   ;;  %s10452_s11 = inlined_call_operand.vmem [shape: f32[1,32], index: 11, kind: input, shape index: {}]   ;;  %s10453_s12 = inlined_call_operand.vmem [shape: f32[32,6], index: 12, kind: input, shape index: {}]   ;;  %s10454_s13 = inlined_call_operand.vmem [shape: f32[32,6], index: 13, kind: input, shape index: {}]   ;;  %s10455_s14 = inlined_call_operand.vmem [shape: f32[1,6], index: 14, kind: input, shape index: {}]   ;;  %s10456_s15 = inlined_call_operand.hbm [shape: f32[2,1,6], index: 15, kind: output, shape index: {}]  }
   0x1   :  { %v84_v0 = vld [vmem:[%s10442_s1] sm:$0x7]  ;;  %v52_v2 = vld [vmem:[%s10441_s0 + $0x8] sm:$0xff]  ;;  %v53_v3 = vld [vmem:[%s10441_s0 + $0x10] sm:$0xff] }
   0x2   :  { %v51_v1 = vld [vmem:[%s10441_s0] sm:$0xff]  ;;  %7006 = vmatprep.subr.msk.mxu0 %vm178_vm0, %v84_v0  ;;  %v54_v4 = vld [vmem:[%s10441_s0 + $0x18] sm:$0xff]  ;;  %v56_v6 = vld [vmem:[%s10441_s0 + $0x28] sm:$0xff] }
   0x3   :  { %7008 = vmatprep.mubr.msk.f32.mxu0 %vm129_vm1, %v51_v1  ;;  %7007 = vmatpush3.msk.msra.mxu0 %vm178_vm0, %v84_v0  ;;  %v55_v5 = vld [vmem:[%s10441_s0 + $0x20] sm:$0xff] }
   0x4   :  { %7009 = vmatmul.mubr.msk.f32.vlgmr.msra.gmra.mrb[0].mxu0 %vm129_vm1, %v52_v2  ;;  %7076 = vmatprep.subr.msk.mxu0 %vm178_vm0, %v84_v0 }
   0x5   :  { %7011 = vmatprep.mubr.msk.f32.mxu0 %vm129_vm1, %v53_v3  ;;  %7077 = vmatpush3.msk.msra.mxu0 %vm178_vm0, %v84_v0 }
   0x8   :  { %7012 = vmatmul.mubr.msk.f32.gmra.mrb[2].mxu0 %vm129_vm1, %v54_v4 }
   0x9   :  { %7014 = vmatprep.mubr.msk.f32.mxu0 %vm129_vm1, %v55_v5 }
   0xa   :  { %20 = vsyncpa [#allocation3], 0  ;;  %v57_v7 = vld [vmem:[%s10441_s0 + $0x30] sm:$0xff]  ;;  %v58_v8 = vld [vmem:[%s10441_s0 + $0x38] sm:$0xff]  ;;  %vm439_vm2 = vcmask 1045504   ;;  %vm343_vm3 = vcmask 1046528  }
   0xb   :  { %v59_v9 = vld [vmem:[%s10441_s0 + $0x40] sm:$0xff]  ;;  %v60_v10 = vld [vmem:[%s10441_s0 + $0x48] sm:$0xff]  ;;  %v61_v11 = vld [vmem:[%s10441_s0 + $0x50] sm:$0xff]  ;;  %vm631_vm4 = vcmask 1043456   ;;  %vm535_vm5 = vcmask 1044480   ;;  %s8153_s20 = smov 112  }
   0xc   :  { %7015 = vmatmul.mubr.msk.f32.gmra.mrb[4].mxu0 %vm129_vm1, %v56_v6  ;;  %v62_v12 = vld [vmem:[%s10441_s0 + $0x58] sm:$0xff]  ;;  %v63_v13 = vld [vmem:[%s10441_s0 + $0x60] sm:$0xff]  ;;  %v64_v14 = vld [vmem:[%s10441_s0 + $0x68] sm:$0xff]  ;;  %s8154_s21 = smov 64   ;;  %s8155_s22 = smov 80   ;;  %vm844_vm7 = vcmask 1006592  }
   0xd   :  { %7017 = vmatprep.mubr.msk.f32.mxu0 %vm129_vm1, %v57_v7  ;;  %v65_v15 = vld [vmem:[%s10441_s0 + $0x70] sm:$0xff]  ;;  %v66_v16 = vld [vmem:[%s10441_s0 + $0x78] sm:$0xff]  ;;  %v6502_v17 = vld [vmem:[%s10441_s0 + $0x80] sm:$0xff]  ;;  %vm8157_vm15 = vmmov 1  }
   0xe   :  { %v6503_v18 = vld [vmem:[%s10441_s0 + $0x88] sm:$0xff]  ;;  %v6504_v19 = vld [vmem:[%s10441_s0 + $0x90] sm:$0xff]  ;;  %v6505_v20 = vld [vmem:[%s10441_s0 + $0x98] sm:$0xff] }
   0xf   :  { %v6506_v21 = vld [vmem:[%s10441_s0 + $0xa0] sm:$0xff]  ;;  %v6507_v22 = vld [vmem:[%s10441_s0 + $0xa8] sm:$0xff]  ;;  %v6508_v23 = vld [vmem:[%s10441_s0 + $0xb0] sm:$0xff] }
  0x10   :  { %7018 = vmatmul.mubr.msk.f32.gmra.mrb[6].mxu0 %vm129_vm1, %v58_v8  ;;  %v6509_v24 = vld [vmem:[%s10441_s0 + $0xb8] sm:$0xff]  ;;  %v6510_v25 = vld [vmem:[%s10441_s0 + $0xc0] sm:$0xff]  ;;  %v6511_v26 = vld [vmem:[%s10441_s0 + $0xc8] sm:$0xff] }
  0x11   :  { %7020 = vmatprep.mubr.msk.f32.mxu0 %vm129_vm1, %v59_v9  ;;  %v6512_v27 = vld [vmem:[%s10441_s0 + $0xd0] sm:$0xff]  ;;  %v6513_v28 = vld [vmem:[%s10441_s0 + $0xd8] sm:$0xff]  ;;  %v6514_v29 = vld [vmem:[%s10441_s0 + $0xe0] sm:$0xff] }
  0x12   :  { %v6515_v30 = vld [vmem:[%s10441_s0 + $0xe8] sm:$0xff]  ;;  %v6516_v31 = vld [vmem:[%s10441_s0 + $0xf0] sm:$0xff]  ;;  %v6517_v32 = vld [vmem:[%s10441_s0 + $0xf8] sm:$0xff]  ;;  %s8152_s0 = smov 96  }
  0x14   :  { %7021 = vmatmul.mubr.msk.f32.gmra.mrb[8].mxu0 %vm129_vm1, %v60_v10 }
  0x15   :  { %7023 = vmatprep.mubr.msk.f32.mxu0 %vm129_vm1, %v61_v11 }
  0x18   :  { %7024 = vmatmul.mubr.msk.f32.gmra.mrb[10].mxu0 %vm129_vm1, %v62_v12 }
  0x19   :  { %7026 = vmatprep.mubr.msk.f32.mxu0 %vm129_vm1, %v63_v13 }
  0x1c   :  { %7027 = vmatmul.mubr.msk.f32.gmra.mrb[12].mxu0 %vm129_vm1, %v64_v14 }
  0x1d   :  { %7029 = vmatprep.mubr.msk.f32.mxu0 %vm129_vm1, %v65_v15 }
  0x20   :  { %7030 = vmatmul.mubr.msk.f32.gmra.mrb[14].mxu0 %vm129_vm1, %v66_v16 }
  0x21   :  { %7078 = vmatprep.mubr.msk.f32.mxu0 %vm129_vm1, %v6502_v17 }
  0x24   :  { %7079 = vmatmul.mubr.msk.f32.vlgmr.msra.gmra.mrb[16].mxu0 %vm129_vm1, %v6503_v18 }
  0x25   :  { %7081 = vmatprep.mubr.msk.f32.mxu0 %vm129_vm1, %v6504_v19 }
  0x28   :  { %7082 = vmatmul.mubr.msk.f32.gmra.mrb[18].mxu0 %vm129_vm1, %v6505_v20 }
  0x29   :  { %7084 = vmatprep.mubr.msk.f32.mxu0 %vm129_vm1, %v6506_v21 }
  0x2c   :  { %7085 = vmatmul.mubr.msk.f32.gmra.mrb[20].mxu0 %vm129_vm1, %v6507_v22 }
  0x2d   :  { %7087 = vmatprep.mubr.msk.f32.mxu0 %vm129_vm1, %v6508_v23 }
  0x30   :  { %7088 = vmatmul.mubr.msk.f32.gmra.mrb[22].mxu0 %vm129_vm1, %v6509_v24 }
  0x31   :  { %7090 = vmatprep.mubr.msk.f32.mxu0 %vm129_vm1, %v6510_v25 }
  0x34   :  { %7091 = vmatmul.mubr.msk.f32.gmra.mrb[24].mxu0 %vm129_vm1, %v6511_v26 }
  0x35   :  { %7093 = vmatprep.mubr.msk.f32.mxu0 %vm129_vm1, %v6512_v27 }
  0x38   :  { %7094 = vmatmul.mubr.msk.f32.gmra.mrb[26].mxu0 %vm129_vm1, %v6513_v28 }
  0x39   :  { %7096 = vmatprep.mubr.msk.f32.mxu0 %vm129_vm1, %v6514_v29 }
  0x3c   :  { %7097 = vmatmul.mubr.msk.f32.gmra.mrb[28].mxu0 %vm129_vm1, %v6515_v30 }
  0x3d   :  { %7099 = vmatprep.mubr.msk.f32.mxu0 %vm129_vm1, %v6516_v31 }
  0x40   :  { %7100 = vmatmul.mubr.msk.f32.gmra.mrb[30].mxu0 %vm129_vm1, %v6517_v32  ;;  %vm9311_vm1 = vmpackc.low %vm178_vm0, %vm8157_vm15  ;;  %vm1788_vm0 = vcmask 130048  }
  0xd7   :  { %v8378_v33 = vpop.f32.mrb[0].mxu0 }
  0xd8   :  { %v8380_v34 = vpop.f32.mrb[1].mxu0  ;;  %v441_v35 = vrot.slane %v8378_v33, 2  ;;  %v345_v36 = vrot.slane %v8378_v33, 1  ;;  %v633_v37 = vrot.slane %v8378_v33, 4  ;;  %v537_v38 = vrot.slane %v8378_v33, 3 }
  0xd9   :  { %v440_v39 = vrot.slane %v8380_v34, 2  ;;  %v344_v40 = vrot.slane %v8380_v34, 1  ;;  %v632_v41 = vrot.slane %v8380_v34, 4  ;;  %v536_v42 = vrot.slane %v8380_v34, 3 }
  0xdb   :  { %v8390_v43 = vpop.f32.mrb[2].mxu0  ;;  %v442_v44 = vsel %vm439_vm2, %v440_v39, %v441_v35  ;;  %v346_v45 = vsel %vm343_vm3, %v344_v40, %v345_v36  ;;  %v634_v46 = vsel %vm631_vm4, %v632_v41, %v633_v37  ;;  %v538_v47 = vsel %vm535_vm5, %v536_v42, %v537_v38 }
  0xdc   :  { %471 = vrot.lane.b32.xlu1 %v442_v44, %s8152_s0  ;;  %375 = vrot.lane.b32.xlu0 %v346_v45, %s8153_s20  ;;  %v8398_v48 = vpop.f32.mrb[3].mxu0  ;;  %v349_v49 = vrot.slane %v8390_v43, 1  ;;  %v445_v50 = vrot.slane %v8390_v43, 2  ;;  %v541_v51 = vrot.slane %v8390_v43, 3  ;;  %v637_v52 = vrot.slane %v8390_v43, 4 }
  0xdd   :  { %v347_v53 = vrot.slane %v8398_v48, 1  ;;  %v443_v54 = vrot.slane %v8398_v48, 2  ;;  %v539_v55 = vrot.slane %v8398_v48, 3  ;;  %v635_v56 = vrot.slane %v8398_v48, 4 }
  0xdf   :  { %v8408_v57 = vpop.f32.mrb[4].mxu0  ;;  %v350_v58 = vsel %vm343_vm3, %v347_v53, %v349_v49  ;;  %v348_v59 = vsel %vm343_vm3, %v345_v36, %v347_v53  ;;  %v446_v60 = vsel %vm439_vm2, %v443_v54, %v445_v50  ;;  %v444_v61 = vsel %vm439_vm2, %v441_v35, %v443_v54 }
  0xe0   :  { %663 = vrot.lane.b32.xlu1 %v634_v46, %s8154_s21  ;;  %567 = vrot.lane.b32.xlu0 %v538_v47, %s8155_s22  ;;  %v8416_v62 = vpop.f32.mrb[5].mxu0  ;;  %v540_v63 = vsel %vm535_vm5, %v537_v38, %v539_v55  ;;  %v542_v0 = vsel %vm535_vm5, %v539_v55, %v541_v51  ;;  %v8421_v1 = vsel %vm631_vm4, %v635_v56, %v637_v52  ;;  %v353_v2 = vrot.slane %v8408_v57, 1 }
  0xe1   :  { %v8425_v3 = vsel %vm631_vm4, %v633_v37, %v635_v56  ;;  %v351_v4 = vrot.slane %v8416_v62, 1  ;;  %v447_v5 = vrot.slane %v8416_v62, 2  ;;  %v449_v6 = vrot.slane %v8408_v57, 2 }
  0xe2   :  { %v543_v7 = vrot.slane %v8416_v62, 3  ;;  %v545_v8 = vrot.slane %v8408_v57, 3  ;;  %v639_v9 = vrot.slane %v8416_v62, 4  ;;  %v641_v10 = vrot.slane %v8408_v57, 4 }
  0xe3   :  { %v8434_v11 = vpop.f32.mrb[6].mxu0  ;;  %v8437_v12 = vsel %vm343_vm3, %v351_v4, %v353_v2  ;;  %v8440_v13 = vsel %vm343_vm3, %v349_v49, %v351_v4  ;;  %v8443_v14 = vsel %vm439_vm2, %v445_v50, %v447_v5  ;;  %v8446_v15 = vsel %vm439_vm2, %v447_v5, %v449_v6 }
  0xe4   :  { %10495 = vst [vmem:[#allocation5_spill] sm:$0xff] %v8434_v11  ;;  %379 = vrot.lane.b32.xlu1 %v350_v58, %s8153_s20  ;;  %377 = vrot.lane.b32.xlu0 %v348_v59, %s8153_s20  ;;  %v8450_v16 = vpop.f32.mrb[7].mxu0  ;;  %v8453_v17 = vsel %vm535_vm5, %v543_v7, %v545_v8  ;;  %v8456_v18 = vsel %vm535_vm5, %v541_v51, %v543_v7  ;;  %v357_v20 = vrot.slane %v8434_v11, 1  ;;  %v453_v24 = vrot.slane %v8434_v11, 2 }
  0xe5   :  { %v8459_v19 = vsel %vm631_vm4, %v639_v9, %v641_v10  ;;  %v8463_v21 = vsel %vm631_vm4, %v637_v52, %v639_v9  ;;  %v355_v22 = vrot.slane %v8450_v16, 1  ;;  %v451_v23 = vrot.slane %v8450_v16, 2 }
  0xe6   :  { %v547_v25 = vrot.slane %v8450_v16, 3  ;;  %v549_v26 = vrot.slane %v8434_v11, 3  ;;  %v643_v27 = vrot.slane %v8450_v16, 4  ;;  %v645_v28 = vrot.slane %v8434_v11, 4 }
  0xe7   :  { %v8472_v29 = vpop.f32.mrb[8].mxu0  ;;  %v8475_v30 = vsel %vm343_vm3, %v355_v22, %v357_v20  ;;  %v8478_v31 = vsel %vm343_vm3, %v353_v2, %v355_v22  ;;  %v8481_v32 = vsel %vm439_vm2, %v451_v23, %v453_v24  ;;  %v8484_v35 = vsel %vm439_vm2, %v449_v6, %v451_v23 }
  0xe8   :  { %10496 = vst [vmem:[#allocation6_spill] sm:$0xff] %v8472_v29  ;;  %475 = vrot.lane.b32.xlu1 %v446_v60, %s8152_s0  ;;  %473 = vrot.lane.b32.xlu0 %v444_v61, %s8152_s0  ;;  %v8488_v36 = vpop.f32.mrb[9].mxu0  ;;  %v8491_v37 = vsel %vm535_vm5, %v547_v25, %v549_v26  ;;  %v8494_v38 = vsel %vm535_vm5, %v545_v8, %v547_v25  ;;  %v361_v40 = vrot.slane %v8472_v29, 1  ;;  %v457_v45 = vrot.slane %v8472_v29, 2 }
  0xe9   :  { %10497 = vst [vmem:[#allocation7_spill] sm:$0xff] %v8488_v36  ;;  %v8497_v39 = vsel %vm631_vm4, %v643_v27, %v645_v28  ;;  %v8501_v41 = vsel %vm631_vm4, %v641_v10, %v643_v27  ;;  %v359_v42 = vrot.slane %v8488_v36, 1  ;;  %v455_v44 = vrot.slane %v8488_v36, 2 }
  0xea   :  { %v551_v46 = vrot.slane %v8488_v36, 3  ;;  %v553_v47 = vrot.slane %v8472_v29, 3  ;;  %v647_v49 = vrot.slane %v8488_v36, 4  ;;  %v649_v50 = vrot.slane %v8472_v29, 4 }
  0xeb   :  { %v8510_v51 = vpop.f32.mrb[10].mxu0  ;;  %v8513_v52 = vsel %vm343_vm3, %v359_v42, %v361_v40  ;;  %v8516_v53 = vsel %vm343_vm3, %v357_v20, %v359_v42  ;;  %v8519_v54 = vsel %vm439_vm2, %v455_v44, %v457_v45  ;;  %v8522_v55 = vsel %vm439_vm2, %v453_v24, %v455_v44 }
  0xec   :  { %10498 = vst [vmem:[#allocation8_spill] sm:$0xff] %v8510_v51  ;;  %569 = vrot.lane.b32.xlu1 %v540_v63, %s8155_s22  ;;  %571 = vrot.lane.b32.xlu0 %v542_v0, %s8155_s22  ;;  %v8526_v56 = vpop.f32.mrb[11].mxu0  ;;  %v8529_v58 = vsel %vm535_vm5, %v551_v46, %v553_v47  ;;  %v8532_v59 = vsel %vm535_vm5, %v549_v26, %v551_v46  ;;  %v365_v61 = vrot.slane %v8510_v51, 1  ;;  %v461_v4 = vrot.slane %v8510_v51, 2 }
  0xed   :  { %10499 = vst [vmem:[#allocation9_spill] sm:$0xff] %v8526_v56  ;;  %v8535_v60 = vsel %vm631_vm4, %v647_v49, %v649_v50  ;;  %v8539_v2 = vsel %vm631_vm4, %v645_v28, %v647_v49  ;;  %v363_v63 = vrot.slane %v8526_v56, 1  ;;  %v459_v0 = vrot.slane %v8526_v56, 2 }
  0xee   :  { %v555_v5 = vrot.slane %v8526_v56, 3  ;;  %v557_v6 = vrot.slane %v8510_v51, 3  ;;  %v651_v7 = vrot.slane %v8526_v56, 4  ;;  %v653_v8 = vrot.slane %v8510_v51, 4 }
  0xef   :  { %v8548_v9 = vpop.f32.mrb[12].mxu0  ;;  %v8551_v10 = vsel %vm343_vm3, %v363_v63, %v365_v61  ;;  %v8554_v20 = vsel %vm343_vm3, %v361_v40, %v363_v63  ;;  %v8557_v22 = vsel %vm439_vm2, %v459_v0, %v461_v4  ;;  %v8560_v23 = vsel %vm439_vm2, %v457_v45, %v459_v0 }
  0xf0   :  { %10500 = vst [vmem:[#allocation10_spill] sm:$0xff] %v8548_v9  ;;  %667 = vrot.lane.b32.xlu1 %v8421_v1, %s8154_s21  ;;  %665 = vrot.lane.b32.xlu0 %v8425_v3, %s8154_s21  ;;  %v8566_v24 = vpop.f32.mrb[13].mxu0  ;;  %v8569_v25 = vsel %vm535_vm5, %v555_v5, %v557_v6  ;;  %v8572_v26 = vsel %vm535_vm5, %v553_v47, %v555_v5  ;;  %v369_v28 = vrot.slane %v8548_v9, 1  ;;  %v465_v42 = vrot.slane %v8548_v9, 2 }
  0xf1   :  { %10501 = vst [vmem:[#allocation11_spill] sm:$0xff] %v8566_v24  ;;  %v8575_v27 = vsel %vm631_vm4, %v651_v7, %v653_v8  ;;  %v8579_v40 = vsel %vm631_vm4, %v649_v50, %v651_v7  ;;  %v367_v1 = vrot.slane %v8566_v24, 1  ;;  %v463_v3 = vrot.slane %v8566_v24, 2 }
  0xf2   :  { %v559_v44 = vrot.slane %v8566_v24, 3  ;;  %v561_v45 = vrot.slane %v8548_v9, 3  ;;  %v655_v46 = vrot.slane %v8566_v24, 4  ;;  %v657_v47 = vrot.slane %v8548_v9, 4 }
  0xf3   :  { %v8588_v49 = vpop.f32.mrb[14].mxu0  ;;  %v8591_v63 = vsel %vm343_vm3, %v367_v1, %v369_v28  ;;  %v8594_v50 = vsel %vm343_vm3, %v365_v61, %v367_v1  ;;  %v8597_v0 = vsel %vm439_vm2, %v463_v3, %v465_v42  ;;  %v8600_v5 = vsel %vm439_vm2, %v461_v4, %v463_v3 }
  0xf4   :  { %10502 = vst [vmem:[#allocation12_spill] sm:$0xff] %v8588_v49  ;;  %383 = vrot.lane.b32.xlu1 %v8437_v12, %s8153_s20  ;;  %381 = vrot.lane.b32.xlu0 %v8440_v13, %s8153_s20  ;;  %v8606_v7 = vpop.f32.mrb[15].mxu0  ;;  %v8609_v9 = vsel %vm535_vm5, %v559_v44, %v561_v45  ;;  %v8612_v61 = vsel %vm535_vm5, %v557_v6, %v559_v44  ;;  %v10463_v12 = vrot.slane %v8588_v49, 1  ;;  %v10464_v29 = vrot.slane %v8588_v49, 3 }
  0xf5   :  { %10503 = vst [vmem:[#allocation13_spill] sm:$0xff] %v8606_v7  ;;  %v8615_v1 = vsel %vm631_vm4, %v655_v46, %v657_v47  ;;  %v8619_v3 = vsel %vm631_vm4, %v653_v8, %v655_v46  ;;  %v371_v13 = vrot.slane %v8606_v7, 1  ;;  %v467_v51 = vrot.slane %v8606_v7, 2 }
  0xf6   :  { %v563_v24 = vrot.slane %v8606_v7, 3  ;;  %v659_v6 = vrot.slane %v8606_v7, 4  ;;  %v10465_v44 = vrot.slane %v8588_v49, 4  ;;  %v10504_v46 = vrot.slane %v8588_v49, 2 }
  0xf7   :  { %v8631_v4 = vsel %vm343_vm3, %v371_v13, %v10463_v12  ;;  %v8634_v8 = vsel %vm343_vm3, %v369_v28, %v371_v13  ;;  %v8642_v11 = vsel %vm439_vm2, %v465_v42, %v467_v51 }
  0xf8   :  { %v8639_v56 = vsel %vm439_vm2, %v467_v51, %v10504_v46  ;;  %477 = vrot.lane.b32.xlu1 %v8443_v14, %s8152_s0  ;;  %479 = vrot.lane.b32.xlu0 %v8446_v15, %s8152_s0  ;;  %v8649_v12 = vsel %vm535_vm5, %v561_v45, %v563_v24  ;;  %v8654_v28 = vsel %vm535_vm5, %v563_v24, %v10464_v29  ;;  %v8664_v14 = vpop.f32.mrb[16].mxu0 }
  0xf9   :  { %v8659_v13 = vsel %vm631_vm4, %v659_v6, %v10465_v44  ;;  %v8662_v51 = vsel %vm631_vm4, %v657_v47, %v659_v6  ;;  %10505 = vst [vmem:[#allocation14_spill] sm:$0xff] %v8664_v14  ;;  %v8670_v15 = vpop.f32.mrb[17].mxu0  ;;  %v1187_v42 = vrot.slane %v8664_v14, 1  ;;  %v1282_v6 = vrot.slane %v8664_v14, 2 }
  0xfa   :  { %10506 = vst [vmem:[#allocation15_spill] sm:$0xff] %v8670_v15  ;;  %v1186_v24 = vrot.slane %v8670_v15, 1  ;;  %v1281_v47 = vrot.slane %v8670_v15, 2  ;;  %v1377_v46 = vrot.slane %v8664_v14, 3  ;;  %v1471_v44 = vrot.slane %v8670_v15, 4 }
  0xfb   :  { %v8688_v29 = vpop.f32.mrb[18].mxu0  ;;  %v1472_v7 = vrot.slane %v8664_v14, 4 }
  0xfc   :  { %575 = vrot.lane.b32.xlu1 %v8453_v17, %s8155_s22  ;;  %573 = vrot.lane.b32.xlu0 %v8456_v18, %s8155_s22  ;;  %v8675_v45 = vsel %vm343_vm3, %v1186_v24, %v1187_v42  ;;  %v8684_v17 = vsel %vm439_vm2, %v1281_v47, %v1282_v6  ;;  %v1376_v18 = vrot.slane %v8670_v15, 3  ;;  %10507 = vst [vmem:[#allocation16_spill] sm:$0xff] %v8688_v29  ;;  %v1286_v14 = vrot.slane %v8688_v29, 2 }
  0xfd   :  { %v1476_v15 = vrot.slane %v8688_v29, 4 }
  0xfe   :  { %v8691_v24 = vsel %vm535_vm5, %v1376_v18, %v1377_v46  ;;  %v1191_v18 = vrot.slane %v8688_v29, 1 }
 0x100   :  { %671 = vrot.lane.b32.xlu1 %v8459_v19, %s8154_s21  ;;  %669 = vrot.lane.b32.xlu0 %v8463_v21, %s8154_s21  ;;  %v8699_v19 = vpop.f32.mrb[19].mxu0  ;;  %v8702_v21 = vsel %vm631_vm4, %v1471_v44, %v1472_v7 }
 0x101   :  { %10508 = vst [vmem:[#allocation17_spill] sm:$0xff] %v8699_v19  ;;  %v1189_v47 = vrot.slane %v8699_v19, 1 }
 0x103   :  { %v8707_v36 = vsel %vm343_vm3, %v1189_v47, %v1191_v18 }
 0x104   :  { %387 = vrot.lane.b32.xlu1 %v8475_v30, %s8153_s20  ;;  %385 = vrot.lane.b32.xlu0 %v8478_v31, %s8153_s20  ;;  %v8714_v30 = vsel %vm343_vm3, %v1187_v42, %v1189_v47  ;;  %v1284_v31 = vrot.slane %v8699_v19, 2  ;;  %v1381_v42 = vrot.slane %v8688_v29, 3 }
 0x106   :  { %v8718_v44 = vsel %vm439_vm2, %v1282_v6, %v1284_v31  ;;  %v8741_v6 = vpop.f32.mrb[20].mxu0 }
 0x107   :  { %10509 = vst [vmem:[#allocation18_spill] sm:$0xff] %v8741_v6 }
 0x108   :  { %483 = vrot.lane.b32.xlu1 %v8481_v32, %s8152_s0  ;;  %481 = vrot.lane.b32.xlu0 %v8484_v35, %s8152_s0  ;;  %v8726_v32 = vsel %vm439_vm2, %v1284_v31, %v1286_v14  ;;  %v1379_v35 = vrot.slane %v8699_v19, 3 }
 0x10a   :  { %v8731_v47 = vsel %vm535_vm5, %v1379_v35, %v1381_v42 }
 0x10c   :  { %579 = vrot.lane.b32.xlu1 %v8491_v37, %s8155_s22  ;;  %577 = vrot.lane.b32.xlu0 %v8494_v38, %s8155_s22  ;;  %v8738_v37 = vsel %vm535_vm5, %v1377_v46, %v1379_v35  ;;  %v1474_v38 = vrot.slane %v8699_v19, 4  ;;  %v10516_v19 = vrot.slane %v8588_v49, 2 }
 0x10e   :  { %v8744_v31 = vsel %vm631_vm4, %v1472_v7, %v1474_v38  ;;  %v1195_v7 = vrot.slane %v8741_v6, 1 }
 0x110   :  { %675 = vrot.lane.b32.xlu1 %v8497_v39, %s8154_s21  ;;  %673 = vrot.lane.b32.xlu0 %v8501_v41, %s8154_s21  ;;  %v8751_v39 = vpop.f32.mrb[21].mxu0  ;;  %v8754_v41 = vsel %vm631_vm4, %v1474_v38, %v1476_v15  ;;  %v1290_v38 = vrot.slane %v8741_v6, 2 }
 0x111   :  { %10510 = vst [vmem:[#allocation19_spill] sm:$0xff] %v8751_v39  ;;  %v1193_v46 = vrot.slane %v8751_v39, 1 }
 0x113   :  { %v8758_v35 = vsel %vm343_vm3, %v1191_v18, %v1193_v46 }
 0x114   :  { %391 = vrot.lane.b32.xlu1 %v8513_v52, %s8153_s20  ;;  %389 = vrot.lane.b32.xlu0 %v8516_v53, %s8153_s20  ;;  %v8766_v52 = vsel %vm343_vm3, %v1193_v46, %v1195_v7  ;;  %v1288_v53 = vrot.slane %v8751_v39, 2  ;;  %v1385_v46 = vrot.slane %v8741_v6, 3 }
 0x116   :  { %v8771_v29 = vsel %vm439_vm2, %v1288_v53, %v1290_v38 }
 0x118   :  { %487 = vrot.lane.b32.xlu1 %v8519_v54, %s8152_s0  ;;  %485 = vrot.lane.b32.xlu0 %v8522_v55, %s8152_s0  ;;  %v8778_v54 = vsel %vm439_vm2, %v1286_v14, %v1288_v53  ;;  %v1383_v55 = vrot.slane %v8751_v39, 3  ;;  %v8793_v14 = vpop.f32.mrb[22].mxu0 }
 0x119   :  { %10511 = vst [vmem:[#allocation20_spill] sm:$0xff] %v8793_v14 }
 0x11a   :  { %v8782_v18 = vsel %vm535_vm5, %v1381_v42, %v1383_v55  ;;  %v1480_v42 = vrot.slane %v8741_v6, 4  ;;  %v1294_v6 = vrot.slane %v8793_v14, 2 }
 0x11c   :  { %583 = vrot.lane.b32.xlu1 %v8529_v58, %s8155_s22  ;;  %581 = vrot.lane.b32.xlu0 %v8532_v59, %s8155_s22  ;;  %v8790_v58 = vsel %vm535_vm5, %v1383_v55, %v1385_v46  ;;  %v1478_v59 = vrot.slane %v8751_v39, 4 }
 0x11e   :  { %v8796_v53 = vsel %vm631_vm4, %v1476_v15, %v1478_v59  ;;  %v1199_v15 = vrot.slane %v8793_v14, 1 }
 0x120   :  { %679 = vrot.lane.b32.xlu1 %v8535_v60, %s8154_s21  ;;  %677 = vrot.lane.b32.xlu0 %v8539_v2, %s8154_s21  ;;  %v8803_v60 = vpop.f32.mrb[23].mxu0  ;;  %v8806_v2 = vsel %vm631_vm4, %v1478_v59, %v1480_v42 }
 0x121   :  { %10512 = vst [vmem:[#allocation21_spill] sm:$0xff] %v8803_v60  ;;  %v1197_v55 = vrot.slane %v8803_v60, 1 }
 0x123   :  { %v8810_v39 = vsel %vm343_vm3, %v1195_v7, %v1197_v55 }
 0x124   :  { %395 = vrot.lane.b32.xlu1 %v8551_v10, %s8153_s20  ;;  %393 = vrot.lane.b32.xlu0 %v8554_v20, %s8153_s20  ;;  %v8818_v10 = vsel %vm343_vm3, %v1197_v55, %v1199_v15  ;;  %v1292_v20 = vrot.slane %v8803_v60, 2  ;;  %v1389_v55 = vrot.slane %v8793_v14, 3 }
 0x126   :  { %v8822_v59 = vsel %vm439_vm2, %v1290_v38, %v1292_v20  ;;  %v8845_v38 = vpop.f32.mrb[24].mxu0 }
 0x127   :  { %10513 = vst [vmem:[#allocation22_spill] sm:$0xff] %v8845_v38 }
 0x128   :  { %491 = vrot.lane.b32.xlu1 %v8557_v22, %s8152_s0  ;;  %489 = vrot.lane.b32.xlu0 %v8560_v23, %s8152_s0  ;;  %v8830_v22 = vsel %vm439_vm2, %v1292_v20, %v1294_v6  ;;  %v1387_v23 = vrot.slane %v8803_v60, 3 }
 0x12a   :  { %v8834_v7 = vsel %vm535_vm5, %v1385_v46, %v1387_v23  ;;  %v1484_v46 = vrot.slane %v8793_v14, 4  ;;  %v1298_v14 = vrot.slane %v8845_v38, 2 }
 0x12c   :  { %587 = vrot.lane.b32.xlu1 %v8569_v25, %s8155_s22  ;;  %585 = vrot.lane.b32.xlu0 %v8572_v26, %s8155_s22  ;;  %v8842_v25 = vsel %vm535_vm5, %v1387_v23, %v1389_v55  ;;  %v1482_v26 = vrot.slane %v8803_v60, 4 }
 0x12e   :  { %v8848_v20 = vsel %vm631_vm4, %v1480_v42, %v1482_v26  ;;  %v1203_v42 = vrot.slane %v8845_v38, 1 }
 0x130   :  { %683 = vrot.lane.b32.xlu1 %v8575_v27, %s8154_s21  ;;  %681 = vrot.lane.b32.xlu0 %v8579_v40, %s8154_s21  ;;  %v8855_v27 = vpop.f32.mrb[25].mxu0  ;;  %v8858_v40 = vsel %vm631_vm4, %v1482_v26, %v1484_v46 }
 0x131   :  { %10514 = vst [vmem:[#allocation23_spill] sm:$0xff] %v8855_v27  ;;  %v1201_v23 = vrot.slane %v8855_v27, 1 }
 0x133   :  { %v8862_v60 = vsel %vm343_vm3, %v1199_v15, %v1201_v23 }
 0x134   :  { %399 = vrot.lane.b32.xlu1 %v8591_v63, %s8153_s20  ;;  %397 = vrot.lane.b32.xlu0 %v8594_v50, %s8153_s20  ;;  %v8870_v63 = vsel %vm343_vm3, %v1201_v23, %v1203_v42  ;;  %v1296_v50 = vrot.slane %v8855_v27, 2  ;;  %v1393_v23 = vrot.slane %v8845_v38, 3 }
 0x136   :  { %v8874_v26 = vsel %vm439_vm2, %v1294_v6, %v1296_v50  ;;  %v8897_v6 = vpop.f32.mrb[26].mxu0 }
 0x137   :  { %10515 = vst [vmem:[#allocation24_spill] sm:$0xff] %v8897_v6 }
 0x138   :  { %495 = vrot.lane.b32.xlu1 %v8597_v0, %s8152_s0  ;;  %493 = vrot.lane.b32.xlu0 %v8600_v5, %s8152_s0  ;;  %v8882_v0 = vsel %vm439_vm2, %v1296_v50, %v1298_v14  ;;  %v1391_v5 = vrot.slane %v8855_v27, 3 }
 0x13a   :  { %v8886_v15 = vsel %vm535_vm5, %v1389_v55, %v1391_v5  ;;  %v1488_v55 = vrot.slane %v8845_v38, 4  ;;  %v1207_v38 = vrot.slane %v8897_v6, 1 }
 0x13c   :  { %591 = vrot.lane.b32.xlu1 %v8609_v9, %s8155_s22  ;;  %589 = vrot.lane.b32.xlu0 %v8612_v61, %s8155_s22  ;;  %v8894_v9 = vsel %vm535_vm5, %v1391_v5, %v1393_v23  ;;  %v1486_v61 = vrot.slane %v8855_v27, 4 }
 0x13e   :  { %v8900_v50 = vsel %vm631_vm4, %v1484_v46, %v1486_v61  ;;  %v8912_v5 = vsel %vm631_vm4, %v1486_v61, %v1488_v55 }
 0x13f   :  { %10519 = vst [vmem:[#allocation26_spill] sm:$0xff] %v8912_v5  ;;  %v1302_v5 = vrot.slane %v8897_v6, 2 }
 0x140   :  { %687 = vrot.lane.b32.xlu1 %v8615_v1, %s8154_s21  ;;  %685 = vrot.lane.b32.xlu0 %v8619_v3, %s8154_s21  ;;  %v10517_v1 = vrot.slane %v8588_v49, 1  ;;  %v8909_v3 = vpop.f32.mrb[27].mxu0 }
 0x141   :  { %10518 = vst [vmem:[#allocation25_spill] sm:$0xff] %v8909_v3  ;;  %v1205_v27 = vrot.slane %v8909_v3, 1 }
 0x143   :  { %v8916_v46 = vsel %vm343_vm3, %v1203_v42, %v1205_v27 }
 0x144   :  { %501 = vrot.lane.b32.xlu1 %v10516_v19, %s8152_s0  ;;  %405 = vrot.lane.b32.xlu0 %v10517_v1, %s8153_s20  ;;  %10520 = vst [vmem:[#allocation27_spill] sm:$0xff] %v8916_v46  ;;  %v8924_v19 = vsel %vm343_vm3, %v1205_v27, %v1207_v38  ;;  %v1300_v1 = vrot.slane %v8909_v3, 2 }
 0x145   :  { %10521 = vst [vmem:[#allocation28_spill] sm:$0xff] %v8924_v19 }
 0x146   :  { %v8928_v61 = vsel %vm439_vm2, %v1298_v14, %v1300_v1 }
 0x147   :  { %10522 = vst [vmem:[#allocation29_spill] sm:$0xff] %v8928_v61  ;;  %v1397_v61 = vrot.slane %v8897_v6, 3 }
 0x148   :  { %403 = vrot.lane.b32.xlu1 %v8631_v4, %s8153_s20  ;;  %401 = vrot.lane.b32.xlu0 %v8634_v8, %s8153_s20  ;;  %v8936_v4 = vsel %vm439_vm2, %v1300_v1, %v1302_v5  ;;  %v1395_v8 = vrot.slane %v8909_v3, 3 }
 0x149   :  { %10523 = vst [vmem:[#allocation30_spill] sm:$0xff] %v8936_v4 }
 0x14a   :  { %v8941_v14 = vsel %vm535_vm5, %v1393_v23, %v1395_v8 }
 0x14b   :  { %10524 = vst [vmem:[#allocation31_spill] sm:$0xff] %v8941_v14  ;;  %v8996_v14 = vld [vmem:[%s10443_s2] ss:$0 sm:$0xff] }
 0x14c   :  { %499 = vrot.lane.b32.xlu1 %v8639_v56, %s8152_s0  ;;  %497 = vrot.lane.b32.xlu0 %v8642_v11, %s8152_s0  ;;  %v8949_v11 = vsel %vm535_vm5, %v1395_v8, %v1397_v61  ;;  %v1490_v56 = vrot.slane %v8909_v3, 4 }
 0x14d   :  { %10525 = vst [vmem:[#allocation32_spill] sm:$0xff] %v8949_v11 }
 0x14e   :  { %v472_v27 = vpop.permute.xlu1 %471  ;;  %v376_v42 = vpop.permute.xlu0 %375  ;;  %v8955_v23 = vsel %vm631_vm4, %v1488_v55, %v1490_v56 }
 0x14f   :  { %v423_v19 = vadd.f32 %v376_v42, %v8380_v34  ;;  %v8952_v34 = vpop.f32.mrb[28].mxu0  ;;  %10526 = vst [vmem:[#allocation33_spill] sm:$0xff] %v8955_v23  ;;  %v10479_v42 = vrot.slane %v8897_v6, 4 }
 0x150   :  { %593 = vrot.lane.b32.xlu1 %v8649_v12, %s8155_s22  ;;  %595 = vrot.lane.b32.xlu0 %v8654_v28, %s8155_s22  ;;  %v8962_v12 = vpop.f32.mrb[29].mxu0 }
 0x151   :  { %v519_v46 = vadd.f32 %v472_v27, %v423_v19  ;;  %10527 = vst [vmem:[#allocation34_spill] sm:$0xff] %v8962_v12  ;;  %v8967_v28 = vsel %vm631_vm4, %v1490_v56, %v10479_v42  ;;  %v1209_v19 = vrot.slane %v8962_v12, 1  ;;  %v86_v27 = vlaneseq }
 0x152   :  { %v664_v1 = vpop.permute.xlu1 %663  ;;  %v568_v4 = vpop.permute.xlu0 %567  ;;  %10528 = vst [vmem:[#allocation35_spill] sm:$0xff] %v8967_v28  ;;  %v10481_v56 = vrot.slane %v8952_v34, 1  ;;  %v1304_v28 = vrot.slane %v8962_v12, 2 }
 0x153   :  { %v615_v3 = vadd.f32 %v568_v4, %v519_v46  ;;  %v8971_v23 = vsel %vm343_vm3, %v1207_v38, %v1209_v19  ;;  %v8980_v42 = vshrl.u32 %v86_v27, 7 }
 0x154   :  { %691 = vrot.lane.b32.xlu1 %v8659_v13, %s8154_s21  ;;  %689 = vrot.lane.b32.xlu0 %v8662_v51, %s8154_s21  ;;  %10529 = vst [vmem:[#allocation36_spill] sm:$0xff] %v8971_v23  ;;  %v10530_v13 = vrot.slane %v8588_v49, 4  ;;  %v10531_v51 = vrot.slane %v8588_v49, 3  ;;  %v8987_v38 = vsel %vm343_vm3, %v1209_v19, %v10481_v56  ;;  %v8991_v49 = vand.u32 127, %v86_v27 }
 0x155   :  { %v711_v23 = vadd.f32 %v664_v1, %v615_v3  ;;  %v97_v19 = vmul.u32 2, %v8980_v42  ;;  %v9004_v3 = vsel %vm439_vm2, %v1302_v5, %v1304_v28  ;;  %v10482_v56 = vmov 0.0  }
 0x156   :  { %v380_v8 = vpop.permute.xlu1 %379  ;;  %v378_v55 = vpop.permute.xlu0 %377  ;;  %10532 = vst [vmem:[#allocation37_spill] sm:$0xff] %v9004_v3  ;;  %v10534_v1 = vmov 0 }
 0x157   :  { %v424_v11 = vadd.f32 %v8378_v33, %v378_v55  ;;  %v89_v55 = vadd.s32 16, %v8980_v42  ;;  %vm105_vm6 = vcmp.eq.s32.totalorder %v8991_v49, %v97_v19 }
 0x158   :  { %693 = vrot.lane.b32.xlu1 %v10530_v13, %s8154_s21  ;;  %597 = vrot.lane.b32.xlu0 %v10531_v51, %s8155_s22  ;;  %v88_v13 = vadd.s32 8, %v8980_v42  ;;  %v425_v51 = vadd.f32 %v380_v8, %v8398_v48  ;;  %v1399_v8 = vrot.slane %v8962_v12, 3 }
 0x159   :  { %v99_v19 = vmul.u32 2, %v89_v55 }
 0x15a   :  { %v476_v46 = vpop.permute.xlu1 %475  ;;  %v474_v4 = vpop.permute.xlu0 %473  ;;  %v98_v48 = vmul.u32 2, %v88_v13  ;;  %v9015_v13 = vsel %vm105_vm6, 1.0, %v10482_v56  ;;  %vm2175_vm6 = vcmask 465920  }
 0x15b   :  { %v520_v33 = vadd.f32 %v474_v4, %v424_v11  ;;  %v521_v27 = vadd.f32 %v476_v46, %v425_v51  ;;  %10533 = vst [vmem:[#allocation38_spill] sm:$0xff] %v9015_v13  ;;  %7064 = vmatprep.mubr.msk.f32.mxu1 %vm844_vm7, %v9015_v13  ;;  %vm9040_vm9 = vcmp.eq.s32.totalorder %v8991_v49, %v99_v19 }
 0x15c   :  { %1217 = vrot.lane.b32.xlu0 %v8675_v45, %s8153_s20  ;;  %1312 = vrot.lane.b32.xlu1 %v8684_v17, %s8152_s0  ;;  %v90_v45 = vadd.s32 24, %v8980_v42  ;;  %v9012_v17 = vadd.f32 %v8996_v14, %v711_v23  ;;  %vm9018_vm8 = vcmp.eq.s32.totalorder %v8991_v49, %v98_v48  ;;  %v10537_v23 = vrot.slane %v8952_v34, 2 }
 0x15d   :  { %v10535_v1 = vsel %vm9018_vm8, 4294967295, %v10534_v1 }
 0x15e   :  { %v570_v11 = vpop.permute.xlu1 %569  ;;  %v572_v4 = vpop.permute.xlu0 %571  ;;  %10536 = vst [vmem:[#allocation39_spill] sm:$0xff] %v10535_v1  ;;  %v9029_v51 = vsel %vm439_vm2, %v1304_v28, %v10537_v23  ;;  %v100_v48 = vmul.u32 2, %v90_v45  ;;  %v10540_v28 = vmov 0  ;;  %v749_v56 = vmax.f32 %v9012_v17, 0.0 }
 0x15f   :  { %v616_v5 = vadd.f32 %v570_v11, %v520_v33  ;;  %v617_v46 = vadd.f32 %v572_v4, %v521_v27  ;;  %10538 = vst [vmem:[#allocation40_spill] sm:$0xff] %v9029_v51  ;;  %v9032_v33 = vsel %vm535_vm5, %v1397_v61, %v1399_v8  ;;  %v10487_v27 = vrot.slane %v8952_v34, 3 }
 0x160   :  { %1407 = vrot.lane.b32.xlu0 %v8691_v24, %s8155_s22  ;;  %1502 = vrot.lane.b32.xlu1 %v8702_v21, %s8154_s21  ;;  %10539 = vst [vmem:[#allocation41_spill] sm:$0xff] %v9032_v33  ;;  %v1494_v24 = vrot.slane %v8962_v12, 4  ;;  %v91_v11 = vadd.s32 32, %v8980_v42  ;;  %v10541_v28 = vsel %vm9040_vm9, 4294967295, %v10540_v28  ;;  %v92_v61 = vadd.s32 40, %v8980_v42 }
 0x161   :  { %10542 = vst [vmem:[#allocation42_spill] sm:$0xff] %v10541_v28  ;;  %vm9047_vm10 = vcmp.eq.s32.totalorder %v8991_v49, %v100_v48  ;;  %v10543_v45 = vmov 0  ;;  %v9058_v19 = vsel %vm535_vm5, %v1399_v8, %v10487_v27  ;;  %v10549_v8 = vmov 0 }
 0x162   :  { %v668_v21 = vpop.permute.xlu1 %667  ;;  %v666_v4 = vpop.permute.xlu0 %665  ;;  %v10544_v45 = vsel %vm9047_vm10, 4294967295, %v10543_v45  ;;  %10546 = vst [vmem:[#allocation44_spill] sm:$0xff] %v9058_v19  ;;  %v781_v27 = vrot.slane %v749_v56, 1  ;;  %v10556_v1 = vrot.slane %v8952_v34, 1 }
 0x163   :  { %v713_v55 = vadd.f32 %v668_v21, %v617_v46  ;;  %v712_v23 = vadd.f32 %v666_v4, %v616_v5  ;;  %10545 = vst [vmem:[#allocation43_spill] sm:$0xff] %v10544_v45  ;;  %v10547_v5 = vrot.slane %v8897_v6, 4  ;;  %v101_v46 = vmul.u32 2, %v91_v11  ;;  %v9069_v4 = vpop.f32.mrb[30].mxu0 }
 0x164   :  { %1221 = vrot.lane.b32.xlu0 %v8707_v36, %s8153_s20  ;;  %1219 = vrot.lane.b32.xlu1 %v8714_v30, %s8153_s20  ;;  %v102_v36 = vmul.u32 2, %v92_v61  ;;  %v1496_v30 = vrot.slane %v8952_v34, 4  ;;  %v9079_v6 = vpop.f32.mrb[31].mxu0  ;;  %v10552_v61 = vmov 0 }
 0x165   :  { %v9063_v17 = vsel %vm631_vm4, %v10547_v5, %v1494_v24  ;;  %v9066_v48 = vadd.f32 %v8996_v14, %v713_v55  ;;  %v734_v21 = vadd.f32 %v8996_v14, %v712_v23  ;;  %vm9073_vm11 = vcmp.eq.s32.totalorder %v8991_v49, %v101_v46 }
 0x166   :  { %10548 = vst [vmem:[#allocation45_spill] sm:$0xff] %v9063_v17  ;;  %v384_v12 = vpop.permute.xlu1 %383  ;;  %v382_v13 = vpop.permute.xlu0 %381  ;;  %v10550_v8 = vsel %vm9073_vm11, 4294967295, %v10549_v8  ;;  %v93_v5 = vadd.s32 48, %v8980_v42  ;;  %vm9086_vm12 = vcmp.eq.s32.totalorder %v8991_v49, %v102_v36  ;;  %v9091_v23 = vsel %vm631_vm4, %v1494_v24, %v1496_v30 }
 0x167   :  { %10551 = vst [vmem:[#allocation46_spill] sm:$0xff] %v10550_v8  ;;  %v10494_v11 = vmax.f32 %v9066_v48, 0.0  ;;  %v750_v55 = vmax.f32 %v734_v21, 0.0  ;;  %v10553_v61 = vsel %vm9086_vm12, 4294967295, %v10552_v61  ;;  %10555 = vst [vmem:[#allocation48_spill] sm:$0xff] %v9091_v23  ;;  %v1215_v46 = vrot.slane %v9069_v4, 1 }
 0x168   :  { %1314 = vrot.lane.b32.xlu0 %v8718_v44, %s8152_s0  ;;  %1316 = vrot.lane.b32.xlu1 %v8726_v32, %s8152_s0  ;;  %10554 = vst [vmem:[#allocation47_spill] sm:$0xff] %v10553_v61  ;;  %v1213_v21 = vrot.slane %v9079_v6, 1  ;;  %v1308_v32 = vrot.slane %v9079_v6, 2  ;;  %v103_v23 = vmul.u32 2, %v93_v5  ;;  %v427_v17 = vadd.f32 %v384_v12, %v8416_v62 }
 0x169   :  { %v784_v8 = vrot.slane %v10494_v11, 1  ;;  %v782_v45 = vrot.slane %v750_v55, 1  ;;  %v94_v11 = vadd.s32 56, %v8980_v42  ;;  %v426_v44 = vadd.f32 %v8390_v43, %v382_v13 }
 0x16a   :  { %v478_v28 = vpop.permute.xlu1 %477  ;;  %v480_v36 = vpop.permute.xlu0 %479  ;;  %v9102_v61 = vsel %vm343_vm3, %v10556_v1, %v1213_v21  ;;  %v9107_v24 = vsel %vm343_vm3, %v1213_v21, %v1215_v46  ;;  %v10557_v1 = vrot.slane %v8952_v34, 2  ;;  %vm9124_vm13 = vcmp.eq.s32.totalorder %v8991_v49, %v103_v23 }
 0x16b   :  { %v783_v19 = vsel %vm343_vm3, %v781_v27, %v782_v45  ;;  %v785_v33 = vsel %vm343_vm3, %v782_v45, %v784_v8  ;;  %v104_v62 = vmul.u32 2, %v94_v11  ;;  %v10560_v12 = vrot.slane %v9069_v4, 2 }
 0x16c   :  { %v828_v51 = vmax.f32 %v749_v56, %v783_v19  ;;  %v829_v3 = vmax.f32 %v750_v55, %v785_v33  ;;  %1411 = vrot.lane.b32.xlu0 %v8731_v47, %s8155_s22  ;;  %1409 = vrot.lane.b32.xlu1 %v8738_v37, %s8155_s22  ;;  %v9121_v42 = vsel %vm439_vm2, %v10557_v1, %v1308_v32  ;;  %v1403_v47 = vrot.slane %v9079_v6, 3 }
 0x16d   :  { %v9131_v56 = vsel %vm439_vm2, %v1308_v32, %v10560_v12  ;;  %v1405_v37 = vrot.slane %v9069_v4, 3  ;;  %vm9136_vm14 = vcmp.eq.s32.totalorder %v8991_v49, %v104_v62  ;;  %v1498_v19 = vrot.slane %v9079_v6, 4 }
 0x16e   :  { %v576_v13 = vpop.permute.xlu1 %575  ;;  %v574_v33 = vpop.permute.xlu0 %573  ;;  %v7684_v27 = vpack.c.bf16 %v829_v3, %v828_v51  ;;  %v522_v5 = vadd.f32 %v478_v28, %v426_v44  ;;  %v523_v11 = vadd.f32 %v480_v36, %v427_v17  ;;  %v10563_v3 = vrot.slane %v8952_v34, 3 }
 0x16f   :  { %v9144_v55 = vsel %vm535_vm5, %v1403_v47, %v1405_v37  ;;  %v9154_v51 = vsel %vm631_vm4, %v1496_v30, %v1498_v19  ;;  %v1500_v28 = vrot.slane %v9069_v4, 4 }
 0x170   :  { %7685 = vmatprep.subr.bf16.mxu1 %v7684_v27  ;;  %1504 = vrot.lane.b32.xlu0 %v8744_v31, %s8154_s21  ;;  %v9151_v49 = vsel %vm535_vm5, %v10563_v3, %v1403_v47  ;;  %v619_v17 = vadd.f32 %v576_v13, %v523_v11  ;;  %v618_v23 = vadd.f32 %v574_v33, %v522_v5 }
 0x171   :  { %7687 = vmatpush3.bf16.msra.mxu1 %v7684_v27  ;;  %1506 = vrot.lane.b32.xlu1 %v8754_v41, %s8154_s21  ;;  %v9162_v31 = vsel %vm631_vm4, %v1498_v19, %v1500_v28 }
 0x172   :  { %v672_v21 = vpop.permute.xlu1 %671  ;;  %v670_v44 = vpop.permute.xlu0 %669 }
 0x173   :  { %v715_v32 = vadd.f32 %v672_v21, %v619_v17  ;;  %v714_v36 = vadd.f32 %v670_v44, %v618_v23 }
 0x174   :  { %1223 = vrot.lane.b32.xlu0 %v8758_v35, %s8153_s20 }
 0x175   :  { %v737_v30 = vadd.f32 %v8996_v14, %v715_v32  ;;  %v736_v1 = vadd.f32 %v8996_v14, %v714_v36  ;;  %1225 = vrot.lane.b32.xlu1 %v8766_v52, %s8153_s20  ;;  %v10564_v52 = vmax.f32 %v9066_v48, 0.0 }
 0x176   :  { %v388_v41 = vpop.permute.xlu1 %387  ;;  %v386_v62 = vpop.permute.xlu0 %385 }
 0x177   :  { %v753_v12 = vmax.f32 %v737_v30, 0.0  ;;  %v752_v47 = vmax.f32 %v736_v1, 0.0  ;;  %v428_v17 = vadd.f32 %v8408_v57, %v386_v62 }
 0x178   :  { %1320 = vrot.lane.b32.xlu0 %v8771_v29, %s8152_s0  ;;  %v429_v29 = vadd.f32 %v388_v41, %v8450_v16 }
 0x179   :  { %v788_v13 = vrot.slane %v753_v12, 1  ;;  %v786_v33 = vrot.slane %v752_v47, 1  ;;  %1318 = vrot.lane.b32.xlu1 %v8778_v54, %s8152_s0 }
 0x17a   :  { %v484_v35 = vpop.permute.xlu1 %483  ;;  %v482_v27 = vpop.permute.xlu0 %481 }
 0x17b   :  { %v787_v19 = vsel %vm343_vm3, %v784_v8, %v786_v33  ;;  %v789_v5 = vsel %vm343_vm3, %v786_v33, %v788_v13  ;;  %v525_v8 = vadd.f32 %v484_v35, %v429_v29  ;;  %v524_v44 = vadd.f32 %v482_v27, %v428_v17 }
 0x17c   :  { %v830_v11 = vmax.f32 %v10564_v52, %v787_v19  ;;  %v831_v3 = vmax.f32 %v752_v47, %v789_v5  ;;  %1413 = vrot.lane.b32.xlu0 %v8782_v18, %s8155_s22  ;;  %v10565_v5 = vld [vmem:[#allocation7_spill] sm:$0xff] }
 0x17d   :  { %1415 = vrot.lane.b32.xlu1 %v8790_v58, %s8155_s22 }
 0x17e   :  { %v580_v54 = vpop.permute.xlu1 %579  ;;  %v578_v23 = vpop.permute.xlu0 %577  ;;  %v7688_v21 = vpack.c.bf16 %v831_v3, %v830_v11  ;;  %v10566_v11 = vld [vmem:[#allocation5_spill] sm:$0xff] }
 0x17f   :  { %v621_v48 = vadd.f32 %v580_v54, %v525_v8  ;;  %v620_v32 = vadd.f32 %v578_v23, %v524_v44 }
 0x180   :  { %7689 = vmatprep.subr.bf16.mxu1 %v7688_v21  ;;  %1508 = vrot.lane.b32.xlu0 %v8796_v53, %s8154_s21 }
 0x181   :  { %7691 = vmatpush3.bf16.msra.mxu1 %v7688_v21  ;;  %1510 = vrot.lane.b32.xlu1 %v8806_v2, %s8154_s21 }
 0x182   :  { %v676_v16 = vpop.permute.xlu1 %675  ;;  %v674_v57 = vpop.permute.xlu0 %673 }
 0x183   :  { %v717_v18 = vadd.f32 %v676_v16, %v621_v48  ;;  %v716_v36 = vadd.f32 %v674_v57, %v620_v32 }
 0x184   :  { %1227 = vrot.lane.b32.xlu0 %v8810_v39, %s8153_s20 }
 0x185   :  { %v739_v58 = vadd.f32 %v8996_v14, %v717_v18  ;;  %v738_v30 = vadd.f32 %v8996_v14, %v716_v36  ;;  %1229 = vrot.lane.b32.xlu1 %v8818_v10, %s8153_s20 }
 0x186   :  { %v392_v53 = vpop.permute.xlu1 %391  ;;  %v390_v1 = vpop.permute.xlu0 %389 }
 0x187   :  { %v755_v41 = vmax.f32 %v739_v58, 0.0  ;;  %v754_v62 = vmax.f32 %v738_v30, 0.0  ;;  %v431_v52 = vadd.f32 %v392_v53, %v10565_v5  ;;  %v10567_v53 = vld [vmem:[#allocation9_spill] sm:$0xff] }
 0x188   :  { %1322 = vrot.lane.b32.xlu0 %v8822_v59, %s8152_s0  ;;  %v430_v59 = vadd.f32 %v10566_v11, %v390_v1 }
 0x189   :  { %v792_v2 = vrot.slane %v755_v41, 1  ;;  %v790_v47 = vrot.slane %v754_v62, 1  ;;  %1324 = vrot.lane.b32.xlu1 %v8830_v22, %s8152_s0 }
 0x18a   :  { %v488_v39 = vpop.permute.xlu1 %487  ;;  %v486_v33 = vpop.permute.xlu0 %485 }
 0x18b   :  { %v791_v35 = vsel %vm343_vm3, %v788_v13, %v790_v47  ;;  %v793_v27 = vsel %vm343_vm3, %v790_v47, %v792_v2  ;;  %v527_v17 = vadd.f32 %v488_v39, %v431_v52  ;;  %v526_v54 = vadd.f32 %v486_v33, %v430_v59  ;;  %v10571_v59 = vld [vmem:[#allocation28_spill] sm:$0xff] }
 0x18c   :  { %v832_v19 = vmax.f32 %v753_v12, %v791_v35  ;;  %v833_v10 = vmax.f32 %v754_v62, %v793_v27  ;;  %1417 = vrot.lane.b32.xlu0 %v8834_v7, %s8155_s22  ;;  %v10568_v62 = vld [vmem:[#allocation6_spill] sm:$0xff] }
 0x18d   :  { %1419 = vrot.lane.b32.xlu1 %v8842_v25, %s8155_s22 }
 0x18e   :  { %v584_v3 = vpop.permute.xlu1 %583  ;;  %v582_v22 = vpop.permute.xlu0 %581  ;;  %v7692_v29 = vpack.c.bf16 %v833_v10, %v832_v19 }
 0x18f   :  { %v623_v12 = vadd.f32 %v584_v3, %v527_v17  ;;  %v622_v13 = vadd.f32 %v582_v22, %v526_v54  ;;  %v10572_v17 = vld [vmem:[#allocation29_spill] sm:$0xff] }
 0x190   :  { %7693 = vmatprep.subr.bf16.mxu1 %v7692_v29  ;;  %1512 = vrot.lane.b32.xlu0 %v8848_v20, %s8154_s21 }
 0x191   :  { %7695 = vmatpush3.bf16.msra.mxu1 %v7692_v29  ;;  %1514 = vrot.lane.b32.xlu1 %v8858_v40, %s8154_s21 }
 0x192   :  { %v680_v7 = vpop.permute.xlu1 %679  ;;  %v678_v23 = vpop.permute.xlu0 %677 }
 0x193   :  { %v719_v21 = vadd.f32 %v680_v7, %v623_v12  ;;  %v718_v8 = vadd.f32 %v678_v23, %v622_v13  ;;  %v10573_v13 = vld [vmem:[#allocation30_spill] sm:$0xff] }
 0x194   :  { %1231 = vrot.lane.b32.xlu0 %v8862_v60, %s8153_s20 }
 0x195   :  { %v741_v25 = vadd.f32 %v8996_v14, %v719_v21  ;;  %v740_v44 = vadd.f32 %v8996_v14, %v718_v8  ;;  %1233 = vrot.lane.b32.xlu1 %v8870_v63, %s8153_s20 }
 0x196   :  { %v396_v20 = vpop.permute.xlu1 %395  ;;  %v394_v48 = vpop.permute.xlu0 %393 }
 0x197   :  { %v757_v32 = vmax.f32 %v741_v25, 0.0  ;;  %v756_v16 = vmax.f32 %v740_v44, 0.0  ;;  %v433_v1 = vadd.f32 %v396_v20, %v10567_v53  ;;  %v10574_v20 = vld [vmem:[#allocation31_spill] sm:$0xff] }
 0x198   :  { %1326 = vrot.lane.b32.xlu0 %v8874_v26, %s8152_s0  ;;  %v432_v26 = vadd.f32 %v10568_v62, %v394_v48  ;;  %v10575_v48 = vld [vmem:[#allocation11_spill] sm:$0xff] }
 0x199   :  { %v796_v40 = vrot.slane %v757_v32, 1  ;;  %v794_v57 = vrot.slane %v756_v16, 1  ;;  %1328 = vrot.lane.b32.xlu1 %v8882_v0, %s8152_s0  ;;  %v10579_v62 = vld [vmem:[#allocation35_spill] sm:$0xff] }
 0x19a   :  { %v492_v60 = vpop.permute.xlu1 %491  ;;  %v490_v18 = vpop.permute.xlu0 %489 }
 0x19b   :  { %v795_v36 = vsel %vm343_vm3, %v792_v2, %v794_v57  ;;  %v797_v58 = vsel %vm343_vm3, %v794_v57, %v796_v40  ;;  %v529_v33 = vadd.f32 %v492_v60, %v433_v1  ;;  %v528_v35 = vadd.f32 %v490_v18, %v432_v26  ;;  %v10576_v57 = vld [vmem:[#allocation8_spill] sm:$0xff] }
 0x19c   :  { %v834_v30 = vmax.f32 %v755_v41, %v795_v36  ;;  %v835_v63 = vmax.f32 %v756_v16, %v797_v58  ;;  %1421 = vrot.lane.b32.xlu0 %v8886_v15, %s8155_s22  ;;  %v10569_v15 = vld [vmem:[#allocation26_spill] sm:$0xff]  ;;  %v10577_v18 = vld [vmem:[#allocation32_spill] sm:$0xff] }
 0x19d   :  { %1423 = vrot.lane.b32.xlu1 %v8894_v9, %s8155_s22  ;;  %v10570_v9 = vld [vmem:[#allocation27_spill] sm:$0xff] }
 0x19e   :  { %v588_v47 = vpop.permute.xlu1 %587  ;;  %v586_v0 = vpop.permute.xlu0 %585  ;;  %v7696_v39 = vpack.c.bf16 %v835_v63, %v834_v30 }
 0x19f   :  { %v625_v41 = vadd.f32 %v588_v47, %v529_v33  ;;  %v624_v2 = vadd.f32 %v586_v0, %v528_v35  ;;  %v10580_v33 = vld [vmem:[#allocation36_spill] sm:$0xff] }
 0x1a0   :  { %7697 = vmatprep.subr.bf16.mxu1 %v7696_v39  ;;  %1516 = vrot.lane.b32.xlu0 %v8900_v50, %s8154_s21 }
 0x1a1   :  { %7699 = vmatpush3.bf16.msra.mxu1 %v7696_v39  ;;  %1518 = vrot.lane.b32.xlu1 %v10569_v15, %s8154_s21 }
 0x1a2   :  { %v684_v27 = vpop.permute.xlu1 %683  ;;  %v682_v19 = vpop.permute.xlu0 %681 }
 0x1a3   :  { %v721_v10 = vadd.f32 %v684_v27, %v625_v41  ;;  %v720_v5 = vadd.f32 %v682_v19, %v624_v2 }
 0x1a4   :  { %1235 = vrot.lane.b32.xlu0 %v10570_v9, %s8153_s20 }
 0x1a5   :  { %v743_v52 = vadd.f32 %v8996_v14, %v721_v10  ;;  %v742_v11 = vadd.f32 %v8996_v14, %v720_v5  ;;  %1237 = vrot.lane.b32.xlu1 %v10571_v59, %s8153_s20  ;;  %v10581_v10 = vld [vmem:[#allocation37_spill] sm:$0xff] }
 0x1a6   :  { %v400_v50 = vpop.permute.xlu1 %399  ;;  %v398_v3 = vpop.permute.xlu0 %397 }
 0x1a7   :  { %v759_v22 = vmax.f32 %v743_v52, 0.0  ;;  %v758_v29 = vmax.f32 %v742_v11, 0.0  ;;  %v435_v16 = vadd.f32 %v400_v50, %v10575_v48  ;;  %v434_v60 = vadd.f32 %v10576_v57, %v398_v3  ;;  %v10582_v52 = vld [vmem:[#allocation40_spill] sm:$0xff] }
 0x1a8   :  { %1330 = vrot.lane.b32.xlu0 %v10572_v17, %s8152_s0  ;;  %v10583_v17 = vld [vmem:[#allocation41_spill] sm:$0xff] }
 0x1a9   :  { %v800_v54 = vrot.slane %v759_v22, 1  ;;  %v798_v12 = vrot.slane %v758_v29, 1  ;;  %1332 = vrot.lane.b32.xlu1 %v10573_v13, %s8152_s0 }
 0x1aa   :  { %v496_v7 = vpop.permute.xlu1 %495  ;;  %v494_v23 = vpop.permute.xlu0 %493 }
 0x1ab   :  { %v799_v21 = vsel %vm343_vm3, %v796_v40, %v798_v12  ;;  %v801_v8 = vsel %vm343_vm3, %v798_v12, %v800_v54  ;;  %v531_v63 = vadd.f32 %v496_v7, %v435_v16  ;;  %v530_v53 = vadd.f32 %v494_v23, %v434_v60  ;;  %v10578_v40 = vld [vmem:[#allocation33_spill] sm:$0xff]  ;;  %v10584_v12 = vld [vmem:[#allocation44_spill] sm:$0xff] }
 0x1ac   :  { %v836_v25 = vmax.f32 %v757_v32, %v799_v21  ;;  %v837_v44 = vmax.f32 %v758_v29, %v801_v8  ;;  %1425 = vrot.lane.b32.xlu0 %v10574_v20, %s8155_s22  ;;  %v10585_v21 = vld [vmem:[#allocation45_spill] sm:$0xff]  ;;  %v10589_v60 = vld [vmem:[#allocation12_spill] sm:$0xff] }
 0x1ad   :  { %1427 = vrot.lane.b32.xlu1 %v10577_v18, %s8155_s22  ;;  %v10586_v8 = vld [vmem:[#allocation13_spill] sm:$0xff] }
 0x1ae   :  { %v592_v36 = vpop.permute.xlu1 %591  ;;  %v590_v58 = vpop.permute.xlu0 %589  ;;  %v7700_v30 = vpack.c.bf16 %v837_v44, %v836_v25 }
 0x1af   :  { %v627_v32 = vadd.f32 %v592_v36, %v531_v63  ;;  %v626_v1 = vadd.f32 %v590_v58, %v530_v53 }
 0x1b0   :  { %7701 = vmatprep.subr.bf16.mxu1 %v7700_v30  ;;  %1520 = vrot.lane.b32.xlu0 %v10578_v40, %s8154_s21 }
 0x1b1   :  { %7703 = vmatpush3.bf16.msra.mxu1 %v7700_v30  ;;  %1522 = vrot.lane.b32.xlu1 %v10579_v62, %s8154_s21  ;;  %v10590_v30 = vrot.slane %v9069_v4, 2 }
 0x1b2   :  { %v688_v26 = vpop.permute.xlu1 %687  ;;  %v686_v47 = vpop.permute.xlu0 %685 }
 0x1b3   :  { %v723_v0 = vadd.f32 %v688_v26, %v627_v32  ;;  %v722_v39 = vadd.f32 %v686_v47, %v626_v1 }
 0x1b4   :  { %1239 = vrot.lane.b32.xlu0 %v10580_v33, %s8153_s20 }
 0x1b5   :  { %v9257_v35 = vadd.f32 %v8996_v14, %v723_v0  ;;  %v744_v41 = vadd.f32 %v8996_v14, %v722_v39  ;;  %1241 = vrot.lane.b32.xlu1 %v8987_v38, %s8153_s20 }
 0x1b6   :  { %v502_v2 = vpop.permute.xlu1 %501  ;;  %v406_v15 = vpop.permute.xlu0 %405 }
 0x1b7   :  { %v761_v27 = vmax.f32 %v9257_v35, 0.0  ;;  %v760_v19 = vmax.f32 %v744_v41, 0.0  ;;  %v438_v18 = vadd.f32 %v10589_v60, %v406_v15 }
 0x1b8   :  { %1334 = vrot.lane.b32.xlu0 %v10581_v10, %s8152_s0 }
 0x1b9   :  { %v804_v5 = vrot.slane %v761_v27, 1  ;;  %v802_v9 = vrot.slane %v760_v19, 1  ;;  %1336 = vrot.lane.b32.xlu1 %v10582_v52, %s8152_s0 }
 0x1ba   :  { %v404_v11 = vpop.permute.xlu1 %403  ;;  %v402_v59 = vpop.permute.xlu0 %401 }
 0x1bb   :  { %v803_v50 = vsel %vm343_vm3, %v800_v54, %v802_v9  ;;  %v805_v3 = vsel %vm343_vm3, %v802_v9, %v804_v5  ;;  %v437_v25 = vadd.f32 %v404_v11, %v10586_v8  ;;  %v10587_v54 = vld [vmem:[#allocation10_spill] sm:$0xff]  ;;  %v10591_v9 = vld [vmem:[#allocation15_spill] sm:$0xff] }
 0x1bc   :  { %v838_v38 = vmax.f32 %v759_v22, %v803_v50  ;;  %v839_v29 = vmax.f32 %v760_v19, %v805_v3  ;;  %1429 = vrot.lane.b32.xlu0 %v10583_v17, %s8155_s22  ;;  %v436_v44 = vadd.f32 %v10587_v54, %v402_v59  ;;  %v10588_v22 = vld [vmem:[#allocation48_spill] sm:$0xff]  ;;  %v10596_v54 = vmov 0.0  }
 0x1bd   :  { %1431 = vrot.lane.b32.xlu1 %v10584_v12, %s8155_s22  ;;  %v9385_v43 = vsel %vm9136_vm14, 1.0, %v10596_v54 }
 0x1be   :  { %v500_v13 = vpop.permute.xlu1 %499  ;;  %v498_v7 = vpop.permute.xlu0 %497  ;;  %v7704_v23 = vpack.c.bf16 %v839_v29, %v838_v38 }
 0x1bf   :  { %v533_v16 = vadd.f32 %v500_v13, %v437_v25  ;;  %v532_v57 = vadd.f32 %v498_v7, %v436_v44  ;;  %v10594_v7 = vld [vmem:[#allocation14_spill] sm:$0xff] }
 0x1c0   :  { %7705 = vmatprep.subr.bf16.mxu1 %v7704_v23  ;;  %1524 = vrot.lane.b32.xlu0 %v10585_v21, %s8154_s21  ;;  %v10595_v21 = vld [vmem:[#allocation17_spill] sm:$0xff] }
 0x1c1   :  { %7707 = vmatpush3.bf16.msra.mxu1 %v7704_v23  ;;  %1526 = vrot.lane.b32.xlu1 %v10588_v22, %s8154_s21  ;;  %v9330_v22 = vsel %vm9018_vm8, 1.0, %v10596_v54 }
 0x1c2   :  { %v594_v20 = vpop.permute.xlu1 %593  ;;  %v596_v48 = vpop.permute.xlu0 %595 }
 0x1c3   :  { %v628_v36 = vadd.f32 %v594_v20, %v532_v57  ;;  %v629_v58 = vadd.f32 %v596_v48, %v533_v16  ;;  %v9335_v16 = vsel %vm9040_vm9, 1.0, %v10596_v54  ;;  %vm2968_vm9 = vcmask 195584  }
 0x1c4   :  { %1247 = vrot.lane.b32.xlu0 %v1215_v46, %s8153_s20  ;;  %v534_v46 = vadd.f32 %v502_v2, %v438_v18 }
 0x1c5   :  { %1342 = vrot.lane.b32.xlu1 %v10590_v30, %s8152_s0 }
 0x1c6   :  { %v692_v63 = vpop.permute.xlu1 %691  ;;  %v690_v53 = vpop.permute.xlu0 %689 }
 0x1c7   :  { %v725_v40 = vadd.f32 %v692_v63, %v629_v58  ;;  %v724_v32 = vadd.f32 %v690_v53, %v628_v36  ;;  %v9344_v36 = vsel %vm9047_vm10, 1.0, %v10596_v54  ;;  %v9350_v53 = vsel %vm9073_vm11, 1.0, %v10596_v54 }
 0x1c8   :  { %1243 = vrot.lane.b32.xlu0 %v9102_v61, %s8153_s20  ;;  %vm4922_vm10 = vcmask 40960  }
 0x1c9   :  { %v747_v1 = vadd.f32 %v8996_v14, %v725_v40  ;;  %v746_v62 = vadd.f32 %v8996_v14, %v724_v32  ;;  %1245 = vrot.lane.b32.xlu1 %v9107_v24, %s8153_s20 }
 0x1ca   :  { %v694_v26 = vpop.permute.xlu1 %693  ;;  %v598_v47 = vpop.permute.xlu0 %597 }
 0x1cb   :  { %v763_v0 = vmax.f32 %v747_v1, 0.0  ;;  %v762_v39 = vmax.f32 %v746_v62, 0.0  ;;  %v630_v33 = vadd.f32 %v598_v47, %v534_v46  ;;  %v1785_v1 = vld [vmem:[%s10444_s3] sm:$0xff]  ;;  %v1786_v62 = vld [vmem:[%s10444_s3 + $0x8] sm:$0xff]  ;;  %s8160_s3 = smov [#allocation2]  }
 0x1cc   :  { %1338 = vrot.lane.b32.xlu0 %v9121_v42, %s8152_s0  ;;  %s6491_s28 = sshll.u32 %s8160_s3, 4  ;;  %s6492_s28 = int_to_ptr.vmem [resolvable:$true] %s6491_s28 }
 0x1cd   :  { %v808_v35 = vrot.slane %v763_v0, 1  ;;  %v806_v41 = vrot.slane %v762_v39, 1  ;;  %v726_v15 = vadd.f32 %v694_v26, %v630_v33  ;;  %1340 = vrot.lane.b32.xlu1 %v9131_v56, %s8152_s0  ;;  %v9365_v26 = vsel %vm9086_vm12, 1.0, %v10596_v54  ;;  %p8133_p1 = scmp.lt.s32.totalorder %s6492_s28, %s6492_s28 }
 0x1ce   :  { %v1218_v61 = vpop.permute.xlu0 %1217  ;;  %v1313_v19 = vpop.permute.xlu1 %1312  ;;  %v9367_v33 = vpack.c.bf16 %v1786_v62, %v1785_v1 }
 0x1cf   :  { %v748_v2 = vadd.f32 %v8996_v14, %v726_v15  ;;  %v807_v24 = vsel %vm343_vm3, %v804_v5, %v806_v41  ;;  %v809_v10 = vsel %vm343_vm3, %v806_v41, %v808_v35  ;;  %v1265_v52 = vadd.f32 %v1218_v61, %v10591_v9 }
 0x1d0   :  { %v840_v11 = vmax.f32 %v761_v27, %v807_v24  ;;  %v841_v59 = vmax.f32 %v762_v39, %v809_v10  ;;  %1435 = vrot.lane.b32.xlu0 %v9144_v55, %s8155_s22  ;;  %7753 = vmatprep.subr.bf16.mxu0 %v9367_v33 }
 0x1d1   :  { %v764_v42 = vmax.f32 %v748_v2, 0.0  ;;  %1433 = vrot.lane.b32.xlu1 %v9151_v49, %s8155_s22  ;;  %v1360_v29 = vadd.f32 %v1313_v19, %v1265_v52  ;;  %7755 = vmatpush3.bf16.msra.mxu0 %v9367_v33  ;;  %v10602_v52 = vld [vmem:[#allocation16_spill] sm:$0xff] }
 0x1d2   :  { %v7708_v56 = vpack.c.bf16 %v841_v59, %v840_v11  ;;  %v1408_v50 = vpop.permute.xlu0 %1407  ;;  %v1503_v3 = vpop.permute.xlu1 %1502  ;;  %7775 = vmatprep.subr.bf16.mxu0 %v9367_v33  ;;  %v10603_v59 = vld [vmem:[#allocation19_spill] sm:$0xff] }
 0x1d3   :  { %v810_v38 = vrot.slane %v764_v42, 1  ;;  %v1455_v13 = vadd.f32 %v1408_v50, %v1360_v29  ;;  %v10604_v29 = vld [vmem:[#allocation38_spill] sm:$0xff] }
 0x1d4   :  { %7709 = vmatprep.subr.bf16.mxu1 %v7708_v56  ;;  %1528 = vrot.lane.b32.xlu0 %v9154_v51, %s8154_s21 }
 0x1d5   :  { %v843_v5 = vmax.f32 %v764_v42, %v810_v38  ;;  %7711 = vmatpush3.bf16.msra.mxu1 %v7708_v56  ;;  %v811_v27 = vsel %vm343_vm3, %v808_v35, %v810_v38  ;;  %1530 = vrot.lane.b32.xlu1 %v9162_v31, %s8154_s21  ;;  %v1550_v20 = vadd.f32 %v1503_v3, %v1455_v13  ;;  %v9372_v35 = vsel %vm9124_vm13, 1.0, %v10596_v54 }
 0x1d6   :  { %v842_v55 = vmax.f32 %v763_v0, %v811_v27  ;;  %v1222_v17 = vpop.permute.xlu0 %1221  ;;  %v1220_v12 = vpop.permute.xlu1 %1219 }
 0x1d7   :  { %v1266_v51 = vadd.f32 %v10594_v7, %v1220_v12  ;;  %v1267_v8 = vadd.f32 %v1222_v17, %v10595_v21  ;;  %v1566_v58 = vadd.f32 %v8996_v14, %v1550_v20 }
 0x1d8   :  { %v7712_v23 = vpack.c.bf16 %v843_v5, %v842_v55  ;;  %1437 = vrot.lane.b32.xlu0 %v1405_v37, %s8155_s22 }
 0x1d9   :  { %1532 = vrot.lane.b32.xlu1 %v1500_v28, %s8154_s21  ;;  %v1582_v47 = vmax.f32 %v1566_v58, 0.0 }
 0x1da   :  { %7714 = vmatprep.subr.msk.bf16.mxu1 %vm9311_vm1, %v7712_v23  ;;  %v1315_v31 = vpop.permute.xlu0 %1314  ;;  %v1317_v25 = vpop.permute.xlu1 %1316 }
 0x1db   :  { %7717 = vmatpush3.bf16.msk.msra.mxu1 %vm9311_vm1, %v7712_v23  ;;  %v1361_v48 = vadd.f32 %v1315_v31, %v1266_v51  ;;  %v1362_v28 = vadd.f32 %v1317_v25, %v1267_v8  ;;  %v1614_v2 = vrot.slane %v1582_v47, 1 }
 0x1de   :  { %7065 = vmatmul.mubr.msk.f32.vlgmr.msra.gmra.mrb[0].mxu1 %vm844_vm7, %v9330_v22  ;;  %v1412_v57 = vpop.permute.xlu0 %1411  ;;  %v1410_v60 = vpop.permute.xlu1 %1409 }
 0x1df   :  { %7067 = vmatprep.mubr.msk.f32.mxu1 %vm844_vm7, %v9335_v16  ;;  %v1456_v30 = vadd.f32 %v1410_v60, %v1361_v48  ;;  %v1457_v40 = vadd.f32 %v1412_v57, %v1362_v28  ;;  %v10605_v57 = vld [vmem:[#allocation18_spill] sm:$0xff] }
 0x1e2   :  { %7068 = vmatmul.mubr.msk.f32.gmra.mrb[2].mxu1 %vm844_vm7, %v9344_v36  ;;  %v1505_v32 = vpop.permute.xlu0 %1504 }
 0x1e3   :  { %7070 = vmatprep.mubr.msk.f32.mxu1 %vm844_vm7, %v9350_v53  ;;  %v1551_v0 = vadd.f32 %v1505_v32, %v1456_v30  ;;  %v1507_v39 = vpop.permute.xlu1 %1506  ;;  %v10606_v30 = vld [vmem:[#allocation21_spill] sm:$0xff] }
 0x1e4   :  { %v1552_v41 = vadd.f32 %v1507_v39, %v1457_v40 }
 0x1e5   :  { %v1567_v15 = vadd.f32 %v8996_v14, %v1551_v0 }
 0x1e6   :  { %7071 = vmatmul.mubr.msk.f32.gmra.mrb[4].mxu1 %vm844_vm7, %v9365_v26  ;;  %v1568_v61 = vadd.f32 %v8996_v14, %v1552_v41  ;;  %v1224_v19 = vpop.permute.xlu0 %1223 }
 0x1e7   :  { %7073 = vmatprep.mubr.msk.f32.mxu1 %vm844_vm7, %v9372_v35  ;;  %v1583_v24 = vmax.f32 %v1567_v15, 0.0  ;;  %v1226_v10 = vpop.permute.xlu1 %1225  ;;  %v1268_v11 = vadd.f32 %v10602_v52, %v1224_v19 }
 0x1e8   :  { %v1584_v9 = vmax.f32 %v1568_v61, 0.0  ;;  %v1269_v42 = vadd.f32 %v1226_v10, %v10603_v59 }
 0x1e9   :  { %v1615_v56 = vrot.slane %v1583_v24, 1 }
 0x1ea   :  { %7074 = vmatmul.mubr.msk.f32.gmra.mrb[6].mxu1 %vm844_vm7, %v9385_v43  ;;  %v1617_v50 = vrot.slane %v1584_v9, 1  ;;  %v1321_v3 = vpop.permute.xlu0 %1320 }
 0x1eb   :  { %v1319_v38 = vpop.permute.xlu1 %1318  ;;  %v1616_v45 = vsel %vm343_vm3, %v1614_v2, %v1615_v56  ;;  %7134 = vmatprep.mubr.msk.f32.mxu1 %vm844_vm7, %v10604_v29  ;;  %v1364_v5 = vadd.f32 %v1321_v3, %v1269_v42 }
 0x1ec   :  { %v1363_v27 = vadd.f32 %v1319_v38, %v1268_v11  ;;  %v1618_v55 = vsel %vm343_vm3, %v1615_v56, %v1617_v50  ;;  %v1661_v17 = vmax.f32 %v1582_v47, %v1616_v45  ;;  %v10607_v45 = vld [vmem:[#allocation20_spill] sm:$0xff] }
 0x1ed   :  { %v1662_v12 = vmax.f32 %v1583_v24, %v1618_v55  ;;  %v10608_v55 = vld [vmem:[#allocation23_spill] sm:$0xff] }
 0x1ee   :  { %v1414_v13 = vpop.permute.xlu0 %1413 }
 0x1ef   :  { %v1458_v7 = vadd.f32 %v1414_v13, %v1363_v27  ;;  %v1416_v51 = vpop.permute.xlu1 %1415  ;;  %v7718_v23 = vpack.c.bf16 %v1662_v12, %v1661_v17 }
 0x1f0   :  { %v1459_v21 = vadd.f32 %v1416_v51, %v1364_v5 }
 0x1f1   :  { %7719 = vmatprep.subr.bf16.mxu1 %v7718_v23 }
 0x1f2   :  { %v1509_v8 = vpop.permute.xlu0 %1508  ;;  %7721 = vmatpush3.bf16.msra.mxu1 %v7718_v23 }
 0x1f3   :  { %v1553_v31 = vadd.f32 %v1509_v8, %v1458_v7  ;;  %v1511_v25 = vpop.permute.xlu1 %1510 }
 0x1f4   :  { %v1554_v44 = vadd.f32 %v1511_v25, %v1459_v21 }
 0x1f5   :  { %v1569_v20 = vadd.f32 %v8996_v14, %v1553_v31 }
 0x1f6   :  { %v1570_v48 = vadd.f32 %v8996_v14, %v1554_v44  ;;  %v1228_v37 = vpop.permute.xlu0 %1227 }
 0x1f7   :  { %v1585_v28 = vmax.f32 %v1569_v20, 0.0  ;;  %v1270_v60 = vadd.f32 %v10605_v57, %v1228_v37  ;;  %v1230_v18 = vpop.permute.xlu1 %1229 }
 0x1f8   :  { %v1586_v58 = vmax.f32 %v1570_v48, 0.0  ;;  %v1271_v63 = vadd.f32 %v1230_v18, %v10606_v30 }
 0x1f9   :  { %v1619_v40 = vrot.slane %v1585_v28, 1 }
 0x1fa   :  { %v1621_v32 = vrot.slane %v1586_v58, 1  ;;  %v1323_v1 = vpop.permute.xlu0 %1322 }
 0x1fb   :  { %v1365_v62 = vadd.f32 %v1323_v1, %v1270_v60  ;;  %v1325_v46 = vpop.permute.xlu1 %1324  ;;  %v1620_v47 = vsel %vm343_vm3, %v1617_v50, %v1619_v40 }
 0x1fc   :  { %v1366_v0 = vadd.f32 %v1325_v46, %v1271_v63  ;;  %v1622_v39 = vsel %vm343_vm3, %v1619_v40, %v1621_v32  ;;  %v1663_v41 = vmax.f32 %v1584_v9, %v1620_v47  ;;  %v10609_v46 = vld [vmem:[#allocation22_spill] sm:$0xff] }
 0x1fd   :  { %v1664_v15 = vmax.f32 %v1585_v28, %v1622_v39  ;;  %v10610_v39 = vld [vmem:[#allocation25_spill] sm:$0xff] }
 0x1fe   :  { %v1418_v61 = vpop.permute.xlu0 %1417 }
 0x1ff   :  { %v1460_v19 = vadd.f32 %v1418_v61, %v1365_v62  ;;  %v1420_v2 = vpop.permute.xlu1 %1419  ;;  %v7722_v24 = vpack.c.bf16 %v1664_v15, %v1663_v41 }
 0x200   :  { %v1461_v10 = vadd.f32 %v1420_v2, %v1366_v0 }
 0x201   :  { %7723 = vmatprep.subr.bf16.mxu1 %v7722_v24 }
 0x202   :  { %v1513_v52 = vpop.permute.xlu0 %1512  ;;  %7725 = vmatpush3.bf16.msra.mxu1 %v7722_v24 }
 0x203   :  { %v1555_v11 = vadd.f32 %v1513_v52, %v1460_v19  ;;  %v1515_v59 = vpop.permute.xlu1 %1514 }
 0x204   :  { %v1556_v42 = vadd.f32 %v1515_v59, %v1461_v10 }
 0x205   :  { %v1571_v56 = vadd.f32 %v8996_v14, %v1555_v11 }
 0x206   :  { %v1572_v50 = vadd.f32 %v8996_v14, %v1556_v42  ;;  %v1232_v3 = vpop.permute.xlu0 %1231 }
 0x207   :  { %v1587_v38 = vmax.f32 %v1571_v56, 0.0  ;;  %v1272_v9 = vadd.f32 %v10607_v45, %v1232_v3  ;;  %v1234_v5 = vpop.permute.xlu1 %1233 }
 0x208   :  { %v1588_v27 = vmax.f32 %v1572_v50, 0.0  ;;  %v1273_v17 = vadd.f32 %v1234_v5, %v10608_v55 }
 0x209   :  { %v1623_v12 = vrot.slane %v1587_v38, 1 }
 0x20a   :  { %v1625_v13 = vrot.slane %v1588_v27, 1  ;;  %v1327_v7 = vpop.permute.xlu0 %1326 }
 0x20b   :  { %v1367_v51 = vadd.f32 %v1327_v7, %v1272_v9  ;;  %v1329_v23 = vpop.permute.xlu1 %1328  ;;  %v1624_v21 = vsel %vm343_vm3, %v1621_v32, %v1623_v12 }
 0x20c   :  { %v1368_v8 = vadd.f32 %v1329_v23, %v1273_v17  ;;  %v1626_v31 = vsel %vm343_vm3, %v1623_v12, %v1625_v13  ;;  %v1665_v25 = vmax.f32 %v1586_v58, %v1624_v21  ;;  %v10611_v23 = vld [vmem:[#allocation24_spill] sm:$0xff] }
 0x20d   :  { %v1666_v44 = vmax.f32 %v1587_v38, %v1626_v31  ;;  %v10612_v31 = vld [vmem:[#allocation34_spill] sm:$0xff] }
 0x20e   :  { %v1422_v20 = vpop.permute.xlu0 %1421 }
 0x20f   :  { %v1462_v48 = vadd.f32 %v1422_v20, %v1367_v51  ;;  %v1424_v37 = vpop.permute.xlu1 %1423  ;;  %v7726_v28 = vpack.c.bf16 %v1666_v44, %v1665_v25 }
 0x210   :  { %v1463_v57 = vadd.f32 %v1424_v37, %v1368_v8 }
 0x211   :  { %7727 = vmatprep.subr.bf16.mxu1 %v7726_v28 }
 0x212   :  { %v1517_v60 = vpop.permute.xlu0 %1516  ;;  %7729 = vmatpush3.bf16.msra.mxu1 %v7726_v28 }
 0x213   :  { %v1557_v18 = vadd.f32 %v1517_v60, %v1462_v48  ;;  %v1519_v30 = vpop.permute.xlu1 %1518 }
 0x214   :  { %v1558_v63 = vadd.f32 %v1519_v30, %v1463_v57 }
 0x215   :  { %v1573_v40 = vadd.f32 %v8996_v14, %v1557_v18 }
 0x216   :  { %v1574_v32 = vadd.f32 %v8996_v14, %v1558_v63  ;;  %v1236_v1 = vpop.permute.xlu0 %1235 }
 0x217   :  { %v1589_v62 = vmax.f32 %v1573_v40, 0.0  ;;  %v1274_v58 = vadd.f32 %v10609_v46, %v1236_v1  ;;  %v1238_v47 = vpop.permute.xlu1 %1237 }
 0x218   :  { %v1590_v0 = vmax.f32 %v1574_v32, 0.0  ;;  %v1275_v41 = vadd.f32 %v1238_v47, %v10610_v39 }
 0x219   :  { %v1627_v15 = vrot.slane %v1589_v62, 1 }
 0x21a   :  { %v1629_v61 = vrot.slane %v1590_v0, 1  ;;  %v1331_v19 = vpop.permute.xlu0 %1330 }
 0x21b   :  { %v1369_v2 = vadd.f32 %v1331_v19, %v1274_v58  ;;  %v1333_v24 = vpop.permute.xlu1 %1332  ;;  %v1628_v10 = vsel %vm343_vm3, %v1625_v13, %v1627_v15 }
 0x21c   :  { %v1370_v52 = vadd.f32 %v1333_v24, %v1275_v41  ;;  %v1630_v11 = vsel %vm343_vm3, %v1627_v15, %v1629_v61  ;;  %v1667_v59 = vmax.f32 %v1588_v27, %v1628_v10  ;;  %v8127_v41 = vld [vmem:[%s10443_s2] ss:$0 sm:$0xff]  ;;  %s8128_s2 = scalar_lea.vmem %s6492_s28, 32 }
 0x21d   :  { %v1668_v42 = vmax.f32 %v1589_v62, %v1630_v11  ;;  %p8129_p0 = scmp.ne.s32.totalorder %s6492_s28, %s8128_s2  ;;  %p8134_p2 = scmp.lt.s32.totalorder %s8128_s2, %s8128_s2 }
 0x21e   :  { %v1426_v56 = vpop.permute.xlu0 %1425 }
 0x21f   :  { %v1464_v50 = vadd.f32 %v1426_v56, %v1369_v2  ;;  %v1428_v3 = vpop.permute.xlu1 %1427  ;;  %v7730_v38 = vpack.c.bf16 %v1668_v42, %v1667_v59  ;;  %p8135_p3 = por %p8134_p2, %p8133_p1 }
 0x220   :  { %v1465_v45 = vadd.f32 %v1428_v3, %v1370_v52 }
 0x221   :  { %7731 = vmatprep.subr.bf16.mxu1 %v7730_v38  ;;  %p8136_p4 = pnand %p8135_p3, %p8129_p0 }
 0x222   :  { %v1521_v9 = vpop.permute.xlu0 %1520  ;;  %7733 = vmatpush3.bf16.msra.mxu1 %v7730_v38 }
 0x223   :  { %v1559_v5 = vadd.f32 %v1521_v9, %v1464_v50  ;;  %v1523_v55 = vpop.permute.xlu1 %1522 }
 0x224   :  { %v1560_v17 = vadd.f32 %v1523_v55, %v1465_v45 }
 0x225   :  { %v1575_v12 = vadd.f32 %v8996_v14, %v1559_v5 }
 0x226   :  { %v1576_v13 = vadd.f32 %v8996_v14, %v1560_v17  ;;  %v1240_v7 = vpop.permute.xlu0 %1239 }
 0x227   :  { %v1591_v51 = vmax.f32 %v1575_v12, 0.0  ;;  %v1276_v27 = vadd.f32 %v10611_v23, %v1240_v7  ;;  %v1242_v21 = vpop.permute.xlu1 %1241 }
 0x228   :  { %v1592_v8 = vmax.f32 %v1576_v13, 0.0  ;;  %v1277_v25 = vadd.f32 %v1242_v21, %v10612_v31 }
 0x229   :  { %v1631_v44 = vrot.slane %v1591_v51, 1 }
 0x22a   :  { %v1633_v20 = vrot.slane %v1592_v8, 1  ;;  %v1335_v48 = vpop.permute.xlu0 %1334 }
 0x22b   :  { %v1371_v37 = vadd.f32 %v1335_v48, %v1276_v27  ;;  %v1337_v28 = vpop.permute.xlu1 %1336  ;;  %v1632_v57 = vsel %vm343_vm3, %v1629_v61, %v1631_v44 }
 0x22c   :  { %v1372_v60 = vadd.f32 %v1337_v28, %v1277_v25  ;;  %v1634_v18 = vsel %vm343_vm3, %v1631_v44, %v1633_v20  ;;  %v1669_v30 = vmax.f32 %v1590_v0, %v1632_v57 }
 0x22d   :  { %v1670_v14 = vmax.f32 %v1591_v51, %v1634_v18 }
 0x22e   :  { %v1430_v63 = vpop.permute.xlu0 %1429 }
 0x22f   :  { %v1466_v40 = vadd.f32 %v1430_v63, %v1371_v37  ;;  %v1432_v32 = vpop.permute.xlu1 %1431  ;;  %v7734_v1 = vpack.c.bf16 %v1670_v14, %v1669_v30 }
 0x230   :  { %v1467_v62 = vadd.f32 %v1432_v32, %v1372_v60 }
 0x231   :  { %7735 = vmatprep.subr.bf16.mxu1 %v7734_v1 }
 0x232   :  { %v1525_v46 = vpop.permute.xlu0 %1524  ;;  %7737 = vmatpush3.bf16.msra.mxu1 %v7734_v1 }
 0x233   :  { %v1561_v58 = vadd.f32 %v1525_v46, %v1466_v40  ;;  %v1527_v47 = vpop.permute.xlu1 %1526 }
 0x234   :  { %v1562_v39 = vadd.f32 %v1527_v47, %v1467_v62 }
 0x235   :  { %v1577_v15 = vadd.f32 %v8127_v41, %v1561_v58 }
 0x236   :  { %v1578_v61 = vadd.f32 %v8127_v41, %v1562_v39  ;;  %v1248_v19 = vpop.permute.xlu0 %1247 }
 0x237   :  { %v1593_v0 = vmax.f32 %v1577_v15, 0.0  ;;  %v1343_v2 = vpop.permute.xlu1 %1342  ;;  %v1280_v7 = vadd.f32 %v9069_v4, %v1248_v19 }
 0x238   :  { %v1594_v24 = vmax.f32 %v1578_v61, 0.0 }
 0x239   :  { %v1635_v10 = vrot.slane %v1593_v0, 1  ;;  %v1375_v21 = vadd.f32 %v1343_v2, %v1280_v7 }
 0x23a   :  { %v1637_v52 = vrot.slane %v1594_v24, 1  ;;  %v1244_v11 = vpop.permute.xlu0 %1243 }
 0x23b   :  { %v1246_v59 = vpop.permute.xlu1 %1245  ;;  %v1636_v42 = vsel %vm343_vm3, %v1633_v20, %v1635_v10  ;;  %v1278_v56 = vadd.f32 %v8952_v34, %v1244_v11 }
 0x23c   :  { %v1279_v50 = vadd.f32 %v1246_v59, %v9079_v6  ;;  %v1638_v3 = vsel %vm343_vm3, %v1635_v10, %v1637_v52  ;;  %v1671_v38 = vmax.f32 %v1592_v8, %v1636_v42 }
 0x23d   :  { %v1672_v45 = vmax.f32 %v1593_v0, %v1638_v3 }
 0x23e   :  { %v1339_v9 = vpop.permute.xlu0 %1338 }
 0x23f   :  { %v1341_v5 = vpop.permute.xlu1 %1340  ;;  %v7738_v55 = vpack.c.bf16 %v1672_v45, %v1671_v38  ;;  %v1373_v17 = vadd.f32 %v1339_v9, %v1278_v56 }
 0x240   :  { %v1374_v12 = vadd.f32 %v1341_v5, %v1279_v50 }
 0x241   :  { %7739 = vmatprep.subr.bf16.mxu1 %v7738_v55 }
 0x242   :  { %v1436_v13 = vpop.permute.xlu0 %1435  ;;  %7741 = vmatpush3.bf16.msra.mxu1 %v7738_v55 }
 0x243   :  { %v1434_v51 = vpop.permute.xlu1 %1433  ;;  %v1469_v23 = vadd.f32 %v1436_v13, %v1374_v12 }
 0x244   :  { %v1468_v27 = vadd.f32 %v1434_v51, %v1373_v17 }
 0x246   :  { %v1529_v34 = vpop.permute.xlu0 %1528 }
 0x247   :  { %v1563_v6 = vadd.f32 %v1529_v34, %v1468_v27  ;;  %v1531_v31 = vpop.permute.xlu1 %1530 }
 0x248   :  { %v1564_v25 = vadd.f32 %v1531_v31, %v1469_v23 }
 0x249   :  { %v1579_v8 = vadd.f32 %v8127_v41, %v1563_v6 }
 0x24a   :  { %v1580_v44 = vadd.f32 %v8127_v41, %v1564_v25  ;;  %v1438_v20 = vpop.permute.xlu0 %1437 }
 0x24b   :  { %v1595_v48 = vmax.f32 %v1579_v8, 0.0  ;;  %v1470_v37 = vadd.f32 %v1438_v20, %v1375_v21  ;;  %v1533_v28 = vpop.permute.xlu1 %1532 }
 0x24c   :  { %v1596_v57 = vmax.f32 %v1580_v44, 0.0 }
 0x24d   :  { %v1639_v60 = vrot.slane %v1595_v48, 1  ;;  %v1565_v18 = vadd.f32 %v1533_v28, %v1470_v37 }
 0x24e   :  { %v1641_v30 = vrot.slane %v1596_v57, 1 }
 0x24f   :  { %v1581_v14 = vadd.f32 %v8127_v41, %v1565_v18  ;;  %v1640_v4 = vsel %vm343_vm3, %v1637_v52, %v1639_v60 }
 0x250   :  { %v1642_v63 = vsel %vm343_vm3, %v1639_v60, %v1641_v30  ;;  %v1673_v40 = vmax.f32 %v1594_v24, %v1640_v4 }
 0x251   :  { %v1597_v32 = vmax.f32 %v1581_v14, 0.0  ;;  %v1674_v1 = vmax.f32 %v1595_v48, %v1642_v63 }
 0x253   :  { %v1643_v62 = vrot.slane %v1597_v32, 1  ;;  %v7742_v46 = vpack.c.bf16 %v1674_v1, %v1673_v40 }
 0x255   :  { %v1644_v58 = vsel %vm343_vm3, %v1641_v30, %v1643_v62  ;;  %v1676_v47 = vmax.f32 %v1597_v32, %v1643_v62  ;;  %7743 = vmatprep.subr.bf16.mxu1 %v7742_v46 }
 0x256   :  { %v1675_v39 = vmax.f32 %v1596_v57, %v1644_v58  ;;  %7745 = vmatpush3.bf16.msra.mxu1 %v7742_v46 }
 0x258   :  { %v7746_v15 = vpack.c.bf16 %v1676_v47, %v1675_v39 }
 0x25a   :  { %7748 = vmatprep.subr.msk.bf16.mxu1 %vm9311_vm1, %v7746_v15 }
 0x25b   :  { %7751 = vmatpush3.bf16.msk.msra.mxu1 %vm9311_vm1, %v7746_v15 }
 0x25e   :  { %7135 = vmatmul.mubr.msk.f32.vlgmr.msra.gmra.mrb[8].mxu1 %vm844_vm7, %v9330_v22 }
 0x25f   :  { %7137 = vmatprep.mubr.msk.f32.mxu1 %vm844_vm7, %v9335_v16 }
 0x262   :  { %7138 = vmatmul.mubr.msk.f32.gmra.mrb[10].mxu1 %vm844_vm7, %v9344_v36 }
 0x263   :  { %7140 = vmatprep.mubr.msk.f32.mxu1 %vm844_vm7, %v9350_v53 }
 0x266   :  { %7141 = vmatmul.mubr.msk.f32.gmra.mrb[12].mxu1 %vm844_vm7, %v9365_v26 }
 0x267   :  { %7143 = vmatprep.mubr.msk.f32.mxu1 %vm844_vm7, %v9372_v35 }
 0x26a   :  { %7144 = vmatmul.mubr.msk.f32.gmra.mrb[14].mxu1 %vm844_vm7, %v9385_v43  ;;  %vm2184_vm7 = vcmask 1040384  }
 0x26b   :  { %7178 = vmatprep.mubr.msk.f32.mxu1 %vm2175_vm6, %v10604_v29  ;;  %vm9794_vm8 = vmpackc.low %vm2184_vm7, %vm8157_vm15 }
 0x2b1   :  { %v7066_v49 = vpop.f32.mrb[0].mxu1 }
 0x2b2   :  { %v938_v41 = vpop.f32.mrb[1].mxu1 }
 0x2b3   :  { %7150 = vmatprep.mubr.msk.f32.mxu0 %vm1788_vm0, %v938_v41 }
 0x2b4   :  { %7151 = vmatmul.mubr.msk.f32.vlgmr.msra.gmra.mrb[32].mxu0 %vm1788_vm0, %v7066_v49 }
 0x2b5   :  { %v7069_v61 = vpop.f32.mrb[2].mxu1  ;;  %7777 = vmatpush3.bf16.msra.mxu0 %v9367_v33 }
 0x2b6   :  { %v948_v53 = vpop.f32.mrb[3].mxu1 }
 0x2b7   :  { %7153 = vmatprep.mubr.msk.f32.mxu0 %vm1788_vm0, %v948_v53 }
 0x2b8   :  { %7154 = vmatmul.mubr.msk.f32.gmra.mrb[34].mxu0 %vm1788_vm0, %v7069_v61 }
 0x2b9   :  { %v7072_v26 = vpop.f32.mrb[4].mxu1 }
 0x2ba   :  { %v958_v35 = vpop.f32.mrb[5].mxu1 }
 0x2bb   :  { %7156 = vmatprep.mubr.msk.f32.mxu0 %vm1788_vm0, %v958_v35 }
 0x2bc   :  { %7157 = vmatmul.mubr.msk.f32.gmra.mrb[36].mxu0 %vm1788_vm0, %v7072_v26 }
 0x2bd   :  { %v7075_v43 = vpop.f32.mrb[6].mxu1 }
 0x2be   :  { %v968_v19 = vpop.f32.mrb[7].mxu1 }
 0x2bf   :  { %7159 = vmatprep.mubr.msk.f32.mxu0 %vm1788_vm0, %v968_v19 }
 0x2c0   :  { %7160 = vmatmul.mubr.msk.f32.gmra.mrb[38].mxu0 %vm1788_vm0, %v7075_v43 }
 0x331   :  { %v7136_v0 = vpop.f32.mrb[8].mxu1 }
 0x332   :  { %v1746_v2 = vpop.f32.mrb[9].mxu1 }
 0x333   :  { %7188 = vmatprep.mubr.msk.f32.mxu0 %vm1788_vm0, %v1746_v2 }
 0x334   :  { %7189 = vmatmul.mubr.msk.f32.vlgmr.msra.gmra.mrb[40].mxu0 %vm1788_vm0, %v7136_v0 }
 0x335   :  { %v7139_v33 = vpop.f32.mrb[10].mxu1 }
 0x336   :  { %v1756_v24 = vpop.f32.mrb[11].mxu1 }
 0x337   :  { %7191 = vmatprep.mubr.msk.f32.mxu0 %vm1788_vm0, %v1756_v24 }
 0x338   :  { %7192 = vmatmul.mubr.msk.f32.gmra.mrb[42].mxu0 %vm1788_vm0, %v7139_v33 }
 0x339   :  { %v7142_v10 = vpop.f32.mrb[12].mxu1 }
 0x33a   :  { %v1766_v52 = vpop.f32.mrb[13].mxu1 }
 0x33b   :  { %7194 = vmatprep.mubr.msk.f32.mxu0 %vm1788_vm0, %v1766_v52 }
 0x33c   :  { %7195 = vmatmul.mubr.msk.f32.gmra.mrb[44].mxu0 %vm1788_vm0, %v7142_v10 }
 0x33d   :  { %v7145_v11 = vpop.f32.mrb[14].mxu1 }
 0x33e   :  { %v1776_v59 = vpop.f32.mrb[15].mxu1 }
 0x33f   :  { %7197 = vmatprep.mubr.msk.f32.mxu0 %vm1788_vm0, %v1776_v59 }
 0x340   :  { %7198 = vmatmul.mubr.msk.f32.gmra.mrb[46].mxu0 %vm1788_vm0, %v7145_v11 }
 0x387   :  { %v9466_v42 = vpop.f32.mrb[32].mxu0 }
 0x388   :  { %v9468_v56 = vpop.f32.mrb[33].mxu0  ;;  %v1974_v50 = vrot.slane %v9466_v42, 2  ;;  %v1927_v3 = vrot.slane %v9466_v42, 1  ;;  %v2068_v38 = vrot.slane %v9466_v42, 4  ;;  %v2021_v45 = vrot.slane %v9466_v42, 3 }
 0x389   :  { %v1973_v9 = vrot.slane %v9468_v56, 2  ;;  %v1926_v5 = vrot.slane %v9468_v56, 1  ;;  %v2067_v55 = vrot.slane %v9468_v56, 4  ;;  %v2020_v17 = vrot.slane %v9468_v56, 3 }
 0x38b   :  { %v9478_v12 = vpop.f32.mrb[34].mxu0  ;;  %v1975_v13 = vsel %vm439_vm2, %v1973_v9, %v1974_v50  ;;  %v1928_v7 = vsel %vm343_vm3, %v1926_v5, %v1927_v3  ;;  %v2069_v51 = vsel %vm631_vm4, %v2067_v55, %v2068_v38  ;;  %v2022_v23 = vsel %vm535_vm5, %v2020_v17, %v2021_v45 }
 0x38c   :  { %1988 = vrot.lane.b32.xlu1 %v1975_v13, %s8152_s0  ;;  %1941 = vrot.lane.b32.xlu0 %v1928_v7, %s8153_s20  ;;  %v9486_v27 = vpop.f32.mrb[35].mxu0  ;;  %v1931_v34 = vrot.slane %v9478_v12, 1  ;;  %v1978_v21 = vrot.slane %v9478_v12, 2  ;;  %v2025_v6 = vrot.slane %v9478_v12, 3  ;;  %v2072_v31 = vrot.slane %v9478_v12, 4 }
 0x38d   :  { %v1929_v25 = vrot.slane %v9486_v27, 1  ;;  %v1976_v8 = vrot.slane %v9486_v27, 2  ;;  %v2023_v44 = vrot.slane %v9486_v27, 3  ;;  %v2070_v20 = vrot.slane %v9486_v27, 4 }
 0x38f   :  { %v9496_v48 = vpop.f32.mrb[36].mxu0  ;;  %v1932_v37 = vsel %vm343_vm3, %v1929_v25, %v1931_v34  ;;  %v1930_v28 = vsel %vm343_vm3, %v1927_v3, %v1929_v25  ;;  %v1977_v57 = vsel %vm439_vm2, %v1974_v50, %v1976_v8  ;;  %v1979_v60 = vsel %vm439_vm2, %v1976_v8, %v1978_v21 }
 0x390   :  { %2082 = vrot.lane.b32.xlu1 %v2069_v51, %s8154_s21  ;;  %2035 = vrot.lane.b32.xlu0 %v2022_v23, %s8155_s22  ;;  %v9504_v18 = vpop.f32.mrb[37].mxu0  ;;  %v2026_v30 = vsel %vm535_vm5, %v2023_v44, %v2025_v6  ;;  %v2024_v14 = vsel %vm535_vm5, %v2021_v45, %v2023_v44  ;;  %v2071_v4 = vsel %vm631_vm4, %v2068_v38, %v2070_v20  ;;  %v1935_v63 = vrot.slane %v9496_v48, 1 }
 0x391   :  { %v2073_v40 = vsel %vm631_vm4, %v2070_v20, %v2072_v31  ;;  %v1933_v32 = vrot.slane %v9504_v18, 1  ;;  %v1980_v1 = vrot.slane %v9504_v18, 2  ;;  %v1982_v62 = vrot.slane %v9496_v48, 2  ;;  %v9580_v20 = vld [vmem:[%s10445_s4] ss:$0 sm:$0xff] }
 0x392   :  { %v2027_v46 = vrot.slane %v9504_v18, 3  ;;  %v2029_v58 = vrot.slane %v9496_v48, 3  ;;  %v2074_v47 = vrot.slane %v9504_v18, 4  ;;  %v2076_v39 = vrot.slane %v9496_v48, 4 }
 0x393   :  { %v9518_v15 = vpop.f32.mrb[38].mxu0  ;;  %v1936_v49 = vsel %vm343_vm3, %v1933_v32, %v1935_v63  ;;  %v1934_v41 = vsel %vm343_vm3, %v1931_v34, %v1933_v32  ;;  %v1981_v61 = vsel %vm439_vm2, %v1978_v21, %v1980_v1  ;;  %v1983_v53 = vsel %vm439_vm2, %v1980_v1, %v1982_v62 }
 0x394   :  { %1945 = vrot.lane.b32.xlu0 %v1932_v37, %s8153_s20  ;;  %1943 = vrot.lane.b32.xlu1 %v1930_v28, %s8153_s20  ;;  %v9526_v26 = vpop.f32.mrb[39].mxu0  ;;  %v2030_v35 = vsel %vm535_vm5, %v2027_v46, %v2029_v58  ;;  %v2028_v43 = vsel %vm535_vm5, %v2025_v6, %v2027_v46  ;;  %v2077_v19 = vsel %vm631_vm4, %v2074_v47, %v2076_v39  ;;  %v1986_v0 = vrot.slane %v9518_v15, 2 }
 0x395   :  { %v2075_v2 = vsel %vm631_vm4, %v2072_v31, %v2074_v47  ;;  %v1939_v33 = vrot.slane %v9518_v15, 1  ;;  %v1937_v24 = vrot.slane %v9526_v26, 1  ;;  %v1984_v10 = vrot.slane %v9526_v26, 2 }
 0x396   :  { %v2031_v52 = vrot.slane %v9526_v26, 3  ;;  %v2033_v11 = vrot.slane %v9518_v15, 3  ;;  %v2078_v59 = vrot.slane %v9526_v26, 4  ;;  %v2080_v50 = vrot.slane %v9518_v15, 4 }
 0x397   :  { %v1940_v3 = vsel %vm343_vm3, %v1937_v24, %v1939_v33  ;;  %v1938_v38 = vsel %vm343_vm3, %v1935_v63, %v1937_v24  ;;  %v1987_v45 = vsel %vm439_vm2, %v1984_v10, %v1986_v0  ;;  %v1985_v9 = vsel %vm439_vm2, %v1982_v62, %v1984_v10 }
 0x398   :  { %1990 = vrot.lane.b32.xlu0 %v1977_v57, %s8152_s0  ;;  %1992 = vrot.lane.b32.xlu1 %v1979_v60, %s8152_s0  ;;  %v2032_v5 = vsel %vm535_vm5, %v2029_v58, %v2031_v52  ;;  %v2034_v55 = vsel %vm535_vm5, %v2031_v52, %v2033_v11  ;;  %v2081_v17 = vsel %vm631_vm4, %v2078_v59, %v2080_v50 }
 0x399   :  { %v2079_v13 = vsel %vm631_vm4, %v2076_v39, %v2078_v59 }
 0x39c   :  { %2039 = vrot.lane.b32.xlu0 %v2026_v30, %s8155_s22  ;;  %2037 = vrot.lane.b32.xlu1 %v2024_v14, %s8155_s22 }
 0x3a0   :  { %2084 = vrot.lane.b32.xlu0 %v2071_v4, %s8154_s21  ;;  %2086 = vrot.lane.b32.xlu1 %v2073_v40, %s8154_s21 }
 0x3a4   :  { %1949 = vrot.lane.b32.xlu1 %v1936_v49, %s8153_s20  ;;  %1947 = vrot.lane.b32.xlu0 %v1934_v41, %s8153_s20 }
 0x3a8   :  { %1994 = vrot.lane.b32.xlu1 %v1981_v61, %s8152_s0  ;;  %1996 = vrot.lane.b32.xlu0 %v1983_v53, %s8152_s0 }
 0x3ac   :  { %2043 = vrot.lane.b32.xlu1 %v2030_v35, %s8155_s22  ;;  %2041 = vrot.lane.b32.xlu0 %v2028_v43, %s8155_s22 }
 0x3b0   :  { %2090 = vrot.lane.b32.xlu1 %v2077_v19, %s8154_s21  ;;  %2088 = vrot.lane.b32.xlu0 %v2075_v2, %s8154_s21 }
 0x3b4   :  { %2002 = vrot.lane.b32.xlu1 %v1986_v0, %s8152_s0  ;;  %1955 = vrot.lane.b32.xlu0 %v1939_v33, %s8153_s20 }
 0x3b8   :  { %1953 = vrot.lane.b32.xlu1 %v1940_v3, %s8153_s20  ;;  %1951 = vrot.lane.b32.xlu0 %v1938_v38, %s8153_s20 }
 0x3bc   :  { %2000 = vrot.lane.b32.xlu1 %v1987_v45, %s8152_s0  ;;  %1998 = vrot.lane.b32.xlu0 %v1985_v9, %s8152_s0 }
 0x3c0   :  { %2045 = vrot.lane.b32.xlu1 %v2032_v5, %s8155_s22  ;;  %2047 = vrot.lane.b32.xlu0 %v2034_v55, %s8155_s22 }
 0x3c4   :  { %2094 = vrot.lane.b32.xlu1 %v2081_v17, %s8154_s21  ;;  %2092 = vrot.lane.b32.xlu0 %v2079_v13, %s8154_s21 }
 0x3c8   :  { %2096 = vrot.lane.b32.xlu1 %v2080_v50, %s8154_s21  ;;  %2049 = vrot.lane.b32.xlu0 %v2033_v11, %s8155_s22 }
 0x3fe   :  { %v1989_v7 = vpop.permute.xlu1 %1988  ;;  %v1942_v51 = vpop.permute.xlu0 %1941 }
 0x3ff   :  { %v1965_v23 = vadd.f32 %v1942_v51, %v9468_v56 }
 0x401   :  { %v2012_v34 = vadd.f32 %v1989_v7, %v1965_v23 }
 0x402   :  { %v2083_v21 = vpop.permute.xlu1 %2082  ;;  %v2036_v6 = vpop.permute.xlu0 %2035 }
 0x403   :  { %v2059_v31 = vadd.f32 %v2036_v6, %v2012_v34 }
 0x405   :  { %v2106_v25 = vadd.f32 %v2083_v21, %v2059_v31 }
 0x406   :  { %v1944_v8 = vpop.permute.xlu1 %1943  ;;  %v1946_v44 = vpop.permute.xlu0 %1945 }
 0x407   :  { %v1966_v37 = vadd.f32 %v9466_v42, %v1944_v8  ;;  %v9583_v28 = vpop.f32.mrb[40].mxu0  ;;  %v1967_v4 = vadd.f32 %v1946_v44, %v9486_v27  ;;  %v9596_v32 = vadd.f32 %v9580_v20, %v2106_v25 }
 0x408   :  { %v9585_v57 = vpop.f32.mrb[41].mxu0  ;;  %v2458_v56 = vrot.slane %v9583_v28, 2  ;;  %v2411_v60 = vrot.slane %v9583_v28, 1  ;;  %v2552_v30 = vrot.slane %v9583_v28, 4  ;;  %v2505_v14 = vrot.slane %v9583_v28, 3 }
 0x409   :  { %v2457_v63 = vrot.slane %v9585_v57, 2  ;;  %v2410_v40 = vrot.slane %v9585_v57, 1  ;;  %v2551_v42 = vrot.slane %v9585_v57, 4  ;;  %v2504_v46 = vrot.slane %v9585_v57, 3 }
 0x40a   :  { %v1993_v1 = vpop.permute.xlu1 %1992  ;;  %v1991_v62 = vpop.permute.xlu0 %1990  ;;  %v2128_v33 = vmax.f32 %v9596_v32, 0.0 }
 0x40b   :  { %v2014_v58 = vadd.f32 %v1993_v1, %v1967_v4  ;;  %v2013_v47 = vadd.f32 %v1991_v62, %v1966_v37  ;;  %v2459_v39 = vsel %vm439_vm2, %v2457_v63, %v2458_v56  ;;  %v9600_v49 = vpop.f32.mrb[42].mxu0  ;;  %v2412_v27 = vsel %vm343_vm3, %v2410_v40, %v2411_v60 }
 0x40c   :  { %2472 = vrot.lane.b32.xlu1 %v2459_v39, %s8152_s0  ;;  %v2553_v41 = vsel %vm631_vm4, %v2551_v42, %v2552_v30  ;;  %v2506_v61 = vsel %vm535_vm5, %v2504_v46, %v2505_v14  ;;  %v9606_v53 = vpop.f32.mrb[43].mxu0  ;;  %v2415_v35 = vrot.slane %v9600_v49, 1  ;;  %2425 = vrot.lane.b32.xlu0 %v2412_v27, %s8153_s20  ;;  %v2462_v0 = vrot.slane %v9600_v49, 2 }
 0x40d   :  { %v2413_v43 = vrot.slane %v9606_v53, 1  ;;  %v2460_v19 = vrot.slane %v9606_v53, 2  ;;  %v2507_v2 = vrot.slane %v9606_v53, 3  ;;  %v2509_v52 = vrot.slane %v9600_v49, 3 }
 0x40e   :  { %v2038_v24 = vpop.permute.xlu1 %2037  ;;  %v2040_v10 = vpop.permute.xlu0 %2039  ;;  %v2554_v11 = vrot.slane %v9606_v53, 4  ;;  %v2556_v59 = vrot.slane %v9600_v49, 4 }
 0x40f   :  { %v2060_v50 = vadd.f32 %v2038_v24, %v2013_v47  ;;  %v2061_v3 = vadd.f32 %v2040_v10, %v2014_v58  ;;  %v2416_v38 = vsel %vm343_vm3, %v2413_v43, %v2415_v35  ;;  %v2414_v45 = vsel %vm343_vm3, %v2411_v60, %v2413_v43  ;;  %v9620_v9 = vpop.f32.mrb[44].mxu0 }
 0x410   :  { %2566 = vrot.lane.b32.xlu1 %v2553_v41, %s8154_s21  ;;  %v2461_v5 = vsel %vm439_vm2, %v2458_v56, %v2460_v19  ;;  %v2463_v55 = vsel %vm439_vm2, %v2460_v19, %v2462_v0  ;;  %v9626_v17 = vsel %vm535_vm5, %v2507_v2, %v2509_v52  ;;  %v2508_v13 = vsel %vm535_vm5, %v2505_v14, %v2507_v2  ;;  %v9629_v7 = vpop.f32.mrb[45].mxu0 }
 0x411   :  { %2519 = vrot.lane.b32.xlu0 %v2506_v61, %s8155_s22  ;;  %v9633_v51 = vsel %vm631_vm4, %v2552_v30, %v2554_v11  ;;  %v9636_v23 = vsel %vm631_vm4, %v2554_v11, %v2556_v59  ;;  %v2417_v34 = vrot.slane %v9629_v7, 1  ;;  %v2419_v21 = vrot.slane %v9620_v9, 1 }
 0x412   :  { %v2087_v6 = vpop.permute.xlu1 %2086  ;;  %v2085_v31 = vpop.permute.xlu0 %2084  ;;  %v2464_v25 = vrot.slane %v9629_v7, 2  ;;  %v2466_v8 = vrot.slane %v9620_v9, 2  ;;  %v2511_v44 = vrot.slane %v9629_v7, 3  ;;  %v2513_v37 = vrot.slane %v9620_v9, 3 }
 0x413   :  { %v2108_v56 = vadd.f32 %v2087_v6, %v2061_v3  ;;  %v2107_v60 = vadd.f32 %v2085_v31, %v2060_v50  ;;  %v9645_v30 = vsel %vm343_vm3, %v2417_v34, %v2419_v21  ;;  %v9648_v14 = vsel %vm343_vm3, %v2415_v35, %v2417_v34  ;;  %v9650_v4 = vpop.f32.mrb[46].mxu0 }
 0x414   :  { %2427 = vrot.lane.b32.xlu1 %v2414_v45, %s8153_s20  ;;  %v9654_v63 = vsel %vm439_vm2, %v2462_v0, %v2464_v25  ;;  %v9657_v40 = vsel %vm439_vm2, %v2464_v25, %v2466_v8  ;;  %v9660_v42 = vsel %vm535_vm5, %v2511_v44, %v2513_v37  ;;  %v9663_v1 = vsel %vm535_vm5, %v2509_v52, %v2511_v44  ;;  %v9665_v62 = vpop.f32.mrb[47].mxu0 }
 0x415   :  { %v9668_v46 = vadd.f32 %v9580_v20, %v2108_v56  ;;  %v2121_v58 = vadd.f32 %v9580_v20, %v2107_v60  ;;  %2429 = vrot.lane.b32.xlu0 %v2416_v38, %s8153_s20  ;;  %v2558_v47 = vrot.slane %v9629_v7, 4  ;;  %v2560_v39 = vrot.slane %v9620_v9, 4 }
 0x416   :  { %v1950_v27 = vpop.permute.xlu1 %1949  ;;  %v1948_v41 = vpop.permute.xlu0 %1947  ;;  %v2423_v61 = vrot.slane %v9650_v4, 1  ;;  %v2421_v35 = vrot.slane %v9665_v62, 1  ;;  %v2468_v43 = vrot.slane %v9665_v62, 2  ;;  %v2144_v19 = vrot.slane %v2128_v33, 1 }
 0x417   :  { %v2130_v0 = vmax.f32 %v9668_v46, 0.0  ;;  %v2129_v2 = vmax.f32 %v2121_v58, 0.0  ;;  %v2470_v24 = vrot.slane %v9650_v4, 2  ;;  %v9683_v10 = vsel %vm631_vm4, %v2558_v47, %v2560_v39 }
 0x418   :  { %2476 = vrot.lane.b32.xlu1 %v2463_v55, %s8152_s0  ;;  %v9686_v52 = vsel %vm631_vm4, %v2556_v59, %v2558_v47  ;;  %v9691_v11 = vsel %vm343_vm3, %v2421_v35, %v2423_v61  ;;  %v9694_v50 = vsel %vm343_vm3, %v2419_v21, %v2421_v35  ;;  %v9705_v59 = vsel %vm439_vm2, %v2466_v8, %v2468_v43 }
 0x419   :  { %v2147_v3 = vrot.slane %v2130_v0, 1  ;;  %v2145_v38 = vrot.slane %v2129_v2, 1  ;;  %2474 = vrot.lane.b32.xlu0 %v2461_v5, %s8152_s0  ;;  %v9702_v45 = vsel %vm439_vm2, %v2468_v43, %v2470_v24  ;;  %v2515_v6 = vrot.slane %v9665_v62, 3 }
 0x41a   :  { %v1995_v55 = vpop.permute.xlu1 %1994  ;;  %v1997_v34 = vpop.permute.xlu0 %1996  ;;  %v2517_v21 = vrot.slane %v9650_v4, 3  ;;  %v2562_v31 = vrot.slane %v9665_v62, 4  ;;  %v2564_v25 = vrot.slane %v9650_v4, 4  ;;  %v1969_v47 = vadd.f32 %v1950_v27, %v9504_v18 }
 0x41b   :  { %v2148_v5 = vsel %vm343_vm3, %v2145_v38, %v2147_v3  ;;  %v2146_v44 = vsel %vm343_vm3, %v2144_v19, %v2145_v38  ;;  %v9717_v8 = vsel %vm535_vm5, %v2513_v37, %v2515_v6  ;;  %v1968_v35 = vadd.f32 %v9478_v12, %v1948_v41 }
 0x41c   :  { %v2168_v56 = vmax.f32 %v2129_v2, %v2148_v5  ;;  %v2167_v60 = vmax.f32 %v2128_v33, %v2146_v44  ;;  %2521 = vrot.lane.b32.xlu1 %v2508_v13, %s8155_s22  ;;  %v9722_v58 = vsel %vm535_vm5, %v2515_v6, %v2517_v21  ;;  %v9731_v32 = vsel %vm631_vm4, %v2562_v31, %v2564_v25 }
 0x41d   :  { %2523 = vrot.lane.b32.xlu0 %v9626_v17, %s8155_s22  ;;  %v9734_v33 = vsel %vm631_vm4, %v2560_v39, %v2562_v31  ;;  %v2015_v19 = vadd.f32 %v1995_v55, %v1968_v35  ;;  %v2016_v2 = vadd.f32 %v1997_v34, %v1969_v47 }
 0x41e   :  { %v2044_v13 = vpop.permute.xlu1 %2043  ;;  %v2042_v37 = vpop.permute.xlu0 %2041  ;;  %v7756_v43 = vpack.c.bf16 %v2168_v56, %v2167_v60 }
 0x41f   :  { %v2063_v12 = vadd.f32 %v2044_v13, %v2016_v2  ;;  %v2062_v18 = vadd.f32 %v2042_v37, %v2015_v19 }
 0x420   :  { %7757 = vmatprep.subr.bf16.mxu1 %v7756_v43  ;;  %2570 = vrot.lane.b32.xlu1 %v9636_v23, %s8154_s21 }
 0x421   :  { %7759 = vmatpush3.bf16.msra.mxu1 %v7756_v43  ;;  %2568 = vrot.lane.b32.xlu0 %v9633_v51, %s8154_s21 }
 0x422   :  { %v2091_v17 = vpop.permute.xlu1 %2090  ;;  %v2089_v27 = vpop.permute.xlu0 %2088 }
 0x423   :  { %v2110_v41 = vadd.f32 %v2091_v17, %v2063_v12  ;;  %v2109_v39 = vadd.f32 %v2089_v27, %v2062_v18 }
 0x424   :  { %2433 = vrot.lane.b32.xlu1 %v9645_v30, %s8153_s20 }
 0x425   :  { %v2124_v38 = vadd.f32 %v9580_v20, %v2110_v41  ;;  %v2123_v55 = vadd.f32 %v9580_v20, %v2109_v39  ;;  %2431 = vrot.lane.b32.xlu0 %v9648_v14, %s8153_s20 }
 0x426   :  { %v2003_v23 = vpop.permute.xlu1 %2002  ;;  %v1956_v34 = vpop.permute.xlu0 %1955 }
 0x427   :  { %v2132_v6 = vmax.f32 %v2124_v38, 0.0  ;;  %v2131_v31 = vmax.f32 %v2123_v55, 0.0 }
 0x428   :  { %2478 = vrot.lane.b32.xlu1 %v9654_v63, %s8152_s0 }
 0x429   :  { %v2151_v51 = vrot.slane %v2132_v6, 1  ;;  %v2149_v5 = vrot.slane %v2131_v31, 1  ;;  %2480 = vrot.lane.b32.xlu0 %v9657_v40, %s8152_s0 }
 0x42a   :  { %v1954_v30 = vpop.permute.xlu1 %1953  ;;  %v1952_v44 = vpop.permute.xlu0 %1951 }
 0x42b   :  { %v2152_v56 = vsel %vm343_vm3, %v2149_v5, %v2151_v51  ;;  %v2150_v60 = vsel %vm343_vm3, %v2147_v3, %v2149_v5  ;;  %v1971_v40 = vadd.f32 %v1954_v30, %v9526_v26  ;;  %v1970_v3 = vadd.f32 %v9496_v48, %v1952_v44 }
 0x42c   :  { %v2170_v47 = vmax.f32 %v2131_v31, %v2152_v56  ;;  %v2169_v14 = vmax.f32 %v2130_v0, %v2150_v60  ;;  %2527 = vrot.lane.b32.xlu1 %v9660_v42, %s8155_s22 }
 0x42d   :  { %2525 = vrot.lane.b32.xlu0 %v9663_v1, %s8155_s22  ;;  %v1972_v1 = vadd.f32 %v9518_v15, %v1956_v34 }
 0x42e   :  { %v2001_v63 = vpop.permute.xlu1 %2000  ;;  %v1999_v35 = vpop.permute.xlu0 %1998  ;;  %v7760_v13 = vpack.c.bf16 %v2170_v47, %v2169_v14 }
 0x42f   :  { %v2018_v0 = vadd.f32 %v2001_v63, %v1971_v40  ;;  %v2017_v37 = vadd.f32 %v1999_v35, %v1970_v3 }
 0x430   :  { %7761 = vmatprep.subr.bf16.mxu1 %v7760_v13  ;;  %2574 = vrot.lane.b32.xlu1 %v9683_v10, %s8154_s21 }
 0x431   :  { %7763 = vmatpush3.bf16.msra.mxu1 %v7760_v13  ;;  %2572 = vrot.lane.b32.xlu0 %v9686_v52, %s8154_s21 }
 0x432   :  { %v2046_v46 = vpop.permute.xlu1 %2045  ;;  %v2048_v42 = vpop.permute.xlu0 %2047 }
 0x433   :  { %v2064_v43 = vadd.f32 %v2046_v46, %v2017_v37  ;;  %v2065_v10 = vadd.f32 %v2048_v42, %v2018_v0 }
 0x434   :  { %2486 = vrot.lane.b32.xlu1 %v2470_v24, %s8152_s0  ;;  %v2019_v24 = vadd.f32 %v2003_v23, %v1972_v1 }
 0x435   :  { %2439 = vrot.lane.b32.xlu0 %v2423_v61, %s8153_s20 }
 0x436   :  { %v2095_v48 = vpop.permute.xlu1 %2094  ;;  %v2093_v26 = vpop.permute.xlu0 %2092 }
 0x437   :  { %v2112_v19 = vadd.f32 %v2095_v48, %v2065_v10  ;;  %v2111_v52 = vadd.f32 %v2093_v26, %v2064_v43 }
 0x438   :  { %2437 = vrot.lane.b32.xlu1 %v9691_v11, %s8153_s20 }
 0x439   :  { %v2126_v2 = vadd.f32 %v9580_v20, %v2112_v19  ;;  %v2125_v12 = vadd.f32 %v9580_v20, %v2111_v52  ;;  %2435 = vrot.lane.b32.xlu0 %v9694_v50, %s8153_s20 }
 0x43a   :  { %v2050_v15 = vpop.permute.xlu0 %2049  ;;  %v2097_v61 = vpop.permute.xlu1 %2096 }
 0x43b   :  { %v2134_v18 = vmax.f32 %v2126_v2, 0.0  ;;  %v2133_v17 = vmax.f32 %v2125_v12, 0.0  ;;  %v2066_v27 = vadd.f32 %v2050_v15, %v2019_v24 }
 0x43c   :  { %2484 = vrot.lane.b32.xlu1 %v9702_v45, %s8152_s0 }
 0x43d   :  { %v2155_v41 = vrot.slane %v2134_v18, 1  ;;  %v2153_v39 = vrot.slane %v2133_v17, 1  ;;  %v2113_v38 = vadd.f32 %v2097_v61, %v2066_v27  ;;  %2482 = vrot.lane.b32.xlu0 %v9705_v59, %s8152_s0 }
 0x43f   :  { %v2156_v11 = vsel %vm343_vm3, %v2153_v39, %v2155_v41  ;;  %v2127_v55 = vadd.f32 %v9580_v20, %v2113_v38  ;;  %v2154_v50 = vsel %vm343_vm3, %v2151_v51, %v2153_v39 }
 0x440   :  { %v2172_v23 = vmax.f32 %v2133_v17, %v2156_v11  ;;  %v2171_v34 = vmax.f32 %v2132_v6, %v2154_v50  ;;  %2529 = vrot.lane.b32.xlu1 %v9717_v8, %s8155_s22 }
 0x441   :  { %v2135_v31 = vmax.f32 %v2127_v55, 0.0  ;;  %2531 = vrot.lane.b32.xlu0 %v9722_v58, %s8155_s22 }
 0x442   :  { %v7764_v45 = vpack.c.bf16 %v2172_v23, %v2171_v34 }
 0x443   :  { %v2157_v5 = vrot.slane %v2135_v31, 1 }
 0x444   :  { %7765 = vmatprep.subr.bf16.mxu1 %v7764_v45  ;;  %2578 = vrot.lane.b32.xlu1 %v9731_v32, %s8154_s21 }
 0x445   :  { %v2174_v59 = vmax.f32 %v2135_v31, %v2157_v5  ;;  %7767 = vmatpush3.bf16.msra.mxu1 %v7764_v45  ;;  %v2158_v51 = vsel %vm343_vm3, %v2155_v41, %v2157_v5  ;;  %2576 = vrot.lane.b32.xlu0 %v9734_v33, %s8154_s21 }
 0x446   :  { %v2173_v6 = vmax.f32 %v2134_v18, %v2158_v51 }
 0x448   :  { %v7768_v58 = vpack.c.bf16 %v2174_v59, %v2173_v6  ;;  %2580 = vrot.lane.b32.xlu1 %v2564_v25, %s8154_s21  ;;  %v2742_v25 = vld [vmem:[%s10446_s5 + $0x8] sm:$0xff] }
 0x449   :  { %2533 = vrot.lane.b32.xlu0 %v2517_v21, %s8155_s22  ;;  %v2741_v21 = vld [vmem:[%s10446_s5] sm:$0xff] }
 0x44a   :  { %7770 = vmatprep.subr.msk.bf16.mxu1 %vm9794_vm8, %v7768_v58  ;;  %v9822_v32 = vpack.c.bf16 %v2742_v25, %v2741_v21 }
 0x44b   :  { %7773 = vmatpush3.bf16.msk.msra.mxu1 %vm9794_vm8, %v7768_v58 }
 0x44c   :  { %7797 = vmatprep.subr.bf16.mxu0 %v9822_v32 }
 0x44d   :  { %7799 = vmatpush3.bf16.msra.mxu0 %v9822_v32 }
 0x44e   :  { %7179 = vmatmul.mubr.msk.f32.vlgmr.msra.gmra.mrb[16].mxu1 %vm2175_vm6, %v9330_v22  ;;  %7805 = vmatprep.subr.bf16.mxu0 %v9822_v32 }
 0x44f   :  { %7181 = vmatprep.mubr.msk.f32.mxu1 %vm2175_vm6, %v9335_v16 }
 0x452   :  { %7182 = vmatmul.mubr.msk.f32.gmra.mrb[18].mxu1 %vm2175_vm6, %v9344_v36 }
 0x453   :  { %7216 = vmatprep.mubr.msk.f32.mxu1 %vm2175_vm6, %v10604_v29 }
 0x47e   :  { %v2473_v33 = vpop.permute.xlu1 %2472  ;;  %v2426_v30 = vpop.permute.xlu0 %2425 }
 0x47f   :  { %v2449_v44 = vadd.f32 %v2426_v30, %v9585_v57 }
 0x481   :  { %v2496_v47 = vadd.f32 %v2473_v33, %v2449_v44 }
 0x482   :  { %v2567_v56 = vpop.permute.xlu1 %2566 }
 0x483   :  { %v2520_v60 = vpop.permute.xlu0 %2519 }
 0x484   :  { %v2543_v35 = vadd.f32 %v2520_v60, %v2496_v47 }
 0x486   :  { %v2428_v14 = vpop.permute.xlu1 %2427  ;;  %v2590_v42 = vadd.f32 %v2567_v56, %v2543_v35 }
 0x487   :  { %v2430_v63 = vpop.permute.xlu0 %2429  ;;  %v2450_v13 = vadd.f32 %v9583_v28, %v2428_v14 }
 0x488   :  { %v2451_v40 = vadd.f32 %v2430_v63, %v9606_v53  ;;  %v2598_v10 = vadd.f32 %v9580_v20, %v2590_v42 }
 0x48a   :  { %v2477_v3 = vpop.permute.xlu1 %2476  ;;  %v2606_v2 = vmax.f32 %v2598_v10, 0.0 }
 0x48b   :  { %v2475_v46 = vpop.permute.xlu0 %2474  ;;  %v2498_v0 = vadd.f32 %v2477_v3, %v2451_v40 }
 0x48c   :  { %v2497_v37 = vadd.f32 %v2475_v46, %v2450_v13  ;;  %v2622_v17 = vrot.slane %v2606_v2, 1 }
 0x48e   :  { %v2522_v1 = vpop.permute.xlu1 %2521 }
 0x48f   :  { %v2524_v43 = vpop.permute.xlu0 %2523  ;;  %v2544_v57 = vadd.f32 %v2522_v1, %v2497_v37 }
 0x490   :  { %v2545_v48 = vadd.f32 %v2524_v43, %v2498_v0 }
 0x492   :  { %v2571_v26 = vpop.permute.xlu1 %2570 }
 0x493   :  { %v2592_v19 = vadd.f32 %v2571_v26, %v2545_v48  ;;  %v2569_v52 = vpop.permute.xlu0 %2568 }
 0x494   :  { %v2591_v12 = vadd.f32 %v2569_v52, %v2544_v57 }
 0x495   :  { %v2600_v28 = vadd.f32 %v9580_v20, %v2592_v19 }
 0x496   :  { %v2599_v53 = vadd.f32 %v9580_v20, %v2591_v12  ;;  %v2434_v24 = vpop.permute.xlu1 %2433 }
 0x497   :  { %v2608_v15 = vmax.f32 %v2600_v28, 0.0  ;;  %v2432_v18 = vpop.permute.xlu0 %2431  ;;  %v2453_v61 = vadd.f32 %v2434_v24, %v9629_v7 }
 0x498   :  { %v2607_v27 = vmax.f32 %v2599_v53, 0.0  ;;  %v2452_v41 = vadd.f32 %v9600_v49, %v2432_v18 }
 0x499   :  { %v2625_v39 = vrot.slane %v2608_v15, 1 }
 0x49a   :  { %v2623_v38 = vrot.slane %v2607_v27, 1  ;;  %v2479_v11 = vpop.permute.xlu1 %2478 }
 0x49b   :  { %v2481_v55 = vpop.permute.xlu0 %2480  ;;  %v2499_v23 = vadd.f32 %v2479_v11, %v2452_v41 }
 0x49c   :  { %v2626_v50 = vsel %vm343_vm3, %v2623_v38, %v2625_v39  ;;  %v2500_v34 = vadd.f32 %v2481_v55, %v2453_v61  ;;  %v2624_v31 = vsel %vm343_vm3, %v2622_v17, %v2623_v38 }
 0x49d   :  { %v2646_v45 = vmax.f32 %v2607_v27, %v2626_v50  ;;  %v2645_v5 = vmax.f32 %v2606_v2, %v2624_v31 }
 0x49e   :  { %v2528_v59 = vpop.permute.xlu1 %2527 }
 0x49f   :  { %v2547_v51 = vadd.f32 %v2528_v59, %v2500_v34  ;;  %v2526_v6 = vpop.permute.xlu0 %2525  ;;  %v7778_v58 = vpack.c.bf16 %v2646_v45, %v2645_v5 }
 0x4a0   :  { %v2546_v21 = vadd.f32 %v2526_v6, %v2499_v23 }
 0x4a1   :  { %7779 = vmatprep.subr.bf16.mxu1 %v7778_v58 }
 0x4a2   :  { %v2575_v7 = vpop.permute.xlu1 %2574  ;;  %7781 = vmatpush3.bf16.msra.mxu1 %v7778_v58 }
 0x4a3   :  { %v2594_v49 = vadd.f32 %v2575_v7, %v2547_v51  ;;  %v2573_v25 = vpop.permute.xlu0 %2572 }
 0x4a4   :  { %v2593_v33 = vadd.f32 %v2573_v25, %v2546_v21 }
 0x4a5   :  { %v2602_v30 = vadd.f32 %v9580_v20, %v2594_v49 }
 0x4a6   :  { %v2601_v44 = vadd.f32 %v9580_v20, %v2593_v33  ;;  %v2487_v56 = vpop.permute.xlu1 %2486 }
 0x4a7   :  { %v2610_v60 = vmax.f32 %v2602_v30, 0.0  ;;  %v2440_v47 = vpop.permute.xlu0 %2439 }
 0x4a8   :  { %v2609_v14 = vmax.f32 %v2601_v44, 0.0  ;;  %v2456_v2 = vadd.f32 %v9650_v4, %v2440_v47 }
 0x4a9   :  { %v2629_v63 = vrot.slane %v2610_v60, 1 }
 0x4aa   :  { %v2627_v35 = vrot.slane %v2609_v14, 1  ;;  %v2438_v13 = vpop.permute.xlu1 %2437  ;;  %v2503_v18 = vadd.f32 %v2487_v56, %v2456_v2 }
 0x4ab   :  { %v2436_v40 = vpop.permute.xlu0 %2435  ;;  %v2455_v46 = vadd.f32 %v2438_v13, %v9665_v62 }
 0x4ac   :  { %v2630_v3 = vsel %vm343_vm3, %v2627_v35, %v2629_v63  ;;  %v2454_v42 = vadd.f32 %v9620_v9, %v2436_v40  ;;  %v2628_v0 = vsel %vm343_vm3, %v2625_v39, %v2627_v35 }
 0x4ad   :  { %v2648_v37 = vmax.f32 %v2609_v14, %v2630_v3  ;;  %v2647_v1 = vmax.f32 %v2608_v15, %v2628_v0 }
 0x4ae   :  { %v2485_v43 = vpop.permute.xlu1 %2484 }
 0x4af   :  { %v2483_v10 = vpop.permute.xlu0 %2482  ;;  %v7782_v57 = vpack.c.bf16 %v2648_v37, %v2647_v1  ;;  %v2502_v48 = vadd.f32 %v2485_v43, %v2455_v46 }
 0x4b0   :  { %v2501_v26 = vadd.f32 %v2483_v10, %v2454_v42 }
 0x4b1   :  { %7783 = vmatprep.subr.bf16.mxu1 %v7782_v57 }
 0x4b2   :  { %v2530_v19 = vpop.permute.xlu1 %2529  ;;  %7785 = vmatpush3.bf16.msra.mxu1 %v7782_v57 }
 0x4b3   :  { %v2532_v52 = vpop.permute.xlu0 %2531  ;;  %v2548_v12 = vadd.f32 %v2530_v19, %v2501_v26 }
 0x4b4   :  { %v2549_v28 = vadd.f32 %v2532_v52, %v2502_v48 }
 0x4b6   :  { %v2579_v62 = vpop.permute.xlu1 %2578 }
 0x4b7   :  { %v2596_v53 = vadd.f32 %v2579_v62, %v2549_v28  ;;  %v2577_v9 = vpop.permute.xlu0 %2576 }
 0x4b8   :  { %v2595_v24 = vadd.f32 %v2577_v9, %v2548_v12 }
 0x4b9   :  { %v2604_v15 = vadd.f32 %v9580_v20, %v2596_v53 }
 0x4ba   :  { %v2603_v17 = vadd.f32 %v9580_v20, %v2595_v24  ;;  %v2581_v41 = vpop.permute.xlu1 %2580 }
 0x4bb   :  { %v2612_v27 = vmax.f32 %v2604_v15, 0.0  ;;  %v2534_v61 = vpop.permute.xlu0 %2533 }
 0x4bc   :  { %v2611_v39 = vmax.f32 %v2603_v17, 0.0  ;;  %v2550_v38 = vadd.f32 %v2534_v61, %v2503_v18 }
 0x4bd   :  { %v2633_v11 = vrot.slane %v2612_v27, 1 }
 0x4be   :  { %v2631_v55 = vrot.slane %v2611_v39, 1  ;;  %v2597_v50 = vadd.f32 %v2581_v41, %v2550_v38 }
 0x4c0   :  { %v2634_v4 = vsel %vm343_vm3, %v2631_v55, %v2633_v11  ;;  %v2605_v23 = vadd.f32 %v9580_v20, %v2597_v50  ;;  %v2632_v34 = vsel %vm343_vm3, %v2629_v63, %v2631_v55 }
 0x4c1   :  { %v2650_v31 = vmax.f32 %v2611_v39, %v2634_v4  ;;  %v2649_v45 = vmax.f32 %v2610_v60, %v2632_v34 }
 0x4c2   :  { %v2613_v5 = vmax.f32 %v2605_v23, 0.0 }
 0x4c3   :  { %v7786_v59 = vpack.c.bf16 %v2650_v31, %v2649_v45 }
 0x4c4   :  { %v2635_v51 = vrot.slane %v2613_v5, 1 }
 0x4c5   :  { %7787 = vmatprep.subr.bf16.mxu1 %v7786_v59 }
 0x4c6   :  { %v2636_v6 = vsel %vm343_vm3, %v2633_v11, %v2635_v51  ;;  %v2652_v58 = vmax.f32 %v2613_v5, %v2635_v51  ;;  %7789 = vmatpush3.bf16.msra.mxu1 %v7786_v59  ;;  %v9923_v59 = vld [vmem:[%s10447_s6] ss:$0 sm:$0xff] }
 0x4c7   :  { %v2651_v21 = vmax.f32 %v2612_v27, %v2636_v6 }
 0x4c9   :  { %v7790_v7 = vpack.c.bf16 %v2652_v58, %v2651_v21 }
 0x4cb   :  { %7792 = vmatprep.subr.msk.bf16.mxu1 %vm9794_vm8, %v7790_v7 }
 0x4cc   :  { %7795 = vmatpush3.bf16.msk.msra.mxu1 %vm9794_vm8, %v7790_v7 }
 0x4cf   :  { %7217 = vmatmul.mubr.msk.f32.vlgmr.msra.gmra.mrb[20].mxu1 %vm2175_vm6, %v9330_v22 }
 0x4d0   :  { %7219 = vmatprep.mubr.msk.f32.mxu1 %vm2175_vm6, %v9335_v16 }
 0x4d3   :  { %7220 = vmatmul.mubr.msk.f32.gmra.mrb[22].mxu1 %vm2175_vm6, %v9344_v36 }
 0x4d4   :  { %7238 = vmatprep.mubr.msk.f32.mxu1 %vm2968_vm9, %v10604_v29 }
 0x521   :  { %v7180_v20 = vpop.f32.mrb[16].mxu1 }
 0x522   :  { %v2254_v49 = vpop.f32.mrb[17].mxu1 }
 0x523   :  { %7226 = vmatprep.mubr.msk.f32.mxu0 %vm1788_vm0, %v2254_v49 }
 0x524   :  { %7227 = vmatmul.mubr.msk.f32.vlgmr.msra.gmra.mrb[48].mxu0 %vm1788_vm0, %v7180_v20 }
 0x525   :  { %v7183_v25 = vpop.f32.mrb[18].mxu1  ;;  %7807 = vmatpush3.bf16.msra.mxu0 %v9822_v32 }
 0x526   :  { %v2264_v8 = vpop.f32.mrb[19].mxu1 }
 0x527   :  { %7229 = vmatprep.mubr.msk.f32.mxu0 %vm1788_vm0, %v2264_v8 }
 0x528   :  { %7230 = vmatmul.mubr.msk.f32.gmra.mrb[50].mxu0 %vm1788_vm0, %v7183_v25 }
 0x5a2   :  { %v7218_v33 = vpop.f32.mrb[20].mxu1 }
 0x5a3   :  { %v2722_v30 = vpop.f32.mrb[21].mxu1 }
 0x5a4   :  { %7245 = vmatprep.mubr.msk.f32.mxu0 %vm1788_vm0, %v2722_v30 }
 0x5a5   :  { %7246 = vmatmul.mubr.msk.f32.vlgmr.msra.gmra.mrb[52].mxu0 %vm1788_vm0, %v7218_v33 }
 0x5a6   :  { %v7221_v16 = vpop.f32.mrb[22].mxu1 }
 0x5a7   :  { %v2732_v36 = vpop.f32.mrb[23].mxu1 }
 0x5a8   :  { %7248 = vmatprep.mubr.msk.f32.mxu0 %vm1788_vm0, %v2732_v36 }
 0x5a9   :  { %7249 = vmatmul.mubr.msk.f32.gmra.mrb[54].mxu0 %vm1788_vm0, %v7221_v16 }
 0x5f7   :  { %v9869_v44 = vpop.f32.mrb[48].mxu0 }
 0x5f8   :  { %v2822_v32 = vpop.f32.mrb[49].mxu0  ;;  %v2869_v56 = vrot.slane %v9869_v44, 2  ;;  %v2846_v60 = vrot.slane %v9869_v44, 1  ;;  %v2892_v47 = vrot.slane %v9869_v44, 3  ;;  %v2915_v14 = vrot.slane %v9869_v44, 4 }
 0x5f9   :  { %v2868_v63 = vrot.slane %v2822_v32, 2  ;;  %v2845_v35 = vrot.slane %v2822_v32, 1  ;;  %v2891_v13 = vrot.slane %v2822_v32, 3  ;;  %v2914_v40 = vrot.slane %v2822_v32, 4 }
 0x5fb   :  { %v9875_v3 = vpop.f32.mrb[50].mxu0  ;;  %v2870_v46 = vsel %vm439_vm2, %v2868_v63, %v2869_v56  ;;  %v2847_v42 = vsel %vm343_vm3, %v2845_v35, %v2846_v60  ;;  %v2893_v0 = vsel %vm535_vm5, %v2891_v13, %v2892_v47  ;;  %v2916_v37 = vsel %vm631_vm4, %v2914_v40, %v2915_v14 }
 0x5fc   :  { %2875 = vrot.lane.b32.xlu1 %v2870_v46, %s8152_s0  ;;  %2852 = vrot.lane.b32.xlu0 %v2847_v42, %s8153_s20  ;;  %v2832_v1 = vpop.f32.mrb[51].mxu0  ;;  %v2850_v43 = vrot.slane %v9875_v3, 1  ;;  %v2873_v10 = vrot.slane %v9875_v3, 2  ;;  %v2896_v57 = vrot.slane %v9875_v3, 3  ;;  %v2919_v48 = vrot.slane %v9875_v3, 4 }
 0x5fd   :  { %v2848_v26 = vrot.slane %v2832_v1, 1  ;;  %v2871_v19 = vrot.slane %v2832_v1, 2  ;;  %v2894_v52 = vrot.slane %v2832_v1, 3  ;;  %v2917_v2 = vrot.slane %v2832_v1, 4 }
 0x5ff   :  { %v2849_v12 = vsel %vm343_vm3, %v2846_v60, %v2848_v26  ;;  %v2851_v28 = vsel %vm343_vm3, %v2848_v26, %v2850_v43  ;;  %v2874_v62 = vsel %vm439_vm2, %v2871_v19, %v2873_v10  ;;  %v2872_v53 = vsel %vm439_vm2, %v2869_v56, %v2871_v19 }
 0x600   :  { %2898 = vrot.lane.b32.xlu0 %v2893_v0, %s8155_s22  ;;  %2858 = vrot.lane.b32.xlu1 %v2850_v43, %s8153_s20  ;;  %v2895_v9 = vsel %vm535_vm5, %v2892_v47, %v2894_v52  ;;  %v2897_v24 = vsel %vm535_vm5, %v2894_v52, %v2896_v57  ;;  %v2918_v18 = vsel %vm631_vm4, %v2915_v14, %v2917_v2 }
 0x601   :  { %v2920_v15 = vsel %vm631_vm4, %v2917_v2, %v2919_v48 }
 0x604   :  { %2921 = vrot.lane.b32.xlu0 %v2916_v37, %s8154_s21  ;;  %2854 = vrot.lane.b32.xlu1 %v2849_v12, %s8153_s20 }
 0x608   :  { %2856 = vrot.lane.b32.xlu0 %v2851_v28, %s8153_s20  ;;  %2879 = vrot.lane.b32.xlu1 %v2874_v62, %s8152_s0 }
 0x60c   :  { %2877 = vrot.lane.b32.xlu0 %v2872_v53, %s8152_s0  ;;  %2900 = vrot.lane.b32.xlu1 %v2895_v9, %s8155_s22 }
 0x610   :  { %2902 = vrot.lane.b32.xlu0 %v2897_v24, %s8155_s22  ;;  %2923 = vrot.lane.b32.xlu1 %v2918_v18, %s8154_s21 }
 0x614   :  { %2925 = vrot.lane.b32.xlu0 %v2920_v15, %s8154_s21  ;;  %2881 = vrot.lane.b32.xlu1 %v2873_v10, %s8152_s0 }
 0x618   :  { %2904 = vrot.lane.b32.xlu0 %v2896_v57, %s8155_s22  ;;  %2927 = vrot.lane.b32.xlu1 %v2919_v48, %s8154_s21 }
 0x66e   :  { %v2876_v17 = vpop.permute.xlu1 %2875  ;;  %v2853_v27 = vpop.permute.xlu0 %2852 }
 0x66f   :  { %v2864_v61 = vadd.f32 %v2853_v27, %v2822_v32 }
 0x671   :  { %v2887_v38 = vadd.f32 %v2876_v17, %v2864_v61 }
 0x672   :  { %v9911_v41 = vpop.permute.xlu1 %2858  ;;  %v2899_v39 = vpop.permute.xlu0 %2898 }
 0x673   :  { %v2910_v50 = vadd.f32 %v2899_v39, %v2887_v38  ;;  %v2867_v27 = vadd.f32 %v9875_v3, %v9911_v41 }
 0x676   :  { %v2855_v11 = vpop.permute.xlu1 %2854  ;;  %v2922_v55 = vpop.permute.xlu0 %2921 }
 0x677   :  { %v2933_v23 = vadd.f32 %v2922_v55, %v2910_v50  ;;  %v2865_v25 = vadd.f32 %v9869_v44, %v2855_v11 }
 0x678   :  { %v9913_v4 = vpop.f32.mrb[52].mxu0 }
 0x679   :  { %v9915_v34 = vpop.f32.mrb[53].mxu0  ;;  %v3150_v31 = vrot.slane %v9913_v4, 1  ;;  %v3173_v45 = vrot.slane %v9913_v4, 2  ;;  %v3196_v5 = vrot.slane %v9913_v4, 3  ;;  %v3219_v49 = vrot.slane %v9913_v4, 4 }
 0x67a   :  { %v2880_v51 = vpop.permute.xlu1 %2879  ;;  %v2857_v6 = vpop.permute.xlu0 %2856  ;;  %v3149_v58 = vrot.slane %v9915_v34, 1  ;;  %v3172_v21 = vrot.slane %v9915_v34, 2  ;;  %v3195_v7 = vrot.slane %v9915_v34, 3  ;;  %v3218_v20 = vrot.slane %v9915_v34, 4 }
 0x67b   :  { %v2943_v36 = vadd.f32 %v9923_v59, %v2933_v23  ;;  %v2866_v32 = vadd.f32 %v2857_v6, %v2832_v1 }
 0x67c   :  { %v3151_v8 = vsel %vm343_vm3, %v3149_v58, %v3150_v31  ;;  %v3174_v33 = vsel %vm439_vm2, %v3172_v21, %v3173_v45  ;;  %v3197_v30 = vsel %vm535_vm5, %v3195_v7, %v3196_v5  ;;  %v9934_v16 = vpop.f32.mrb[54].mxu0  ;;  %v3220_v56 = vsel %vm631_vm4, %v3218_v20, %v3219_v49 }
 0x67d   :  { %3156 = vrot.lane.b32.xlu0 %v3151_v8, %s8153_s20  ;;  %3179 = vrot.lane.b32.xlu1 %v3174_v33, %s8152_s0  ;;  %v3154_v60 = vrot.slane %v9934_v16, 1  ;;  %v9941_v44 = vpop.f32.mrb[55].mxu0  ;;  %v3177_v13 = vrot.slane %v9934_v16, 2  ;;  %v3200_v42 = vrot.slane %v9934_v16, 3  ;;  %v3223_v37 = vrot.slane %v9934_v16, 4 }
 0x67e   :  { %v2901_v47 = vpop.permute.xlu1 %2900  ;;  %v2878_v14 = vpop.permute.xlu0 %2877  ;;  %v3152_v63 = vrot.slane %v9941_v44, 1  ;;  %v3175_v35 = vrot.slane %v9941_v44, 2  ;;  %v3198_v40 = vrot.slane %v9941_v44, 3  ;;  %v3221_v0 = vrot.slane %v9941_v44, 4 }
 0x67f   :  { %v2888_v46 = vadd.f32 %v2878_v14, %v2865_v25  ;;  %v2889_v53 = vadd.f32 %v2880_v51, %v2866_v32  ;;  %v2947_v9 = vmax.f32 %v2943_v36, 0.0  ;;  %v3345_v14 = vld [vmem:[%s10448_s7] sm:$0xff] }
 0x680   :  { %v3155_v1 = vsel %vm343_vm3, %v3152_v63, %v3154_v60  ;;  %v3153_v43 = vsel %vm343_vm3, %v3150_v31, %v3152_v63  ;;  %v3176_v10 = vsel %vm439_vm2, %v3173_v45, %v3175_v35  ;;  %v3178_v57 = vsel %vm439_vm2, %v3175_v35, %v3177_v13  ;;  %vm9987_vm2 = vmpackc.low %vm631_vm4, %vm8157_vm15 }
 0x681   :  { %v2911_v48 = vadd.f32 %v2901_v47, %v2888_v46  ;;  %3202 = vrot.lane.b32.xlu0 %v3197_v30, %s8155_s22  ;;  %3162 = vrot.lane.b32.xlu1 %v3154_v60, %s8153_s20  ;;  %v3201_v26 = vsel %vm535_vm5, %v3198_v40, %v3200_v42  ;;  %v3199_v19 = vsel %vm535_vm5, %v3196_v5, %v3198_v40  ;;  %v2955_v38 = vrot.slane %v2947_v9, 1 }
 0x682   :  { %v2924_v52 = vpop.permute.xlu1 %2923  ;;  %v2903_v2 = vpop.permute.xlu0 %2902  ;;  %v3224_v12 = vsel %vm631_vm4, %v3221_v0, %v3223_v37  ;;  %v3222_v28 = vsel %vm631_vm4, %v3219_v49, %v3221_v0  ;;  %v8158_v46 = vmov 0.0|0.0   ;;  %vm3386_vm4 = vcmask 97280  }
 0x683   :  { %v2934_v62 = vadd.f32 %v2924_v52, %v2911_v48  ;;  %v2912_v18 = vadd.f32 %v2903_v2, %v2889_v53  ;;  %vm3471_vm5 = vcmask 261120  }
 0x685   :  { %v2944_v24 = vadd.f32 %v9923_v59, %v2934_v62  ;;  %3225 = vrot.lane.b32.xlu0 %v3220_v56, %s8154_s21  ;;  %3158 = vrot.lane.b32.xlu1 %v3153_v43, %s8153_s20 }
 0x686   :  { %v2882_v15 = vpop.permute.xlu1 %2881  ;;  %v2926_v17 = vpop.permute.xlu0 %2925 }
 0x687   :  { %v2948_v61 = vmax.f32 %v2944_v24, 0.0  ;;  %v2935_v39 = vadd.f32 %v2926_v17, %v2912_v18  ;;  %v2890_v55 = vadd.f32 %v2882_v15, %v2867_v27 }
 0x689   :  { %v2956_v11 = vrot.slane %v2948_v61, 1  ;;  %v2945_v50 = vadd.f32 %v9923_v59, %v2935_v39  ;;  %3160 = vrot.lane.b32.xlu0 %v3155_v1, %s8153_s20  ;;  %3183 = vrot.lane.b32.xlu1 %v3178_v57, %s8152_s0 }
 0x68a   :  { %v2905_v23 = vpop.permute.xlu0 %2904  ;;  %v2928_v51 = vpop.permute.xlu1 %2927 }
 0x68b   :  { %v2949_v31 = vmax.f32 %v2945_v50, 0.0  ;;  %v2913_v45 = vadd.f32 %v2905_v23, %v2890_v55  ;;  %v2957_v5 = vsel %vm343_vm3, %v2955_v38, %v2956_v11 }
 0x68c   :  { %v2965_v6 = vmax.f32 %v2947_v9, %v2957_v5 }
 0x68d   :  { %v2958_v58 = vrot.slane %v2949_v31, 1  ;;  %v2936_v3 = vadd.f32 %v2928_v51, %v2913_v45  ;;  %3181 = vrot.lane.b32.xlu0 %v3176_v10, %s8152_s0  ;;  %3204 = vrot.lane.b32.xlu1 %v3199_v19, %s8155_s22 }
 0x68f   :  { %v2946_v41 = vadd.f32 %v9923_v59, %v2936_v3  ;;  %v2959_v21 = vsel %vm343_vm3, %v2956_v11, %v2958_v58 }
 0x690   :  { %v2966_v7 = vmax.f32 %v2948_v61, %v2959_v21 }
 0x691   :  { %v2950_v20 = vmax.f32 %v2946_v41, 0.0  ;;  %3206 = vrot.lane.b32.xlu0 %v3201_v26, %s8155_s22  ;;  %3227 = vrot.lane.b32.xlu1 %v3222_v28, %s8154_s21 }
 0x692   :  { %v7800_v49 = vpack.c.bf16 %v2966_v7, %v2965_v6 }
 0x693   :  { %v2960_v25 = vrot.slane %v2950_v20, 1 }
 0x694   :  { %7801 = vmatprep.subr.bf16.mxu1 %v7800_v49 }
 0x695   :  { %7803 = vmatpush3.bf16.msra.mxu1 %v7800_v49  ;;  %v2961_v8 = vsel %vm343_vm3, %v2958_v58, %v2960_v25  ;;  %3229 = vrot.lane.b32.xlu0 %v3224_v12, %s8154_s21  ;;  %v3341_v49 = vld [vmem:[%s10449_s8] sm:$0xff]  ;;  %v3342_v25 = vld [vmem:[%s10449_s8 + $0x8] sm:$0xff] }
 0x696   :  { %v2967_v33 = vmax.f32 %v2949_v31, %v2961_v8  ;;  %3185 = vrot.lane.b32.xlu1 %v3177_v13, %s8152_s0  ;;  %v10025_v8 = vpack.c.bf16 %v3342_v25, %v3341_v49 }
 0x698   :  { %7236 = vmatprep.subr.mxu1 %v2967_v33 }
 0x699   :  { %7237 = vmatpush3.msra.mxu1 %v2967_v33  ;;  %3208 = vrot.lane.b32.xlu0 %v3200_v42, %s8155_s22  ;;  %v3344_v33 = vld [vmem:[%s10449_s8 + $0x18] sm:$0xff] }
 0x69a   :  { %7239 = vmatmul.mubr.msk.f32.vlgmr.msra.gmra.mrb[24].mxu1 %vm2968_vm9, %v9330_v22  ;;  %3231 = vrot.lane.b32.xlu1 %v3223_v37, %s8154_s21 }
 0x69b   :  { %7257 = vmatprep.mubr.msk.f32.mxu1 %vm2968_vm9, %v10604_v29  ;;  %v3346_v29 = vld [vmem:[%s10448_s7 + $0x8] sm:$0xf] }
 0x69c   :  { %v9997_v35 = vpack.c.bf16 %v3346_v29, %v3345_v14 }
 0x69e   :  { %7814 = vmatprep.subr.msk.bf16.mxu0 %vm9987_vm2, %v9997_v35 }
 0x69f   :  { %7817 = vmatpush3.bf16.msk.msra.mxu0 %vm9987_vm2, %v9997_v35 }
 0x6a0   :  { %7824 = vmatprep.subr.bf16.mxu0 %v8158_v46 }
 0x6ef   :  { %v3157_v30 = vpop.permute.xlu0 %3156  ;;  %v3180_v36 = vpop.permute.xlu1 %3179 }
 0x6f0   :  { %v3168_v32 = vadd.f32 %v3157_v30, %v9915_v34 }
 0x6f2   :  { %v3191_v63 = vadd.f32 %v3180_v36, %v3168_v32 }
 0x6f3   :  { %v3203_v60 = vpop.permute.xlu0 %3202  ;;  %v3163_v47 = vpop.permute.xlu1 %3162 }
 0x6f4   :  { %v3214_v40 = vadd.f32 %v3203_v60, %v3191_v63  ;;  %v3171_v9 = vadd.f32 %v9934_v16, %v3163_v47  ;;  %v10062_v63 = vld [vmem:[%s10450_s9] ss:$0 sm:$0xff] }
 0x6f7   :  { %v3226_v34 = vpop.permute.xlu0 %3225  ;;  %v3159_v13 = vpop.permute.xlu1 %3158 }
 0x6f8   :  { %v3237_v37 = vadd.f32 %v3226_v34, %v3214_v40  ;;  %v3169_v1 = vadd.f32 %v9913_v4, %v3159_v13 }
 0x6fa   :  { %v3241_v48 = vadd.f32 %v9923_v59, %v3237_v37 }
 0x6fb   :  { %v3161_v42 = vpop.permute.xlu0 %3160  ;;  %v3184_v0 = vpop.permute.xlu1 %3183 }
 0x6fc   :  { %v3170_v43 = vadd.f32 %v3161_v42, %v9941_v44  ;;  %v3245_v28 = vmax.f32 %v3241_v48, 0.0 }
 0x6fe   :  { %v3193_v26 = vadd.f32 %v3184_v0, %v3170_v43  ;;  %v3253_v4 = vrot.slane %v3245_v28, 1 }
 0x6ff   :  { %v3182_v10 = vpop.permute.xlu0 %3181  ;;  %v3205_v57 = vpop.permute.xlu1 %3204 }
 0x700   :  { %v3192_v19 = vadd.f32 %v3182_v10, %v3169_v1 }
 0x702   :  { %v3215_v52 = vadd.f32 %v3205_v57, %v3192_v19 }
 0x703   :  { %v3207_v2 = vpop.permute.xlu0 %3206  ;;  %v3228_v12 = vpop.permute.xlu1 %3227 }
 0x704   :  { %v3216_v62 = vadd.f32 %v3207_v2, %v3193_v26  ;;  %v3238_v53 = vadd.f32 %v3228_v12, %v3215_v52 }
 0x706   :  { %v3242_v24 = vadd.f32 %v9923_v59, %v3238_v53 }
 0x707   :  { %v3230_v18 = vpop.permute.xlu0 %3229 }
 0x708   :  { %v3246_v15 = vmax.f32 %v3242_v24, 0.0  ;;  %v3239_v44 = vadd.f32 %v3230_v18, %v3216_v62  ;;  %v3186_v17 = vpop.permute.xlu1 %3185 }
 0x709   :  { %v3194_v27 = vadd.f32 %v3186_v17, %v3171_v9 }
 0x70a   :  { %v3254_v61 = vrot.slane %v3246_v15, 1  ;;  %v3243_v39 = vadd.f32 %v9923_v59, %v3239_v44 }
 0x70b   :  { %v3209_v38 = vpop.permute.xlu0 %3208 }
 0x70c   :  { %v3247_v11 = vmax.f32 %v3243_v39, 0.0  ;;  %v3217_v55 = vadd.f32 %v3209_v38, %v3194_v27  ;;  %v3232_v50 = vpop.permute.xlu1 %3231  ;;  %v3255_v23 = vsel %vm343_vm3, %v3253_v4, %v3254_v61 }
 0x70d   :  { %v3263_v31 = vmax.f32 %v3245_v28, %v3255_v23 }
 0x70e   :  { %v3256_v45 = vrot.slane %v3247_v11, 1  ;;  %v3240_v16 = vadd.f32 %v3232_v50, %v3217_v55 }
 0x710   :  { %v3244_v5 = vadd.f32 %v9923_v59, %v3240_v16  ;;  %v3257_v51 = vsel %vm343_vm3, %v3254_v61, %v3256_v45 }
 0x711   :  { %v3264_v6 = vmax.f32 %v3246_v15, %v3257_v51 }
 0x712   :  { %v3248_v58 = vmax.f32 %v3244_v5, 0.0 }
 0x713   :  { %v7808_v3 = vpack.c.bf16 %v3264_v6, %v3263_v31 }
 0x714   :  { %v3258_v41 = vrot.slane %v3248_v58, 1 }
 0x715   :  { %7809 = vmatprep.subr.bf16.mxu1 %v7808_v3 }
 0x716   :  { %7811 = vmatpush3.bf16.msra.mxu1 %v7808_v3  ;;  %v3259_v21 = vsel %vm343_vm3, %v3256_v45, %v3258_v41  ;;  %vm8159_vm3 = vmmov 0  }
 0x717   :  { %v3265_v7 = vmax.f32 %v3247_v11, %v3259_v21 }
 0x719   :  { %7255 = vmatprep.subr.mxu1 %v3265_v7 }
 0x71a   :  { %7256 = vmatpush3.msra.mxu1 %v3265_v7 }
 0x71b   :  { %7258 = vmatmul.mubr.msk.f32.vlgmr.msra.gmra.mrb[26].mxu1 %vm2968_vm9, %v9330_v22  ;;  %7818 = vmatprep.subr.bf16.mxu1 %v8158_v46  ;;  %v3343_v22 = vld [vmem:[%s10449_s8 + $0x10] sm:$0xff] }
 0x71c   :  { %7820 = vmatpush3.bf16.msra.mxu1 %v10025_v8  ;;  %v10035_v30 = vpack.c.bf16 %v3344_v33, %v3343_v22  ;;  %7275 = vmatprep.mubr.msk.f32.mxu1 %vm8159_vm3, %v10596_v54 }
 0x71d   :  { %7821 = vmatprep.subr.bf16.mxu1 %v8158_v46 }
 0x720   :  { %7823 = vmatpush3.bf16.msra.mxu1 %v10035_v30 }
 0x721   :  { %7830 = vmatprep.subr.bf16.mxu1 %v8158_v46 }
 0x723   :  { %7276 = vmatmul.mubr.f32.vlgmr.msra.gmra.mrb[28].mxu1 %v10596_v54 }
 0x724   :  { %7832 = vmatpush3.bf16.msra.mxu1 %v10025_v8  ;;  %7297 = vmatprep.mubr.msk.f32.mxu1 %vm8159_vm3, %v10596_v54 }
 0x725   :  { %7833 = vmatprep.subr.bf16.mxu1 %v8158_v46 }
 0x728   :  { %7835 = vmatpush3.bf16.msra.mxu1 %v10035_v30 }
 0x729   :  { %7842 = vmatprep.subr.bf16.mxu1 %v8158_v46 }
 0x76d   :  { %v7240_v20 = vpop.f32.mrb[24].mxu1 }
 0x76e   :  { %v3039_v59 = vpop.f32.mrb[25].mxu1 }
 0x76f   :  { %3348 = vxpose.xlu0.b32.start [1/2] (short) (narrow) %v3039_v59, 16 }
 0x773   :  { %3349 = vxpose.xlu0.b32.end [2/2] (short) (narrow) %v7240_v20, 16 }
 0x7ee   :  { %v7259_v36 = vpop.f32.mrb[26].mxu1 }
 0x7ef   :  { %v3364_v32 = vpop.trf.xlu0  ;;  %v3332_v60 = vpop.f32.mrb[27].mxu1 }
 0x7f0   :  { %7264 = vmatprep.mubr.msk.f32.mxu0 %vm3386_vm4, %v3364_v32  ;;  %4924 = vxpose.xlu1.b32.start [1/2] (short) (narrow) %v3332_v60, 16 }
 0x7f3   :  { %v10049_v47 = vpop.trf.xlu0 }
 0x7f4   :  { %7265 = vmatmul.mubr.msk.f32.vlgmr.msra.gmra.mrb[56].mxu0 %vm3386_vm4, %v10049_v47  ;;  %4925 = vxpose.xlu1.b32.end [2/2] (short) (narrow) %v7259_v36, 16 }
 0x7f5   :  { %7826 = vmatpush3.bf16.msra.mxu0 %v10025_v8  ;;  %7286 = vmatprep.mubr.msk.f32.mxu0 %vm8159_vm3, %v10596_v54 }
 0x7f6   :  { %7827 = vmatprep.subr.bf16.mxu0 %v8158_v46  ;;  %v3541_v14 = vpop.f32.mrb[28].mxu1 }
 0x7f7   :  { %v7277_v29 = vpop.f32.mrb[29].mxu1 }
 0x7f9   :  { %7829 = vmatpush3.bf16.msra.mxu0 %v10035_v30 }
 0x7fa   :  { %7836 = vmatprep.subr.bf16.mxu0 %v8158_v46 }
 0x8c7   :  { %v10064_v34 = vpop.f32.mrb[56].mxu0 }
 0x8c8   :  { %v3462_v13 = vpop.f32.mrb[57].mxu0  ;;  %v10135_v58 = vadd.f32 %v10064_v34, %v10062_v63 }
 0x8c9   :  { %v10067_v40 = vadd.f32 %v10062_v63, %v3462_v13 }
 0x8ca   :  { %v4154_v20 = vrot.slane %v10135_v58, 1  ;;  %v4230_v33 = vrot.slane %v10135_v58, 2  ;;  %v4306_v29 = vrot.slane %v10135_v58, 3 }
 0x8cb   :  { %v3542_v42 = vadd.f32 %v3541_v14, %v10067_v40  ;;  %v3547_v37 = vrot.slane %v10067_v40, 1  ;;  %v3623_v48 = vrot.slane %v10067_v40, 2  ;;  %v3699_v12 = vrot.slane %v10067_v40, 3 }
 0x8cc   :  { %v3775_v24 = vrot.slane %v10067_v40, 4  ;;  %v3851_v17 = vrot.slane %v10067_v40, 5  ;;  %v3927_v11 = vrot.slane %v10067_v40, 6  ;;  %v4003_v45 = vrot.slane %v10067_v40, 7 }
 0x8cd   :  { %8059 = vtanh.f32 %v3542_v42 }
 0x8d7   :  { %v8060_v0 = vpop.eup %8059 }
 0x8d8   :  { %7287 = vmatmul.mubr.msk.f32.vlgmr.msra.gmra.mrb[58].mxu0 %vm3471_vm5, %v8060_v0  ;;  %v4382_v0 = vrot.slane %v10135_v58, 4 }
 0x8d9   :  { %7838 = vmatpush3.bf16.msra.mxu0 %v10025_v8  ;;  %7308 = vmatprep.mubr.msk.f32.mxu0 %vm8159_vm3, %v10596_v54 }
 0x8da   :  { %7839 = vmatprep.subr.bf16.mxu0 %v8158_v46 }
 0x8dd   :  { %7841 = vmatpush3.bf16.msra.mxu0 %v10035_v30 }
 0x8de   :  { %7848 = vmatprep.subr.bf16.mxu0 %v8158_v46 }
 0x9ab   :  { %v3618_v1 = vpop.f32.mrb[58].mxu0 }
 0x9ac   :  { %v3619_v43 = vadd.f32 %v3618_v1, %v3547_v37  ;;  %v7288_v10 = vpop.f32.mrb[59].mxu0 }
 0x9ae   :  { %8061 = vtanh.f32 %v3619_v43 }
 0x9b8   :  { %v8062_v57 = vpop.eup %8061 }
 0x9b9   :  { %7298 = vmatmul.mubr.msk.f32.vlgmr.msra.gmra.mrb[30].mxu1 %vm3471_vm5, %v8062_v57  ;;  %v4458_v57 = vrot.slane %v10135_v58, 5 }
 0x9ba   :  { %7844 = vmatpush3.bf16.msra.mxu1 %v10025_v8  ;;  %7319 = vmatprep.mubr.msk.f32.mxu1 %vm8159_vm3, %v10596_v54 }
 0x9bb   :  { %7845 = vmatprep.subr.bf16.mxu1 %v8158_v46 }
 0x9be   :  { %7847 = vmatpush3.bf16.msra.mxu1 %v10035_v30 }
 0x9bf   :  { %7854 = vmatprep.subr.bf16.mxu1 %v8158_v46 }
 0xa8c   :  { %v3694_v26 = vpop.f32.mrb[30].mxu1 }
 0xa8d   :  { %v3695_v19 = vadd.f32 %v3694_v26, %v3623_v48  ;;  %v7299_v52 = vpop.f32.mrb[31].mxu1 }
 0xa8e   :  { %v10181_v52 = vld [vmem:[%s10451_s10] sm:$0xff] }
 0xa8f   :  { %8063 = vtanh.f32 %v3695_v19 }
 0xa99   :  { %v8064_v2 = vpop.eup %8063 }
 0xa9a   :  { %7309 = vmatmul.mubr.msk.f32.vlgmr.msra.gmra.mrb[60].mxu0 %vm3471_vm5, %v8064_v2  ;;  %v4687_v2 = vld [vmem:[%s10451_s10 + $0x8] sm:$0xf] }
 0xa9b   :  { %7850 = vmatpush3.bf16.msra.mxu0 %v10025_v8  ;;  %7330 = vmatprep.mubr.msk.f32.mxu0 %vm8159_vm3, %v10596_v54 }
 0xa9c   :  { %7851 = vmatprep.subr.bf16.mxu0 %v8158_v46 }
 0xa9f   :  { %7853 = vmatpush3.bf16.msra.mxu0 %v10035_v30 }
 0xaa0   :  { %7860 = vmatprep.subr.bf16.mxu0 %v8158_v46 }
 0xb6d   :  { %v3770_v28 = vpop.f32.mrb[60].mxu0 }
 0xb6e   :  { %v3771_v62 = vadd.f32 %v3770_v28, %v3699_v12  ;;  %v7310_v53 = vpop.f32.mrb[61].mxu0  ;;  %v7915_v12 = vpack.c.bf16 %v4687_v2, %v10181_v52 }
 0xb6f   :  { %v4534_v53 = vrot.slane %v10135_v58, 6 }
 0xb70   :  { %8065 = vtanh.f32 %v3771_v62  ;;  %v4689_v62 = vrot.slane %v10049_v47, 7 }
 0xb7a   :  { %v8066_v9 = vpop.eup %8065 }
 0xb7b   :  { %7320 = vmatmul.mubr.msk.f32.vlgmr.msra.gmra.mrb[32].mxu1 %vm3471_vm5, %v8066_v9 }
 0xb7c   :  { %7856 = vmatpush3.bf16.msra.mxu1 %v10025_v8  ;;  %7341 = vmatprep.mubr.msk.f32.mxu1 %vm8159_vm3, %v10596_v54 }
 0xb7d   :  { %7857 = vmatprep.subr.bf16.mxu1 %v8158_v46 }
 0xb80   :  { %7859 = vmatpush3.bf16.msra.mxu1 %v10035_v30 }
 0xb81   :  { %7866 = vmatprep.subr.bf16.mxu1 %v8158_v46 }
 0xc4e   :  { %v3846_v18 = vpop.f32.mrb[32].mxu1 }
 0xc4f   :  { %v3847_v4 = vadd.f32 %v3846_v18, %v3775_v24  ;;  %v7321_v15 = vpop.f32.mrb[33].mxu1 }
 0xc51   :  { %8067 = vtanh.f32 %v3847_v4  ;;  %v4688_v4 = vld [vmem:[%s10452_s11] sm:$0x1] }
 0xc5b   :  { %v8068_v44 = vpop.eup %8067 }
 0xc5c   :  { %7331 = vmatmul.mubr.msk.f32.vlgmr.msra.gmra.mrb[62].mxu0 %vm3471_vm5, %v8068_v44 }
 0xc5d   :  { %7862 = vmatpush3.bf16.msra.mxu0 %v10025_v8  ;;  %7352 = vmatprep.mubr.msk.f32.mxu0 %vm8159_vm3, %v10596_v54 }
 0xc5e   :  { %7863 = vmatprep.subr.bf16.mxu0 %v8158_v46 }
 0xc61   :  { %7865 = vmatpush3.bf16.msra.mxu0 %v10035_v30 }
 0xc62   :  { %7872 = vmatprep.subr.bf16.mxu0 %v8158_v46 }
 0xd2f   :  { %v3922_v27 = vpop.f32.mrb[62].mxu0 }
 0xd30   :  { %v3923_v61 = vadd.f32 %v3922_v27, %v3851_v17  ;;  %v7332_v39 = vpop.f32.mrb[63].mxu0  ;;  %v4770_v17 = vld [vmem:[%s10454_s13] sm:$0xff]  ;;  %v4771_v27 = vld [vmem:[%s10454_s13 + $0x8] sm:$0xff] }
 0xd31   :  { %v4772_v39 = vld [vmem:[%s10454_s13 + $0x10] sm:$0xff] }
 0xd32   :  { %8069 = vtanh.f32 %v3923_v61  ;;  %v10207_v61 = vpack.c.bf16 %v4771_v27, %v4770_v17 }
 0xd3c   :  { %v8070_v38 = vpop.eup %8069 }
 0xd3d   :  { %7342 = vmatmul.mubr.msk.f32.vlgmr.msra.gmra.mrb[34].mxu1 %vm3471_vm5, %v8070_v38  ;;  %v4773_v38 = vld [vmem:[%s10454_s13 + $0x18] sm:$0xff] }
 0xd3e   :  { %7868 = vmatpush3.bf16.msra.mxu1 %v10025_v8  ;;  %7363 = vmatprep.mubr.msk.f32.mxu1 %vm8159_vm3, %v10596_v54 }
 0xd3f   :  { %7869 = vmatprep.subr.bf16.mxu1 %v8158_v46 }
 0xd42   :  { %7871 = vmatpush3.bf16.msra.mxu1 %v10035_v30 }
 0xd43   :  { %7878 = vmatprep.subr.bf16.mxu1 %v8158_v46 }
 0xe10   :  { %v3998_v55 = vpop.f32.mrb[34].mxu1 }
 0xe11   :  { %v3999_v50 = vadd.f32 %v3998_v55, %v3927_v11  ;;  %v7343_v23 = vpop.f32.mrb[35].mxu1  ;;  %v10217_v55 = vpack.c.bf16 %v4773_v38, %v4772_v39 }
 0xe12   :  { %v4766_v23 = vld [vmem:[%s10453_s12] sm:$0xff] }
 0xe13   :  { %8071 = vtanh.f32 %v3999_v50 }
 0xe1d   :  { %v8072_v31 = vpop.eup %8071 }
 0xe1e   :  { %7353 = vmatmul.mubr.msk.f32.vlgmr.msra.gmra.mrb[64].mxu0 %vm3471_vm5, %v8072_v31  ;;  %v4767_v31 = vld [vmem:[%s10453_s12 + $0x8] sm:$0xff] }
 0xe1f   :  { %7874 = vmatpush3.bf16.msra.mxu0 %v10025_v8  ;;  %7374 = vmatprep.mubr.msk.f32.mxu0 %vm8159_vm3, %v10596_v54 }
 0xe20   :  { %7875 = vmatprep.subr.bf16.mxu0 %v8158_v46 }
 0xe23   :  { %7877 = vmatpush3.bf16.msra.mxu0 %v10035_v30 }
 0xe24   :  { %7884 = vmatprep.subr.bf16.mxu0 %v8158_v46 }
 0xef1   :  { %v4074_v16 = vpop.f32.mrb[64].mxu0 }
 0xef2   :  { %v4075_v5 = vadd.f32 %v4074_v16, %v4003_v45  ;;  %v7354_v51 = vpop.f32.mrb[65].mxu0  ;;  %v10237_v45 = vpack.c.bf16 %v4767_v31, %v4766_v23  ;;  %v4769_v16 = vld [vmem:[%s10453_s12 + $0x18] sm:$0xff] }
 0xef4   :  { %8073 = vtanh.f32 %v4075_v5  ;;  %v4940_v5 = vpop.trf.xlu1 }
 0xefe   :  { %v8074_v6 = vpop.eup %8073 }
 0xeff   :  { %7364 = vmatmul.mubr.msk.f32.vlgmr.msra.gmra.mrb[36].mxu1 %vm3471_vm5, %v8074_v6  ;;  %v10252_v6 = vpop.trf.xlu1 }
 0xf00   :  { %7880 = vmatpush3.bf16.msra.mxu1 %v10025_v8  ;;  %7385 = vmatprep.mubr.msk.f32.mxu1 %vm8159_vm3, %v10596_v54 }
 0xf01   :  { %7881 = vmatprep.subr.bf16.mxu1 %v8158_v46 }
 0xf04   :  { %7883 = vmatpush3.bf16.msra.mxu1 %v10035_v30 }
 0xf05   :  { %7890 = vmatprep.subr.bf16.mxu1 %v8158_v46 }
 0xfd2   :  { %v4148_v3 = vpop.f32.mrb[36].mxu1 }
 0xfd3   :  { %v4149_v41 = vadd.f32 %v4148_v3, %v10135_v58  ;;  %v7365_v21 = vpop.f32.mrb[37].mxu1  ;;  %v4610_v3 = vrot.slane %v10135_v58, 7 }
 0xfd5   :  { %8075 = vtanh.f32 %v4149_v41 }
 0xfdf   :  { %v8076_v7 = vpop.eup %8075 }
 0xfe0   :  { %7375 = vmatmul.mubr.msk.f32.vlgmr.msra.gmra.mrb[66].mxu0 %vm3471_vm5, %v8076_v7 }
 0xfe1   :  { %7886 = vmatpush3.bf16.msra.mxu0 %v10025_v8  ;;  %7396 = vmatprep.mubr.msk.f32.mxu0 %vm8159_vm3, %v10596_v54 }
 0xfe2   :  { %7887 = vmatprep.subr.bf16.mxu0 %v8158_v46 }
 0xfe5   :  { %7889 = vmatpush3.bf16.msra.mxu0 %v10035_v30 }
 0xfe6   :  { %7896 = vmatprep.subr.bf16.mxu0 %v8158_v46 }
0x10b3   :  { %v4225_v59 = vpop.f32.mrb[66].mxu0 }
0x10b4   :  { %v4226_v49 = vadd.f32 %v4225_v59, %v4154_v20  ;;  %v7376_v25 = vpop.f32.mrb[67].mxu0 }
0x10b6   :  { %8077 = vtanh.f32 %v4226_v49 }
0x10c0   :  { %v8078_v22 = vpop.eup %8077 }
0x10c1   :  { %7386 = vmatmul.mubr.msk.f32.vlgmr.msra.gmra.mrb[38].mxu1 %vm3471_vm5, %v8078_v22 }
0x10c2   :  { %7892 = vmatpush3.bf16.msra.mxu1 %v10025_v8  ;;  %7407 = vmatprep.mubr.msk.f32.mxu1 %vm8159_vm3, %v10596_v54 }
0x10c3   :  { %7893 = vmatprep.subr.bf16.mxu1 %v8158_v46 }
0x10c6   :  { %7895 = vmatpush3.bf16.msra.mxu1 %v10035_v30 }
0x10c7   :  { %7902 = vmatprep.subr.bf16.mxu1 %v8158_v46 }
0x1194   :  { %v4301_v36 = vpop.f32.mrb[38].mxu1 }
0x1195   :  { %v4302_v32 = vadd.f32 %v4301_v36, %v4230_v33  ;;  %v7387_v60 = vpop.f32.mrb[39].mxu1  ;;  %v4920_v33 = vld [vmem:[%s10455_s14] sm:$0x1] }
0x1197   :  { %8079 = vtanh.f32 %v4302_v32 }
0x11a1   :  { %v8080_v14 = vpop.eup %8079 }
0x11a2   :  { %7397 = vmatmul.mubr.msk.f32.vlgmr.msra.gmra.mrb[68].mxu0 %vm3471_vm5, %v8080_v14 }
0x11a3   :  { %7898 = vmatpush3.bf16.msra.mxu0 %v10025_v8  ;;  %7418 = vmatprep.mubr.msk.f32.mxu0 %vm8159_vm3, %v10596_v54 }
0x11a4   :  { %7899 = vmatprep.subr.bf16.mxu0 %v8158_v46 }
0x11a7   :  { %7901 = vmatpush3.bf16.msra.mxu0 %v10035_v30 }
0x11a8   :  { %7908 = vmatprep.subr.bf16.mxu0 %v8158_v46 }
0x1275   :  { %v4377_v34 = vpop.f32.mrb[68].mxu0 }
0x1276   :  { %v4378_v13 = vadd.f32 %v4377_v34, %v4306_v29  ;;  %v7398_v40 = vpop.f32.mrb[69].mxu0 }
0x1278   :  { %8081 = vtanh.f32 %v4378_v13 }
0x1282   :  { %v8082_v42 = vpop.eup %8081 }
0x1283   :  { %7408 = vmatmul.mubr.msk.f32.vlgmr.msra.gmra.mrb[40].mxu1 %vm3471_vm5, %v8082_v42 }
0x1284   :  { %7904 = vmatpush3.bf16.msra.mxu1 %v10025_v8  ;;  %7429 = vmatprep.mubr.msk.f32.mxu1 %vm8159_vm3, %v10596_v54 }
0x1285   :  { %7905 = vmatprep.subr.bf16.mxu1 %v8158_v46 }
0x1288   :  { %7907 = vmatpush3.bf16.msra.mxu1 %v10035_v30 }
0x1289   :  { %7914 = vmatprep.subr.bf16.mxu1 %v8158_v46 }
0x1356   :  { %v4453_v37 = vpop.f32.mrb[40].mxu1 }
0x1357   :  { %v4454_v1 = vadd.f32 %v4453_v37, %v4382_v0  ;;  %v7409_v43 = vpop.f32.mrb[41].mxu1 }
0x1359   :  { %8083 = vtanh.f32 %v4454_v1 }
0x1363   :  { %v8084_v10 = vpop.eup %8083 }
0x1364   :  { %7419 = vmatmul.mubr.msk.f32.vlgmr.msra.gmra.mrb[70].mxu0 %vm3471_vm5, %v8084_v10 }
0x1365   :  { %7910 = vmatpush3.bf16.msra.mxu0 %v10025_v8  ;;  %7440 = vmatprep.mubr.msk.f32.mxu0 %vm8159_vm3, %v10596_v54 }
0x1366   :  { %7911 = vmatprep.subr.bf16.mxu0 %v8158_v46 }
0x1369   :  { %7913 = vmatpush3.bf16.msra.mxu0 %v10035_v30 }
0x136a   :  { %7918 = vmatprep.subr.bf16.mxu0 %v8158_v46 }
0x1437   :  { %v4529_v48 = vpop.f32.mrb[70].mxu0 }
0x1438   :  { %v4530_v26 = vadd.f32 %v4529_v48, %v4458_v57  ;;  %v7420_v19 = vpop.f32.mrb[71].mxu0 }
0x143a   :  { %8085 = vtanh.f32 %v4530_v26 }
0x1444   :  { %v8086_v28 = vpop.eup %8085 }
0x1445   :  { %7430 = vmatmul.mubr.msk.f32.vlgmr.msra.gmra.mrb[42].mxu1 %vm3471_vm5, %v8086_v28 }
0x1446   :  { %7917 = vmatpush3.bf16.msk.msra.mxu1 %vm9987_vm2, %v7915_v12  ;;  %7447 = vmatprep.mubr.msk.f32.mxu1 %vm8159_vm3, %v10596_v54 }
0x1447   :  { %7924 = vmatprep.subr.bf16.mxu1 %v8158_v46 }
0x1449   :  { %7448 = vmatmul.mubr.msk.f32.vlgmr.msra.gmra.mrb[44].mxu1 %vm3386_vm4, %v4689_v62 }
0x144a   :  { %7469 = vmatprep.mubr.msk.f32.mxu1 %vm8159_vm3, %v10596_v54  ;;  %7926 = vmatpush3.bf16.msra.mxu1 %v10237_v45 }
0x144b   :  { %7927 = vmatprep.subr.bf16.mxu1 %v8158_v46 }
0x1518   :  { %v4605_v9 = vpop.f32.mrb[42].mxu1 }
0x1519   :  { %v4606_v24 = vadd.f32 %v4605_v9, %v4534_v53  ;;  %v7431_v18 = vpop.f32.mrb[43].mxu1 }
0x151b   :  { %8087 = vtanh.f32 %v4606_v24 }
0x151c   :  { %v4761_v15 = vpop.f32.mrb[44].mxu1 }
0x151d   :  { %v7449_v44 = vpop.f32.mrb[45].mxu1  ;;  %v4762_v47 = vadd.f32 %v4761_v15, %v4688_v4 }
0x151f   :  { %8089 = vtanh.f32 %v4762_v47 }
0x1525   :  { %v8088_v11 = vpop.eup %8087 }
0x1526   :  { %7441 = vmatmul.mubr.msk.f32.vlgmr.msra.gmra.mrb[72].mxu0 %vm3471_vm5, %v8088_v11 }
0x1527   :  { %7920 = vmatpush3.bf16.msra.mxu0 %v10207_v61  ;;  %7458 = vmatprep.mubr.msk.f32.mxu0 %vm8159_vm3, %v10596_v54 }
0x1528   :  { %7921 = vmatprep.subr.bf16.mxu0 %v8158_v46 }
0x1529   :  { %v8090_v50 = vpop.eup %8089 }
0x152b   :  { %7923 = vmatpush3.bf16.msra.mxu0 %v10217_v55 }
0x152c   :  { %7932 = vmatprep.subr.msk.bf16.mxu0 %vm9987_vm2, %v9997_v35 }
0x152e   :  { %7459 = vmatmul.mubr.msk.f32.vlgmr.msra.gmra.mrb[74].mxu0 %vm3471_vm5, %v8090_v50 }
0x152f   :  { %7935 = vmatpush3.bf16.msk.msra.mxu0 %vm9987_vm2, %v9997_v35  ;;  %v4768_v35 = vld [vmem:[%s10453_s12 + $0x10] sm:$0xff]  ;;  %7476 = vmatprep.mubr.msk.f32.mxu0 %vm3386_vm4, %v4940_v5 }
0x1530   :  { %7942 = vmatprep.subr.bf16.mxu0 %v8158_v46  ;;  %v10247_v51 = vpack.c.bf16 %v4769_v16, %v4768_v35 }
0x1532   :  { %7929 = vmatpush3.bf16.msra.mxu1 %v10247_v51  ;;  %7477 = vmatmul.mubr.msk.f32.vlgmr.msra.gmra.mrb[76].mxu0 %vm3386_vm4, %v10252_v6 }
0x1533   :  { %7936 = vmatprep.subr.bf16.mxu1 %v8158_v46  ;;  %7944 = vmatpush3.bf16.msra.mxu0 %v10025_v8 }
0x1534   :  { %7498 = vmatprep.mubr.msk.f32.mxu0 %vm8159_vm3, %v10596_v54  ;;  %7945 = vmatprep.subr.bf16.mxu0 %v8158_v46 }
0x1537   :  { %7947 = vmatpush3.bf16.msra.mxu0 %v10035_v30 }
0x1538   :  { %7954 = vmatprep.subr.bf16.mxu0 %v8158_v46 }
0x15f9   :  { %v4681_v41 = vpop.f32.mrb[72].mxu0 }
0x15fa   :  { %v4682_v21 = vadd.f32 %v4681_v41, %v4610_v3  ;;  %v7442_v7 = vpop.f32.mrb[73].mxu0 }
0x15fc   :  { %8091 = vtanh.f32 %v4682_v21 }
0x1601   :  { %v4843_v20 = vpop.f32.mrb[74].mxu0 }
0x1602   :  { %v7460_v59 = vpop.f32.mrb[75].mxu0 }
0x1605   :  { %v10277_v58 = vpop.f32.mrb[76].mxu0 }
0x1606   :  { %v8092_v49 = vpop.eup %8091  ;;  %v5028_v25 = vpop.f32.mrb[77].mxu0  ;;  %v10352_v21 = vadd.f32 %v10277_v58, %v10062_v63 }
0x1607   :  { %7470 = vmatmul.mubr.msk.f32.vlgmr.msra.gmra.mrb[46].mxu1 %vm3471_vm5, %v8092_v49  ;;  %v10284_v14 = vadd.f32 %v10062_v63, %v5028_v25 }
0x1608   :  { %7938 = vmatpush3.bf16.msra.mxu1 %v10025_v8  ;;  %7487 = vmatprep.mubr.msk.f32.mxu1 %vm8159_vm3, %v10596_v54  ;;  %v5716_v63 = vrot.slane %v10352_v21, 1  ;;  %v6096_v56 = vrot.slane %v10352_v21, 6 }
0x1609   :  { %7939 = vmatprep.subr.bf16.mxu1 %v8158_v46  ;;  %v5109_v42 = vrot.slane %v10284_v14, 1  ;;  %v5185_v10 = vrot.slane %v10284_v14, 2  ;;  %v5261_v2 = vrot.slane %v10284_v14, 3  ;;  %v5337_v9 = vrot.slane %v10284_v14, 4 }
0x160a   :  { %v5413_v44 = vrot.slane %v10284_v14, 5  ;;  %v5489_v38 = vrot.slane %v10284_v14, 6  ;;  %v5565_v35 = vrot.slane %v10284_v14, 7 }
0x160c   :  { %7941 = vmatpush3.bf16.msra.mxu1 %v10035_v30 }
0x160d   :  { %7948 = vmatprep.subr.bf16.mxu1 %v8158_v46 }
0x160f   :  { %7488 = vmatmul.mubr.f32.vlgmr.msra.gmra.mrb[48].mxu1 %v10596_v54 }
0x1610   :  { %7950 = vmatpush3.bf16.msra.mxu1 %v10025_v8  ;;  %7509 = vmatprep.mubr.msk.f32.mxu1 %vm8159_vm3, %v10596_v54 }
0x1611   :  { %7951 = vmatprep.subr.bf16.mxu1 %v8158_v46 }
0x1614   :  { %7953 = vmatpush3.bf16.msra.mxu1 %v10035_v30 }
0x1615   :  { %7960 = vmatprep.subr.bf16.mxu1 %v8158_v46 }
0x16da   :  { %v4916_v22 = vpop.f32.mrb[46].mxu1 }
0x16db   :  { %v4917_v36 = vadd.f32 %v4916_v22, %v4843_v20  ;;  %v7471_v32 = vpop.f32.mrb[47].mxu1 }
0x16dd   :  { %v4921_v60 = vadd.f32 %v4920_v33, %v4917_v36  ;;  %v5792_v36 = vrot.slane %v10352_v21, 2 }
0x16df   :  { %4923 = vst.msk [vmem:[#allocation2] sm:$0x1] %vm4922_vm10, %v4921_v60 }
0x16e2   :  { %v5103_v29 = vpop.f32.mrb[48].mxu1 }
0x16e3   :  { %v5104_v34 = vadd.f32 %v5103_v29, %v10284_v14  ;;  %v7489_v13 = vpop.f32.mrb[49].mxu1 }
0x16e5   :  { %8093 = vtanh.f32 %v5104_v34  ;;  %v5868_v34 = vrot.slane %v10352_v21, 3 }
0x16ef   :  { %v8094_v40 = vpop.eup %8093 }
0x16f0   :  { %7499 = vmatmul.mubr.msk.f32.vlgmr.msra.gmra.mrb[78].mxu0 %vm3471_vm5, %v8094_v40 }
0x16f1   :  { %7956 = vmatpush3.bf16.msra.mxu0 %v10025_v8  ;;  %7520 = vmatprep.mubr.msk.f32.mxu0 %vm8159_vm3, %v10596_v54 }
0x16f2   :  { %7957 = vmatprep.subr.bf16.mxu0 %v8158_v46 }
0x16f5   :  { %7959 = vmatpush3.bf16.msra.mxu0 %v10035_v30 }
0x16f6   :  { %7966 = vmatprep.subr.bf16.mxu0 %v8158_v46 }
0x17c3   :  { %v5180_v0 = vpop.f32.mrb[78].mxu0 }
0x17c4   :  { %v5181_v37 = vadd.f32 %v5180_v0, %v5109_v42  ;;  %v7500_v1 = vpop.f32.mrb[79].mxu0 }
0x17c6   :  { %8095 = vtanh.f32 %v5181_v37  ;;  %v5944_v37 = vrot.slane %v10352_v21, 4 }
0x17d0   :  { %v8096_v43 = vpop.eup %8095 }
0x17d1   :  { %7510 = vmatmul.mubr.msk.f32.vlgmr.msra.gmra.mrb[50].mxu1 %vm3471_vm5, %v8096_v43 }
0x17d2   :  { %7962 = vmatpush3.bf16.msra.mxu1 %v10025_v8  ;;  %7531 = vmatprep.mubr.msk.f32.mxu1 %vm8159_vm3, %v10596_v54 }
0x17d3   :  { %7963 = vmatprep.subr.bf16.mxu1 %v8158_v46 }
0x17d6   :  { %7965 = vmatpush3.bf16.msra.mxu1 %v10035_v30 }
0x17d7   :  { %7972 = vmatprep.subr.bf16.mxu1 %v8158_v46 }
0x18a4   :  { %v5256_v57 = vpop.f32.mrb[50].mxu1 }
0x18a5   :  { %v5257_v48 = vadd.f32 %v5256_v57, %v5185_v10  ;;  %v7511_v26 = vpop.f32.mrb[51].mxu1 }
0x18a7   :  { %8097 = vtanh.f32 %v5257_v48  ;;  %v6020_v48 = vrot.slane %v10352_v21, 5 }
0x18b1   :  { %v8098_v19 = vpop.eup %8097 }
0x18b2   :  { %7521 = vmatmul.mubr.msk.f32.vlgmr.msra.gmra.mrb[80].mxu0 %vm3471_vm5, %v8098_v19 }
0x18b3   :  { %7968 = vmatpush3.bf16.msra.mxu0 %v10025_v8  ;;  %7542 = vmatprep.mubr.msk.f32.mxu0 %vm8159_vm3, %v10596_v54 }
0x18b4   :  { %7969 = vmatprep.subr.bf16.mxu0 %v8158_v46 }
0x18b7   :  { %7971 = vmatpush3.bf16.msra.mxu0 %v10035_v30 }
0x18b8   :  { %7978 = vmatprep.subr.bf16.mxu0 %v8158_v46 }
0x1985   :  { %v5332_v12 = vpop.f32.mrb[80].mxu0 }
0x1986   :  { %v5333_v28 = vadd.f32 %v5332_v12, %v5261_v2  ;;  %v7522_v62 = vpop.f32.mrb[81].mxu0  ;;  %v6249_v12 = vld [vmem:[%s10451_s10 + $0x8] sm:$0xf] }
0x1988   :  { %8099 = vtanh.f32 %v5333_v28 }
0x1992   :  { %v8100_v53 = vpop.eup %8099 }
0x1993   :  { %7532 = vmatmul.mubr.msk.f32.vlgmr.msra.gmra.mrb[52].mxu1 %vm3471_vm5, %v8100_v53 }
0x1994   :  { %7974 = vmatpush3.bf16.msra.mxu1 %v10025_v8  ;;  %7553 = vmatprep.mubr.msk.f32.mxu1 %vm8159_vm3, %v10596_v54 }
0x1995   :  { %7975 = vmatprep.subr.bf16.mxu1 %v8158_v46 }
0x1998   :  { %7977 = vmatpush3.bf16.msra.mxu1 %v10035_v30 }
0x1999   :  { %7984 = vmatprep.subr.bf16.mxu1 %v8158_v46 }
0x1a66   :  { %v5408_v24 = vpop.f32.mrb[52].mxu1 }
0x1a67   :  { %v5409_v18 = vadd.f32 %v5408_v24, %v5337_v9  ;;  %v7533_v4 = vpop.f32.mrb[53].mxu1 }
0x1a68   :  { %v6172_v4 = vrot.slane %v10352_v21, 7 }
0x1a69   :  { %8101 = vtanh.f32 %v5409_v18 }
0x1a73   :  { %v8102_v15 = vpop.eup %8101 }
0x1a74   :  { %7543 = vmatmul.mubr.msk.f32.vlgmr.msra.gmra.mrb[82].mxu0 %vm3471_vm5, %v8102_v15 }
0x1a75   :  { %7980 = vmatpush3.bf16.msra.mxu0 %v10025_v8  ;;  %7564 = vmatprep.mubr.msk.f32.mxu0 %vm8159_vm3, %v10596_v54 }
0x1a76   :  { %7981 = vmatprep.subr.bf16.mxu0 %v8158_v46 }
0x1a79   :  { %7983 = vmatpush3.bf16.msra.mxu0 %v10035_v30 }
0x1a7a   :  { %7990 = vmatprep.subr.bf16.mxu0 %v8158_v46 }
0x1b47   :  { %v5484_v47 = vpop.f32.mrb[82].mxu0 }
0x1b48   :  { %v5485_v17 = vadd.f32 %v5484_v47, %v5413_v44  ;;  %v7544_v27 = vpop.f32.mrb[83].mxu0 }
0x1b4a   :  { %8103 = vtanh.f32 %v5485_v17 }
0x1b54   :  { %v8104_v39 = vpop.eup %8103 }
0x1b55   :  { %7554 = vmatmul.mubr.msk.f32.vlgmr.msra.gmra.mrb[54].mxu1 %vm3471_vm5, %v8104_v39 }
0x1b56   :  { %7986 = vmatpush3.bf16.msra.mxu1 %v10025_v8  ;;  %7575 = vmatprep.mubr.msk.f32.mxu1 %vm8159_vm3, %v10596_v54 }
0x1b57   :  { %7987 = vmatprep.subr.bf16.mxu1 %v8158_v46 }
0x1b5a   :  { %7989 = vmatpush3.bf16.msra.mxu1 %v10035_v30 }
0x1b5b   :  { %7996 = vmatprep.subr.bf16.mxu1 %v8158_v46 }
0x1c28   :  { %v5560_v11 = vpop.f32.mrb[54].mxu1 }
0x1c29   :  { %v5561_v50 = vadd.f32 %v5560_v11, %v5489_v38  ;;  %v7555_v23 = vpop.f32.mrb[55].mxu1 }
0x1c2b   :  { %8105 = vtanh.f32 %v5561_v50 }
0x1c35   :  { %v8106_v31 = vpop.eup %8105 }
0x1c36   :  { %7565 = vmatmul.mubr.msk.f32.vlgmr.msra.gmra.mrb[84].mxu0 %vm3471_vm5, %v8106_v31 }
0x1c37   :  { %7992 = vmatpush3.bf16.msra.mxu0 %v10025_v8  ;;  %7586 = vmatprep.mubr.msk.f32.mxu0 %vm8159_vm3, %v10596_v54 }
0x1c38   :  { %7993 = vmatprep.subr.bf16.mxu0 %v8158_v46 }
0x1c3b   :  { %7995 = vmatpush3.bf16.msra.mxu0 %v10035_v30 }
0x1c3c   :  { %8002 = vmatprep.subr.bf16.mxu0 %v8158_v46 }
0x1d09   :  { %v5636_v16 = vpop.f32.mrb[84].mxu0 }
0x1d0a   :  { %v5637_v5 = vadd.f32 %v5636_v16, %v5565_v35  ;;  %v7566_v3 = vpop.f32.mrb[85].mxu0 }
0x1d0c   :  { %8107 = vtanh.f32 %v5637_v5 }
0x1d16   :  { %v8108_v41 = vpop.eup %8107 }
0x1d17   :  { %7576 = vmatmul.mubr.msk.f32.vlgmr.msra.gmra.mrb[56].mxu1 %vm3471_vm5, %v8108_v41 }
0x1d18   :  { %7998 = vmatpush3.bf16.msra.mxu1 %v10025_v8  ;;  %7597 = vmatprep.mubr.msk.f32.mxu1 %vm8159_vm3, %v10596_v54 }
0x1d19   :  { %7999 = vmatprep.subr.bf16.mxu1 %v8158_v46 }
0x1d1c   :  { %8001 = vmatpush3.bf16.msra.mxu1 %v10035_v30 }
0x1d1d   :  { %8008 = vmatprep.subr.bf16.mxu1 %v8158_v46 }
0x1dea   :  { %v5710_v7 = vpop.f32.mrb[56].mxu1 }
0x1deb   :  { %v5711_v20 = vadd.f32 %v5710_v7, %v10352_v21  ;;  %v7577_v59 = vpop.f32.mrb[57].mxu1 }
0x1ded   :  { %8109 = vtanh.f32 %v5711_v20 }
0x1df7   :  { %v8110_v49 = vpop.eup %8109 }
0x1df8   :  { %7587 = vmatmul.mubr.msk.f32.vlgmr.msra.gmra.mrb[86].mxu0 %vm3471_vm5, %v8110_v49 }
0x1df9   :  { %8004 = vmatpush3.bf16.msra.mxu0 %v10025_v8  ;;  %7608 = vmatprep.mubr.msk.f32.mxu0 %vm8159_vm3, %v10596_v54 }
0x1dfa   :  { %8005 = vmatprep.subr.bf16.mxu0 %v8158_v46 }
0x1dfd   :  { %8007 = vmatpush3.bf16.msra.mxu0 %v10035_v30 }
0x1dfe   :  { %8014 = vmatprep.subr.bf16.mxu0 %v8158_v46 }
0x1ecb   :  { %v5787_v58 = vpop.f32.mrb[86].mxu0 }
0x1ecc   :  { %v5788_v25 = vadd.f32 %v5787_v58, %v5716_v63  ;;  %v7588_v22 = vpop.f32.mrb[87].mxu0 }
0x1ece   :  { %8111 = vtanh.f32 %v5788_v25 }
0x1ed8   :  { %v8112_v33 = vpop.eup %8111 }
0x1ed9   :  { %7598 = vmatmul.mubr.msk.f32.vlgmr.msra.gmra.mrb[58].mxu1 %vm3471_vm5, %v8112_v33 }
0x1eda   :  { %8010 = vmatpush3.bf16.msra.mxu1 %v10025_v8  ;;  %7619 = vmatprep.mubr.msk.f32.mxu1 %vm8159_vm3, %v10596_v54 }
0x1edb   :  { %8011 = vmatprep.subr.bf16.mxu1 %v8158_v46 }
0x1ede   :  { %8013 = vmatpush3.bf16.msra.mxu1 %v10035_v30 }
0x1edf   :  { %8020 = vmatprep.subr.bf16.mxu1 %v8158_v46 }
0x1fac   :  { %v5863_v32 = vpop.f32.mrb[58].mxu1 }
0x1fad   :  { %v5864_v60 = vadd.f32 %v5863_v32, %v5792_v36  ;;  %v7599_v14 = vpop.f32.mrb[59].mxu1 }
0x1faf   :  { %8113 = vtanh.f32 %v5864_v60 }
0x1fb9   :  { %v8114_v29 = vpop.eup %8113 }
0x1fba   :  { %7609 = vmatmul.mubr.msk.f32.vlgmr.msra.gmra.mrb[88].mxu0 %vm3471_vm5, %v8114_v29 }
0x1fbb   :  { %8016 = vmatpush3.bf16.msra.mxu0 %v10025_v8  ;;  %7630 = vmatprep.mubr.msk.f32.mxu0 %vm8159_vm3, %v10596_v54 }
0x1fbc   :  { %8017 = vmatprep.subr.bf16.mxu0 %v8158_v46 }
0x1fbf   :  { %8019 = vmatpush3.bf16.msra.mxu0 %v10035_v30 }
0x1fc0   :  { %8026 = vmatprep.subr.bf16.mxu0 %v8158_v46 }
0x208d   :  { %v5939_v13 = vpop.f32.mrb[88].mxu0 }
0x208e   :  { %v5940_v40 = vadd.f32 %v5939_v13, %v5868_v34  ;;  %v7610_v42 = vpop.f32.mrb[89].mxu0 }
0x2090   :  { %8115 = vtanh.f32 %v5940_v40 }
0x209a   :  { %v8116_v0 = vpop.eup %8115 }
0x209b   :  { %7620 = vmatmul.mubr.msk.f32.vlgmr.msra.gmra.mrb[60].mxu1 %vm3471_vm5, %v8116_v0 }
0x209c   :  { %8022 = vmatpush3.bf16.msra.mxu1 %v10025_v8  ;;  %7641 = vmatprep.mubr.msk.f32.mxu1 %vm8159_vm3, %v10596_v54 }
0x209d   :  { %8023 = vmatprep.subr.bf16.mxu1 %v8158_v46 }
0x20a0   :  { %8025 = vmatpush3.bf16.msra.mxu1 %v10035_v30 }
0x20a1   :  { %8032 = vmatprep.subr.bf16.mxu1 %v8158_v46 }
0x216e   :  { %v6015_v1 = vpop.f32.mrb[60].mxu1 }
0x216f   :  { %v6016_v43 = vadd.f32 %v6015_v1, %v5944_v37  ;;  %v7621_v10 = vpop.f32.mrb[61].mxu1 }
0x2171   :  { %8117 = vtanh.f32 %v6016_v43 }
0x217b   :  { %v8118_v57 = vpop.eup %8117 }
0x217c   :  { %7631 = vmatmul.mubr.msk.f32.vlgmr.msra.gmra.mrb[90].mxu0 %vm3471_vm5, %v8118_v57 }
0x217d   :  { %8028 = vmatpush3.bf16.msra.mxu0 %v10025_v8  ;;  %7652 = vmatprep.mubr.msk.f32.mxu0 %vm8159_vm3, %v10596_v54  ;;  %v8033_v8 = vpack.c.bf16 %v6249_v12, %v10181_v52 }
0x217e   :  { %8029 = vmatprep.subr.bf16.mxu0 %v8158_v46 }
0x2181   :  { %8031 = vmatpush3.bf16.msra.mxu0 %v10035_v30  ;;  %v6251_v30 = vrot.slane %v10252_v6, 7  ;;  %v6250_v6 = vld [vmem:[%s10452_s11] sm:$0x1] }
0x2182   :  { %8036 = vmatprep.subr.bf16.mxu0 %v8158_v46 }
0x224f   :  { %v6091_v26 = vpop.f32.mrb[90].mxu0 }
0x2250   :  { %v6092_v19 = vadd.f32 %v6091_v26, %v6020_v48  ;;  %v7632_v2 = vpop.f32.mrb[91].mxu0 }
0x2252   :  { %8119 = vtanh.f32 %v6092_v19 }
0x225c   :  { %v8120_v28 = vpop.eup %8119 }
0x225d   :  { %7642 = vmatmul.mubr.msk.f32.vlgmr.msra.gmra.mrb[62].mxu1 %vm3471_vm5, %v8120_v28 }
0x225e   :  { %8035 = vmatpush3.bf16.msk.msra.mxu1 %vm9987_vm2, %v8033_v8  ;;  %7659 = vmatprep.mubr.msk.f32.mxu1 %vm8159_vm3, %v10596_v54 }
0x225f   :  { %8042 = vmatprep.subr.bf16.mxu1 %v8158_v46 }
0x2261   :  { %7660 = vmatmul.mubr.msk.f32.vlgmr.msra.gmra.mrb[64].mxu1 %vm3386_vm4, %v6251_v30 }
0x2262   :  { %8044 = vmatpush3.bf16.msra.mxu1 %v10237_v45  ;;  %7681 = vmatprep.mubr.msk.f32.mxu1 %vm8159_vm3, %v10596_v54 }
0x2263   :  { %8045 = vmatprep.subr.bf16.mxu1 %v8158_v46 }
0x2266   :  { %8047 = vmatpush3.bf16.msra.mxu1 %v10247_v51 }
0x2330   :  { %v6167_v52 = vpop.f32.mrb[62].mxu1 }
0x2331   :  { %v6168_v62 = vadd.f32 %v6167_v52, %v6096_v56  ;;  %v7643_v53 = vpop.f32.mrb[63].mxu1 }
0x2333   :  { %8121 = vtanh.f32 %v6168_v62 }
0x2334   :  { %v6323_v9 = vpop.f32.mrb[64].mxu1 }
0x2335   :  { %v7661_v24 = vpop.f32.mrb[65].mxu1  ;;  %v6324_v45 = vadd.f32 %v6323_v9, %v6250_v6 }
0x2337   :  { %8123 = vtanh.f32 %v6324_v45 }
0x233d   :  { %v8122_v18 = vpop.eup %8121 }
0x233e   :  { %7653 = vmatmul.mubr.msk.f32.vlgmr.msra.gmra.mrb[92].mxu0 %vm3471_vm5, %v8122_v18 }
0x233f   :  { %8038 = vmatpush3.bf16.msra.mxu0 %v10207_v61  ;;  %7670 = vmatprep.mubr.msk.f32.mxu0 %vm8159_vm3, %v10596_v54  ;;  %v6482_v54 = vld [vmem:[%s10455_s14] sm:$0x1] }
0x2340   :  { %8039 = vmatprep.subr.bf16.mxu0 %v8158_v46 }
0x2341   :  { %v8124_v51 = vpop.eup %8123 }
0x2343   :  { %8041 = vmatpush3.bf16.msra.mxu0 %v10217_v55 }
0x2346   :  { %7671 = vmatmul.mubr.msk.f32.vlgmr.msra.gmra.mrb[94].mxu0 %vm3471_vm5, %v8124_v51 }
0x2411   :  { %v6243_v15 = vpop.f32.mrb[92].mxu0 }
0x2412   :  { %v6244_v44 = vadd.f32 %v6243_v15, %v6172_v4  ;;  %v7654_v47 = vpop.f32.mrb[93].mxu0 }
0x2414   :  { %8125 = vtanh.f32 %v6244_v44 }
0x2419   :  { %v6405_v17 = vpop.f32.mrb[94].mxu0 }
0x241a   :  { %v7672_v27 = vpop.f32.mrb[95].mxu0 }
0x241e   :  { %v8126_v39 = vpop.eup %8125 }
0x241f   :  { %7682 = vmatmul.mubr.msk.f32.vlgmr.msra.gmra.mrb[66].mxu1 %vm3471_vm5, %v8126_v39 }
0x24f2   :  { %v6478_v61 = vpop.f32.mrb[66].mxu1 }
0x24f3   :  { %v6479_v46 = vadd.f32 %v6478_v61, %v6405_v17  ;;  %v7683_v55 = vpop.f32.mrb[67].mxu1 }
0x24f5   :  { %v6483_v38 = vadd.f32 %v6482_v54, %v6479_v46 }
0x24f7   :  { %6485 = vst.msk [vmem:[#allocation2 + $0x1] sm:$0x1] %vm4922_vm10, %v6483_v38 }
0x24f8   :  { %8139 = shalt.err (!%p8136_p4)
}
0x24f9   :  { %s8140_s30 = scalar_lea.hbm %s10456_s15, 32 }
0x24fa   :  { %p8141_p5 = scmp.ne.s32.totalorder %s10456_s15, %s8140_s30  ;;  %p8144_p6 = scmp.lt.u32.totalorder %s8140_s30, %s10456_s15 }
0x24fc   :  { %p8146_p7 = pnand %p8144_p6, %p8141_p5 }
0x24fe   :  { %8149 = shalt.err (!%p8146_p7)
}
0x24ff   :  { %s8161_s18 = smov 16   ;;  %s8162_s6 = smov 1  }
0x2500   :  { %6497 = dma.vmem_to_hbm [thread:$0]  %s6492_s28, 32, %s10456_s15, [#allocation3], %s8161_s18, %s8161_s18, %s8162_s6  }
0x2501   :  { %8150 = dma.done.wait [#allocation3], 32  }
0x2502   :  { %8151 = vsyncadd [#allocation3], 4294967264 }
0x2503   :  { %6501 = vsyncpa [#allocation3], 1 }

</bundles_post_ra>
